<compile_context>
chip_gen: v5e
topology: v5e:2x2
jax: 0.10.0
libtpu: 0.0.40
codegen_flags: <defaults>
</compile_context>

<pallas_src>
import functools
import math

import jax
import jax.numpy as jnp
from jax.experimental import pallas as pl
from jax.experimental.pallas import tpu as pltpu


# ------------------------------ tiling helpers ------------------------------

_TM, _TN, _TK = 256, 512, 512          # MXU-friendly caps (multiples of 8/128)


def _ceil_to(x, m):
    return ((x + m - 1) // m) * m


def _choose_tile(dim, target, align):
    """Pad `dim` to a multiple of `align`; pick a tile <= target dividing it."""
    p = _ceil_to(dim, align)
    if p <= target:
        return p, p
    return _ceil_to(dim, target), target


def _pad2d(a, rows, cols):
    return jnp.pad(a, ((0, rows - a.shape[0]), (0, cols - a.shape[1])))


# --------------------------- fused matmul kernel -----------------------------

def _fused_matmul_kernel(*refs, activation, fuse_res_ln, true_n, ln_eps):
    if fuse_res_ln:
        x_ref, w_ref, b_ref, r_ref, g_ref, bb_ref, o_ref, acc_ref = refs
    else:
        x_ref, w_ref, b_ref, o_ref, acc_ref = refs

    k = pl.program_id(2)

    @pl.when(k == 0)
    def _():
        acc_ref[...] = jnp.zeros(acc_ref.shape, jnp.float32)

    acc_ref[...] += jnp.dot(x_ref[...], w_ref[...],
                            preferred_element_type=jnp.float32)

    @pl.when(k == pl.num_programs(2) - 1)
    def _():
        y = acc_ref[...] + b_ref[...]
        if activation == "gelu":         # tanh-approx GELU (EUP-friendly)
            c = math.sqrt(2.0 / math.pi)
            y = 0.5 * y * (1.0 + jnp.tanh(c * (y + 0.044715 * (y * y * y))))
        elif activation == "tanh":
            y = jnp.tanh(y)
        elif activation == "relu":
            y = jnp.maximum(y, 0.0)
        if fuse_res_ln:
            y = y + r_ref[...]
            col = jax.lax.broadcasted_iota(jnp.int32, y.shape, 1)
            valid = col < true_n
            inv_n = 1.0 / float(true_n)
            mu = jnp.sum(jnp.where(valid, y, 0.0), axis=-1, keepdims=True) * inv_n
            d = jnp.where(valid, y - mu, 0.0)
            var = jnp.sum(d * d, axis=-1, keepdims=True) * inv_n
            y = d * jax.lax.rsqrt(var + ln_eps) * g_ref[...] + bb_ref[...]
        o_ref[...] = y.astype(o_ref.dtype)


def fused_matmul(x, w, b, activation="none", residual=None, ln_params=None,
                 ln_eps=1e-12):
    """y = [LN](act(x @ w + b) [+ residual]); x:[M,K], w:[K,N] -> [M,N] f32.

    bf16 MXU operands, f32 accumulation, K-reduction grid, padded/lane-dense
    tiles sliced back to the true shape.
    """
    m, kdim = x.shape
    n = w.shape[1]

    mp, tm = _choose_tile(m, _TM, 8)
    kp, tk = _choose_tile(kdim, _TK, 128)
    if ln_params is not None:            # LN reduces over full N: single N tile
        np_ = _ceil_to(n, 128)
        tn = np_
    else:
        np_, tn = _choose_tile(n, _TN, 128)

    xp = _pad2d(x.astype(jnp.float32), mp, kp).astype(jnp.bfloat16)
    wp = _pad2d(w.astype(jnp.float32), kp, np_).astype(jnp.bfloat16)
    bp = _pad2d(b.reshape(1, n).astype(jnp.float32), 1, np_)

    args = [xp, wp, bp]
    in_specs = [pl.BlockSpec((tm, tk), lambda i, j, k: (i, k)),
                pl.BlockSpec((tk, tn), lambda i, j, k: (k, j)),
                pl.BlockSpec((1, tn), lambda i, j, k: (0, j))]

    fuse = ln_params is not None
    if fuse:
        g, bb = ln_params
        args += [_pad2d(residual.astype(jnp.float32), mp, np_),
                 _pad2d(g.reshape(1, n).astype(jnp.float32), 1, np_),
                 _pad2d(bb.reshape(1, n).astype(jnp.float32), 1, np_)]
        in_specs += [pl.BlockSpec((tm, tn), lambda i, j, k: (i, j)),
                     pl.BlockSpec((1, tn), lambda i, j, k: (0, j)),
                     pl.BlockSpec((1, tn), lambda i, j, k: (0, j))]

    out = pl.pallas_call(
        functools.partial(_fused_matmul_kernel, activation=activation,
                          fuse_res_ln=fuse, true_n=n, ln_eps=ln_eps),
        out_shape=jax.ShapeDtypeStruct((mp, np_), jnp.float32),
        grid=(mp // tm, np_ // tn, kp // tk),
        in_specs=in_specs,
        out_specs=pl.BlockSpec((tm, tn), lambda i, j, k: (i, j)),
        scratch_shapes=[pltpu.VMEM((tm, tn), jnp.float32)],
        compiler_params=pltpu.CompilerParams(
            dimension_semantics=("parallel", "parallel", "arbitrary")),
    )(*args)
    return out[:m, :n]


# ----------------------------- LayerNorm kernel ------------------------------

def _layernorm_kernel(x_ref, g_ref, b_ref, o_ref, *, true_n, eps):
    x = x_ref[...]
    col = jax.lax.broadcasted_iota(jnp.int32, x.shape, 1)
    valid = col < true_n
    inv_n = 1.0 / float(true_n)
    mu = jnp.sum(jnp.where(valid, x, 0.0), axis=-1, keepdims=True) * inv_n
    d = jnp.where(valid, x - mu, 0.0)
    var = jnp.sum(d * d, axis=-1, keepdims=True) * inv_n
    o_ref[...] = (d * jax.lax.rsqrt(var + eps) * g_ref[...] + b_ref[...]).astype(o_ref.dtype)


def layer_norm(x, p, eps=1e-12):
    """Row-tiled LayerNorm (used for the embedding LN; others are fused)."""
    shp = x.shape
    n = shp[-1]
    x2 = x.reshape(-1, n).astype(jnp.float32)
    m = x2.shape[0]
    mp, tm = _choose_tile(m, 512, 8)
    np_ = _ceil_to(n, 128)

    y = pl.pallas_call(
        functools.partial(_layernorm_kernel, true_n=n, eps=eps),
        out_shape=jax.ShapeDtypeStruct((mp, np_), jnp.float32),
        grid=(mp // tm,),
        in_specs=[pl.BlockSpec((tm, np_), lambda i: (i, 0)),
                  pl.BlockSpec((1, np_), lambda i: (0, 0)),
                  pl.BlockSpec((1, np_), lambda i: (0, 0))],
        out_specs=pl.BlockSpec((tm, np_), lambda i: (i, 0)),
        compiler_params=pltpu.CompilerParams(dimension_semantics=("parallel",)),
    )(_pad2d(x2, mp, np_),
      _pad2d(p["g"].reshape(1, n).astype(jnp.float32), 1, np_),
      _pad2d(p["b"].reshape(1, n).astype(jnp.float32), 1, np_))
    return y[:m, :n].reshape(shp)


# ------------------------- flash attention kernel ----------------------------

def _flash_attn_kernel(q_ref, k_ref, v_ref, mask_ref, o_ref,
                       m_sc, l_sc, acc_sc, *, scale):
    kv = pl.program_id(1)

    @pl.when(kv == 0)
    def _():
        m_sc[...] = jnp.full(m_sc.shape, -1e30, jnp.float32)
        l_sc[...] = jnp.zeros(l_sc.shape, jnp.float32)
        acc_sc[...] = jnp.zeros(acc_sc.shape, jnp.float32)

    s = jnp.einsum("bqd,bkd->bqk", q_ref[...], k_ref[...],
                   preferred_element_type=jnp.float32) * scale
    s = s + mask_ref[...]                       # additive mask [1,1,tkv]

    m_new = jnp.maximum(m_sc[...], jnp.max(s, axis=-1, keepdims=True))
    alpha = jnp.exp(m_sc[...] - m_new)
    p = jnp.exp(s - m_new)
    l_sc[...] = alpha * l_sc[...] + jnp.sum(p, axis=-1, keepdims=True)
    acc_sc[...] = alpha * acc_sc[...] + jnp.einsum(
        "bqk,bkd->bqd", p.astype(v_ref.dtype), v_ref[...],
        preferred_element_type=jnp.float32)
    m_sc[...] = m_new

    @pl.when(kv == pl.num_programs(1) - 1)
    def _():
        o_ref[...] = (acc_sc[...] * pl.reciprocal(l_sc[...], approx=True)
                      ).astype(o_ref.dtype)


def mha_flash(qh, kh, vh, maskh, head_dim):
    """qh:[BH,Sq,dh], kh/vh:[BH,Sk,dh], maskh:[BH,1,Sk] additive -> [BH,Sq,dh]."""
    bh, sq, dh = qh.shape
    sk = kh.shape[1]
    sqp = _ceil_to(sq, 8)
    skp, tkv = _choose_tile(sk, 128, 8)

    qp = jnp.pad(qh.astype(jnp.float32), ((0, 0), (0, sqp - sq), (0, 0))).astype(jnp.bfloat16)
    kp = jnp.pad(kh.astype(jnp.float32), ((0, 0), (0, skp - sk), (0, 0))).astype(jnp.bfloat16)
    vp = jnp.pad(vh.astype(jnp.float32), ((0, 0), (0, skp - sk), (0, 0))).astype(jnp.bfloat16)
    mp = jnp.pad(maskh.astype(jnp.float32), ((0, 0), (0, 0), (0, skp - sk)),
                 constant_values=-1e9)

    out = pl.pallas_call(
        functools.partial(_flash_attn_kernel, scale=1.0 / math.sqrt(head_dim)),
        out_shape=jax.ShapeDtypeStruct((bh, sqp, dh), jnp.float32),
        grid=(bh, skp // tkv),
        in_specs=[pl.BlockSpec((1, sqp, dh), lambda b, k: (b, 0, 0)),
                  pl.BlockSpec((1, tkv, dh), lambda b, k: (b, k, 0)),
                  pl.BlockSpec((1, tkv, dh), lambda b, k: (b, k, 0)),
                  pl.BlockSpec((1, 1, tkv), lambda b, k: (b, 0, k))],
        out_specs=pl.BlockSpec((1, sqp, dh), lambda b, k: (b, 0, 0)),
        scratch_shapes=[pltpu.VMEM((1, sqp, 1), jnp.float32),
                        pltpu.VMEM((1, sqp, 1), jnp.float32),
                        pltpu.VMEM((1, sqp, dh), jnp.float32)],
        compiler_params=pltpu.CompilerParams(
            dimension_semantics=("parallel", "arbitrary")),
    )(qp, kp, vp, mp)
    return out[:, :sq, :]


# ------------------------------ glue helpers ---------------------------------

def dense(x, p, activation="none"):
    shp = x.shape
    y = fused_matmul(x.reshape(-1, shp[-1]), p["w"], p["b"], activation=activation)
    return y.reshape(shp[:-1] + (p["w"].shape[1],))


def extend_invert_attention_mask(mask):
    # [B, S] -> additive mask [B, 1, 1, S]: 0 where attended, -10000 where masked
    return (1.0 - mask.astype(jnp.float32))[:, None, None, :] * -10000.0


def bert_attention(q_in, ext_mask, p, num_heads, kv=None):
    b, sq, h = q_in.shape
    dh = h // num_heads

    if kv is None:
        # self-attention: one fused [H, 3H] QKV projection
        w_qkv = jnp.concatenate([p["query"]["w"], p["key"]["w"], p["value"]["w"]], axis=1)
        b_qkv = jnp.concatenate([p["query"]["b"], p["key"]["b"], p["value"]["b"]])
        qkv = fused_matmul(q_in.reshape(-1, h), w_qkv, b_qkv)
        q, k, v = qkv[:, :h], qkv[:, h:2 * h], qkv[:, 2 * h:]
        sk = sq
    else:
        # cross-attention: Q from queries, fused [H, 2H] K/V from keys/values
        sk = kv.shape[1]
        q = fused_matmul(q_in.reshape(-1, h), p["query"]["w"], p["query"]["b"])
        w_kv = jnp.concatenate([p["key"]["w"], p["value"]["w"]], axis=1)
        b_kv = jnp.concatenate([p["key"]["b"], p["value"]["b"]])
        kvp = fused_matmul(kv.reshape(-1, h), w_kv, b_kv)
        k, v = kvp[:, :h], kvp[:, h:]

    # TODO(synk): head split/merge transposes remain XLA glue (tiny vs. matmuls).
    def split_heads(t, s):
        return t.reshape(b, s, num_heads, dh).transpose(0, 2, 1, 3).reshape(b * num_heads, s, dh)

    qh, kh, vh = split_heads(q, sq), split_heads(k, sk), split_heads(v, sk)
    maskh = jnp.broadcast_to(ext_mask, (b, num_heads, 1, sk)).reshape(b * num_heads, 1, sk)

    ctx = mha_flash(qh, kh, vh, maskh, dh)
    ctx = ctx.reshape(b, num_heads, sq, dh).transpose(0, 2, 1, 3).reshape(b, sq, h)

    # output dense with fused bias + residual + LayerNorm epilogue
    out = fused_matmul(ctx.reshape(-1, h), p["out_dense"]["w"], p["out_dense"]["b"],
                       residual=q_in.reshape(-1, h),
                       ln_params=(p["out_ln"]["g"], p["out_ln"]["b"]))
    return out.reshape(b, sq, h)


def bert_layer(hidden, ext_mask, p, num_heads, kv=None):
    attn_out = bert_attention(hidden, ext_mask, p["attn"], num_heads, kv=kv)
    b, s, h = attn_out.shape
    inter = dense(attn_out, p["inter"], activation="gelu")
    out = fused_matmul(inter.reshape(-1, inter.shape[-1]),
                       p["output"]["w"], p["output"]["b"],
                       residual=attn_out.reshape(-1, h),
                       ln_params=(p["out_ln"]["g"], p["out_ln"]["b"]))
    return out.reshape(b, s, h)


def bert_model(p, input_ids, attention_mask, token_type_ids, num_heads):
    b, s = input_ids.shape
    emb = (p["word_emb"][input_ids]
           + p["pos_emb"][jnp.arange(s)][None, :, :]
           + p["type_emb"][token_type_ids])
    h = layer_norm(emb, p["emb_ln"])
    ext = extend_invert_attention_mask(attention_mask)
    for lp in p["layers"]:
        h = bert_layer(h, ext, lp, num_heads)
    return h  # last_hidden_state


def bert_pooler_dim(hidden, p, index=0):
    # BertPoolerDim: dense + tanh on the token at `index`
    tok = hidden[:, index, :]
    return fused_matmul(tok, p["w"], p["b"], activation="tanh")


def conv2d_bn_relu(x_nhwc, p, stride, padding):
    """NHWC conv (PyTorch weight layout [Cout,Cin,kh,kw]) + eval BN + ReLU.

    BN is folded using running_mean/running_var; im2col is glue, the
    matmul+bias+ReLU runs in the fused Pallas matmul kernel.
    """
    w, bias = p["w"], p["b"]
    gamma, beta = p["gamma"], p["beta"]
    mean, var = p["running_mean"], p["running_var"]
    scale = gamma / jnp.sqrt(var + 1e-5)
    w_eff = w * scale[:, None, None, None]
    b_eff = beta + (bias - mean) * scale

    bsz, hin, win, cin = x_nhwc.shape
    cout, _, kh, kw = w.shape
    hout = (hin + 2 * padding - kh) // stride + 1
    wout = (win + 2 * padding - kw) // stride + 1

    xp = jnp.pad(x_nhwc, ((0, 0), (padding, padding), (padding, padding), (0, 0)))
    patches = []
    for i in range(kh):
        for j in range(kw):
            patches.append(xp[:, i:i + stride * hout:stride,
                              j:j + stride * wout:stride, :])
    pat = jnp.concatenate(patches, axis=-1)            # [B, Hout, Wout, kh*kw*Cin]
    pat = pat.reshape(bsz * hout * wout, kh * kw * cin)

    w2 = w_eff.transpose(2, 3, 1, 0).reshape(kh * kw * cin, cout)  # (i,j,cin)->cout
    y = fused_matmul(pat, w2, b_eff, activation="relu")
    return y.reshape(bsz, hout, wout, cout)            # stays NHWC (C on lanes)


# ------------------------------- the model -----------------------------------

def tombert_with_resnet_forward(params, input_ids, target_input_ids, images,
                                token_type_ids, target_type_ids,
                                attention_mask, target_attention_mask, *, cfg):
    num_heads = cfg["num_heads"]

    # --- visual encoder (synthetic ResNet stem), NHWC -> [B, regions, vis_dim]
    x = images.transpose(0, 2, 3, 1)                   # NCHW -> NHWC once
    feat = conv2d_bn_relu(x, params["resnet"]["conv1"], stride=2, padding=1)
    feat = conv2d_bn_relu(feat, params["resnet"]["conv2"], stride=2, padding=1)
    b, fh, fw, c = feat.shape
    visual_embeddings = feat.reshape(b, fh * fw, c)
    n_regions = visual_embeddings.shape[1]

    # --- multimodal attention mask ---
    vision_mask = jnp.ones((input_ids.shape[0], n_regions), jnp.float32)
    mm_attention_mask = jnp.concatenate(
        [vision_mask, attention_mask.astype(jnp.float32)], axis=1)

    # --- text encoders (separate weights, per the reference module) ---
    tweet_output = bert_model(params["tweet_bert"], input_ids, attention_mask,
                              token_type_ids, num_heads)
    target_output = bert_model(params["target_bert"], target_input_ids,
                               target_attention_mask, target_type_ids, num_heads)

    # --- map visual features to text space ---
    ei_image_mask = extend_invert_attention_mask(mm_attention_mask[:, :n_regions])
    vis = dense(visual_embeddings, params["vis2txt"])

    # --- target2image cross attention (queries=target, keys/values=visual) ---
    hidden = target_output
    for lp in params["target2image_attention"]:
        hidden = bert_layer(hidden, ei_image_mask, lp, num_heads, kv=vis)
    vis_pooled = bert_pooler_dim(hidden, params["target2image_pooler"], index=0)

    # --- multimodal fusion ---
    mm_embeddings = jnp.concatenate([vis_pooled[:, None, :], tweet_output], axis=1)
    ei_mm_mask = extend_invert_attention_mask(mm_attention_mask[:, n_regions - 1:])
    mm_hidden = mm_embeddings
    for lp in params["multimodal_attention"]:
        mm_hidden = bert_layer(mm_hidden, ei_mm_mask, lp, num_heads)

    # --- pool_and_predict (pooling='first'): pooler -> dropout(eval) -> linear
    pooled = bert_pooler_dim(mm_hidden, params["pool_dense"], index=0)
    logits = fused_matmul(pooled, params["classifier"]["w"], params["classifier"]["b"])
    return logits


# ------------------------------- param init ----------------------------------

def init_params(key, cfg):
    keys = iter(jax.random.split(key, 256))

    def nrm(shape, scale=0.02):
        return (scale * jax.random.normal(next(keys), shape)).astype(jnp.float32)

    def dense_p(din, dout):
        return {"w": nrm((din, dout)), "b": jnp.zeros((dout,), jnp.float32)}

    def ln_p(d):
        return {"g": jnp.ones((d,), jnp.float32), "b": jnp.zeros((d,), jnp.float32)}

    h, inter = cfg["hidden"], cfg["intermediate"]

    def layer_p():
        return {"attn": {"query": dense_p(h, h), "key": dense_p(h, h),
                         "value": dense_p(h, h), "out_dense": dense_p(h, h),
                         "out_ln": ln_p(h)},
                "inter": dense_p(h, inter), "output": dense_p(inter, h),
                "out_ln": ln_p(h)}

    def bert_p(n_layers):
        return {"word_emb": nrm((cfg["vocab"], h)),
                "pos_emb": nrm((cfg["max_pos"], h)),
                "type_emb": nrm((cfg["type_vocab"], h)),
                "emb_ln": ln_p(h),
                "layers": [layer_p() for _ in range(n_layers)]}

    def conv_p(cin, cout, k):
        return {"w": nrm((cout, cin, k, k), scale=0.1),
                "b": jnp.zeros((cout,), jnp.float32),
                "gamma": jnp.ones((cout,), jnp.float32) + nrm((cout,)),
                "beta": nrm((cout,)),
                "running_mean": jnp.zeros((cout,), jnp.float32),
                "running_var": jnp.ones((cout,), jnp.float32)}

    return {
        "resnet": {"conv1": conv_p(3, cfg["stem_ch"], 3),
                   "conv2": conv_p(cfg["stem_ch"], cfg["vis_dim"], 3)},
        "tweet_bert": bert_p(cfg["layers"]),
        "target_bert": bert_p(cfg["layers"]),
        "vis2txt": dense_p(cfg["vis_dim"], h),
        "target2image_attention": [layer_p() for _ in range(cfg["cross_layers"])],
        "target2image_pooler": dense_p(h, h),
        "multimodal_attention": [layer_p() for _ in range(cfg["mm_layers"])],
        "pool_dense": dense_p(h, h),
        "classifier": dense_p(h, cfg["n_classes"]),
    }


# ---------------------------------- main --------------------------------------

if __name__ == "__main__":
    cfg = dict(hidden=32, num_heads=4, intermediate=64, vocab=100, max_pos=64,
               type_vocab=2, layers=1, cross_layers=1, mm_layers=1,
               vis_dim=64, stem_ch=16, n_classes=3)

    key = jax.random.PRNGKey(0)
    pkey, dkey = jax.random.split(key)
    params = init_params(pkey, cfg)

    B, S, St = 2, 8, 6
    k1, k2, k3 = jax.random.split(dkey, 3)
    input_ids = jax.random.randint(k1, (B, S), 0, cfg["vocab"])
    target_input_ids = jax.random.randint(k2, (B, St), 0, cfg["vocab"])
    images = jax.random.normal(k3, (B, 3, 16, 16), jnp.float32)

    token_type_ids = jnp.zeros((B, S), jnp.int32).at[:, S - 3:].set(1)
    target_type_ids = jnp.zeros((B, St), jnp.int32)
    attention_mask = jnp.ones((B, S), jnp.float32).at[:, S - 2:].set(0.0)
    target_attention_mask = jnp.ones((B, St), jnp.float32).at[:, St - 1:].set(0.0)

    fwd = jax.jit(functools.partial(tombert_with_resnet_forward, cfg=cfg))
    logits = fwd(params, input_ids, target_input_ids, images,
                 token_type_ids, target_type_ids,
                 attention_mask, target_attention_mask)
    jax.block_until_ready(logits)

    assert logits.shape == (B, cfg["n_classes"]), logits.shape
    assert bool(jnp.all(jnp.isfinite(logits)))
    print("KERNEL_OK")
</pallas_src>

<mosaic_0001>
module attributes {stable_mosaic.version = 11 : i64} {
  func.func @_fused_matmul_kernel(%arg0: i32, %arg1: i32, %arg2: i32, %arg3: memref<128x128xbf16, #tpu.memory_space<vmem>>, %arg4: memref<128x128xbf16, #tpu.memory_space<vmem>>, %arg5: memref<1x128xf32, #tpu.memory_space<vmem>>, %arg6: memref<128x128xf32, #tpu.memory_space<vmem>>, %arg7: memref<128x128xf32, #tpu.memory_space<vmem>>) attributes {dimension_semantics = [#tpu.dimension_semantics<parallel>, #tpu.dimension_semantics<parallel>, #tpu.dimension_semantics<arbitrary>], iteration_bounds = array<i64: 1, 1, 1>, scalar_prefetch = 0 : i64, scratch_operands = 1 : i64, tpu.core_type = #tpu.core_type<tc>, window_params = [{transform_indices = @transform_0, window_bounds = array<i64: 128, 128>}, {transform_indices = @transform_1, window_bounds = array<i64: 128, 128>}, {transform_indices = @transform_2, window_bounds = array<i64: 1, 128>}, {transform_indices = @transform_3, window_bounds = array<i64: 128, 128>}]} {
    %c0_i32 = arith.constant 0 : i32
    %0 = arith.cmpi eq, %arg2, %c0_i32 : i32
    %1 = arith.extui %0 : i1 to i32
    %c0_i32_0 = arith.constant 0 : i32
    %2 = arith.cmpi ne, %1, %c0_i32_0 : i32
    scf.if %2 {
      %cst_10 = arith.constant 0.000000e+00 : f32
      %12 = vector.broadcast %cst_10 : f32 to vector<128x128xf32>
      %c0_11 = arith.constant 0 : index
      %c0_12 = arith.constant 0 : index
      %13 = vector.load %arg7[%c0_11, %c0_12] : memref<128x128xf32, #tpu.memory_space<vmem>>, vector<128x128xf32>
      tpu.vector_store %arg7[%c0_11, %c0_12], %12 {strides = array<i32>} : memref<128x128xf32, #tpu.memory_space<vmem>>, vector<128x128xf32>,
    } else {
    }
    %c0 = arith.constant 0 : index
    %c0_1 = arith.constant 0 : index
    %3 = vector.load %arg7[%c0, %c0_1] : memref<128x128xf32, #tpu.memory_space<vmem>>, vector<128x128xf32>
    %c0_2 = arith.constant 0 : index
    %c0_3 = arith.constant 0 : index
    %4 = vector.load %arg3[%c0_2, %c0_3] : memref<128x128xbf16, #tpu.memory_space<vmem>>, vector<128x128xbf16>
    %c0_4 = arith.constant 0 : index
    %c0_5 = arith.constant 0 : index
    %5 = vector.load %arg4[%c0_4, %c0_5] : memref<128x128xbf16, #tpu.memory_space<vmem>>, vector<128x128xbf16>
    %cst = arith.constant dense<0.000000e+00> : vector<128x128xf32>
    %6 = tpu.matmul %4, %5, %cst {dimension_numbers = #tpu.dot_dimension_numbers<[1], [0], [0], [1], [0, 0, 1, 1], [], []>} : vector<128x128xbf16>, vector<128x128xbf16>, vector<128x128xf32> -> vector<128x128xf32>
    %7 = arith.addf %3, %6 : vector<128x128xf32>
    %c0_6 = arith.constant 0 : index
    %c0_7 = arith.constant 0 : index
    %8 = vector.load %arg7[%c0_6, %c0_7] : memref<128x128xf32, #tpu.memory_space<vmem>>, vector<128x128xf32>
    tpu.vector_store %arg7[%c0_6, %c0_7], %7 {strides = array<i32>} : memref<128x128xf32, #tpu.memory_space<vmem>>, vector<128x128xf32>,
    %c0_i32_8 = arith.constant 0 : i32
    %9 = arith.cmpi eq, %arg2, %c0_i32_8 : i32
    %10 = arith.extui %9 : i1 to i32
    %c0_i32_9 = arith.constant 0 : i32
    %11 = arith.cmpi ne, %10, %c0_i32_9 : i32
    scf.if %11 {
      %c0_10 = arith.constant 0 : index
      %c0_11 = arith.constant 0 : index
      %12 = vector.load %arg7[%c0_10, %c0_11] : memref<128x128xf32, #tpu.memory_space<vmem>>, vector<128x128xf32>
      %c0_12 = arith.constant 0 : index
      %c0_13 = arith.constant 0 : index
      %13 = vector.load %arg5[%c0_12, %c0_13] : memref<1x128xf32, #tpu.memory_space<vmem>>, vector<1x128xf32>
      %14 = vector.broadcast %13 : vector<1x128xf32> to vector<128x128xf32>
      %15 = arith.addf %12, %14 : vector<128x128xf32>
      %cst_14 = arith.constant 0.000000e+00 : f32
      %16 = vector.broadcast %cst_14 : f32 to vector<128x128xf32>
      %17 = arith.maximumf %15, %16 : vector<128x128xf32>
      %c0_15 = arith.constant 0 : index
      %c0_16 = arith.constant 0 : index
      %18 = vector.load %arg6[%c0_15, %c0_16] : memref<128x128xf32, #tpu.memory_space<vmem>>, vector<128x128xf32>
      tpu.vector_store %arg6[%c0_15, %c0_16], %17 {strides = array<i32>} : memref<128x128xf32, #tpu.memory_space<vmem>>, vector<128x128xf32>,
    } else {
    }
    return
  }
  func.func @transform_0(%arg0: i32, %arg1: i32, %arg2: i32) -> (i32, i32) {
    %c0_i32 = arith.constant 0 : i32
    return %arg0, %arg2 : i32, i32
  }
  func.func @transform_1(%arg0: i32, %arg1: i32, %arg2: i32) -> (i32, i32) {
    %c0_i32 = arith.constant 0 : i32
    return %arg2, %arg1 : i32, i32
  }
  func.func @transform_2(%arg0: i32, %arg1: i32, %arg2: i32) -> (i32, i32) {
    %c0_i32 = arith.constant 0 : i32
    %c0_i32_0 = arith.constant 0 : i32
    return %c0_i32, %arg1 : i32, i32
  }
  func.func @transform_3(%arg0: i32, %arg1: i32, %arg2: i32) -> (i32, i32) {
    %c0_i32 = arith.constant 0 : i32
    return %arg0, %arg1 : i32, i32
  }
}

module attributes {stable_mosaic.version = 11 : i64} {
  func.func @_fused_matmul_kernel(%arg0: i32, %arg1: i32, %arg2: i32, %arg3: memref<32x256xbf16, #tpu.memory_space<vmem>>, %arg4: memref<256x128xbf16, #tpu.memory_space<vmem>>, %arg5: memref<1x128xf32, #tpu.memory_space<vmem>>, %arg6: memref<32x128xf32, #tpu.memory_space<vmem>>, %arg7: memref<32x128xf32, #tpu.memory_space<vmem>>) attributes {dimension_semantics = [#tpu.dimension_semantics<parallel>, #tpu.dimension_semantics<parallel>, #tpu.dimension_semantics<arbitrary>], iteration_bounds = array<i64: 1, 1, 1>, scalar_prefetch = 0 : i64, scratch_operands = 1 : i64, tpu.core_type = #tpu.core_type<tc>, window_params = [{transform_indices = @transform_0, window_bounds = array<i64: 32, 256>}, {transform_indices = @transform_1, window_bounds = array<i64: 256, 128>}, {transform_indices = @transform_2, window_bounds = array<i64: 1, 128>}, {transform_indices = @transform_3, window_bounds = array<i64: 32, 128>}]} {
    %c0_i32 = arith.constant 0 : i32
    %0 = arith.cmpi eq, %arg2, %c0_i32 : i32
    %1 = arith.extui %0 : i1 to i32
    %c0_i32_0 = arith.constant 0 : i32
    %2 = arith.cmpi ne, %1, %c0_i32_0 : i32
    scf.if %2 {
      %cst_10 = arith.constant 0.000000e+00 : f32
      %12 = vector.broadcast %cst_10 : f32 to vector<32x128xf32>
      %c0_11 = arith.constant 0 : index
      %c0_12 = arith.constant 0 : index
      %13 = vector.load %arg7[%c0_11, %c0_12] : memref<32x128xf32, #tpu.memory_space<vmem>>, vector<32x128xf32>
      tpu.vector_store %arg7[%c0_11, %c0_12], %12 {strides = array<i32>} : memref<32x128xf32, #tpu.memory_space<vmem>>, vector<32x128xf32>,
    } else {
    }
    %c0 = arith.constant 0 : index
    %c0_1 = arith.constant 0 : index
    %3 = vector.load %arg7[%c0, %c0_1] : memref<32x128xf32, #tpu.memory_space<vmem>>, vector<32x128xf32>
    %c0_2 = arith.constant 0 : index
    %c0_3 = arith.constant 0 : index
    %4 = vector.load %arg3[%c0_2, %c0_3] : memref<32x256xbf16, #tpu.memory_space<vmem>>, vector<32x256xbf16>
    %c0_4 = arith.constant 0 : index
    %c0_5 = arith.constant 0 : index
    %5 = vector.load %arg4[%c0_4, %c0_5] : memref<256x128xbf16, #tpu.memory_space<vmem>>, vector<256x128xbf16>
    %cst = arith.constant dense<0.000000e+00> : vector<32x128xf32>
    %6 = tpu.matmul %4, %5, %cst {dimension_numbers = #tpu.dot_dimension_numbers<[1], [0], [0], [1], [0, 0, 1, 1], [], []>} : vector<32x256xbf16>, vector<256x128xbf16>, vector<32x128xf32> -> vector<32x128xf32>
    %7 = arith.addf %3, %6 : vector<32x128xf32>
    %c0_6 = arith.constant 0 : index
    %c0_7 = arith.constant 0 : index
    %8 = vector.load %arg7[%c0_6, %c0_7] : memref<32x128xf32, #tpu.memory_space<vmem>>, vector<32x128xf32>
    tpu.vector_store %arg7[%c0_6, %c0_7], %7 {strides = array<i32>} : memref<32x128xf32, #tpu.memory_space<vmem>>, vector<32x128xf32>,
    %c0_i32_8 = arith.constant 0 : i32
    %9 = arith.cmpi eq, %arg2, %c0_i32_8 : i32
    %10 = arith.extui %9 : i1 to i32
    %c0_i32_9 = arith.constant 0 : i32
    %11 = arith.cmpi ne, %10, %c0_i32_9 : i32
    scf.if %11 {
      %c0_10 = arith.constant 0 : index
      %c0_11 = arith.constant 0 : index
      %12 = vector.load %arg7[%c0_10, %c0_11] : memref<32x128xf32, #tpu.memory_space<vmem>>, vector<32x128xf32>
      %c0_12 = arith.constant 0 : index
      %c0_13 = arith.constant 0 : index
      %13 = vector.load %arg5[%c0_12, %c0_13] : memref<1x128xf32, #tpu.memory_space<vmem>>, vector<1x128xf32>
      %14 = vector.broadcast %13 : vector<1x128xf32> to vector<32x128xf32>
      %15 = arith.addf %12, %14 : vector<32x128xf32>
      %cst_14 = arith.constant 0.000000e+00 : f32
      %16 = vector.broadcast %cst_14 : f32 to vector<32x128xf32>
      %17 = arith.maximumf %15, %16 : vector<32x128xf32>
      %c0_15 = arith.constant 0 : index
      %c0_16 = arith.constant 0 : index
      %18 = vector.load %arg6[%c0_15, %c0_16] : memref<32x128xf32, #tpu.memory_space<vmem>>, vector<32x128xf32>
      tpu.vector_store %arg6[%c0_15, %c0_16], %17 {strides = array<i32>} : memref<32x128xf32, #tpu.memory_space<vmem>>, vector<32x128xf32>,
    } else {
    }
    return
  }
  func.func @transform_0(%arg0: i32, %arg1: i32, %arg2: i32) -> (i32, i32) {
    %c0_i32 = arith.constant 0 : i32
    return %arg0, %arg2 : i32, i32
  }
  func.func @transform_1(%arg0: i32, %arg1: i32, %arg2: i32) -> (i32, i32) {
    %c0_i32 = arith.constant 0 : i32
    return %arg2, %arg1 : i32, i32
  }
  func.func @transform_2(%arg0: i32, %arg1: i32, %arg2: i32) -> (i32, i32) {
    %c0_i32 = arith.constant 0 : i32
    %c0_i32_0 = arith.constant 0 : i32
    return %c0_i32, %arg1 : i32, i32
  }
  func.func @transform_3(%arg0: i32, %arg1: i32, %arg2: i32) -> (i32, i32) {
    %c0_i32 = arith.constant 0 : i32
    return %arg0, %arg1 : i32, i32
  }
}

module attributes {stable_mosaic.version = 11 : i64} {
  func.func @_fused_matmul_kernel(%arg0: i32, %arg1: i32, %arg2: i32, %arg3: memref<32x128xbf16, #tpu.memory_space<vmem>>, %arg4: memref<128x128xbf16, #tpu.memory_space<vmem>>, %arg5: memref<1x128xf32, #tpu.memory_space<vmem>>, %arg6: memref<32x128xf32, #tpu.memory_space<vmem>>, %arg7: memref<32x128xf32, #tpu.memory_space<vmem>>) attributes {dimension_semantics = [#tpu.dimension_semantics<parallel>, #tpu.dimension_semantics<parallel>, #tpu.dimension_semantics<arbitrary>], iteration_bounds = array<i64: 1, 1, 1>, scalar_prefetch = 0 : i64, scratch_operands = 1 : i64, tpu.core_type = #tpu.core_type<tc>, window_params = [{transform_indices = @transform_0, window_bounds = array<i64: 32, 128>}, {transform_indices = @transform_1, window_bounds = array<i64: 128, 128>}, {transform_indices = @transform_2, window_bounds = array<i64: 1, 128>}, {transform_indices = @transform_3, window_bounds = array<i64: 32, 128>}]} {
    %c0_i32 = arith.constant 0 : i32
    %0 = arith.cmpi eq, %arg2, %c0_i32 : i32
    %1 = arith.extui %0 : i1 to i32
    %c0_i32_0 = arith.constant 0 : i32
    %2 = arith.cmpi ne, %1, %c0_i32_0 : i32
    scf.if %2 {
      %cst_10 = arith.constant 0.000000e+00 : f32
      %12 = vector.broadcast %cst_10 : f32 to vector<32x128xf32>
      %c0_11 = arith.constant 0 : index
      %c0_12 = arith.constant 0 : index
      %13 = vector.load %arg7[%c0_11, %c0_12] : memref<32x128xf32, #tpu.memory_space<vmem>>, vector<32x128xf32>
      tpu.vector_store %arg7[%c0_11, %c0_12], %12 {strides = array<i32>} : memref<32x128xf32, #tpu.memory_space<vmem>>, vector<32x128xf32>,
    } else {
    }
    %c0 = arith.constant 0 : index
    %c0_1 = arith.constant 0 : index
    %3 = vector.load %arg7[%c0, %c0_1] : memref<32x128xf32, #tpu.memory_space<vmem>>, vector<32x128xf32>
    %c0_2 = arith.constant 0 : index
    %c0_3 = arith.constant 0 : index
    %4 = vector.load %arg3[%c0_2, %c0_3] : memref<32x128xbf16, #tpu.memory_space<vmem>>, vector<32x128xbf16>
    %c0_4 = arith.constant 0 : index
    %c0_5 = arith.constant 0 : index
    %5 = vector.load %arg4[%c0_4, %c0_5] : memref<128x128xbf16, #tpu.memory_space<vmem>>, vector<128x128xbf16>
    %cst = arith.constant dense<0.000000e+00> : vector<32x128xf32>
    %6 = tpu.matmul %4, %5, %cst {dimension_numbers = #tpu.dot_dimension_numbers<[1], [0], [0], [1], [0, 0, 1, 1], [], []>} : vector<32x128xbf16>, vector<128x128xbf16>, vector<32x128xf32> -> vector<32x128xf32>
    %7 = arith.addf %3, %6 : vector<32x128xf32>
    %c0_6 = arith.constant 0 : index
    %c0_7 = arith.constant 0 : index
    %8 = vector.load %arg7[%c0_6, %c0_7] : memref<32x128xf32, #tpu.memory_space<vmem>>, vector<32x128xf32>
    tpu.vector_store %arg7[%c0_6, %c0_7], %7 {strides = array<i32>} : memref<32x128xf32, #tpu.memory_space<vmem>>, vector<32x128xf32>,
    %c0_i32_8 = arith.constant 0 : i32
    %9 = arith.cmpi eq, %arg2, %c0_i32_8 : i32
    %10 = arith.extui %9 : i1 to i32
    %c0_i32_9 = arith.constant 0 : i32
    %11 = arith.cmpi ne, %10, %c0_i32_9 : i32
    scf.if %11 {
      %c0_10 = arith.constant 0 : index
      %c0_11 = arith.constant 0 : index
      %12 = vector.load %arg7[%c0_10, %c0_11] : memref<32x128xf32, #tpu.memory_space<vmem>>, vector<32x128xf32>
      %c0_12 = arith.constant 0 : index
      %c0_13 = arith.constant 0 : index
      %13 = vector.load %arg5[%c0_12, %c0_13] : memref<1x128xf32, #tpu.memory_space<vmem>>, vector<1x128xf32>
      %14 = vector.broadcast %13 : vector<1x128xf32> to vector<32x128xf32>
      %15 = arith.addf %12, %14 : vector<32x128xf32>
      %c0_14 = arith.constant 0 : index
      %c0_15 = arith.constant 0 : index
      %16 = vector.load %arg6[%c0_14, %c0_15] : memref<32x128xf32, #tpu.memory_space<vmem>>, vector<32x128xf32>
      tpu.vector_store %arg6[%c0_14, %c0_15], %15 {strides = array<i32>} : memref<32x128xf32, #tpu.memory_space<vmem>>, vector<32x128xf32>,
    } else {
    }
    return
  }
  func.func @transform_0(%arg0: i32, %arg1: i32, %arg2: i32) -> (i32, i32) {
    %c0_i32 = arith.constant 0 : i32
    return %arg0, %arg2 : i32, i32
  }
  func.func @transform_1(%arg0: i32, %arg1: i32, %arg2: i32) -> (i32, i32) {
    %c0_i32 = arith.constant 0 : i32
    return %arg2, %arg1 : i32, i32
  }
  func.func @transform_2(%arg0: i32, %arg1: i32, %arg2: i32) -> (i32, i32) {
    %c0_i32 = arith.constant 0 : i32
    %c0_i32_0 = arith.constant 0 : i32
    return %c0_i32, %arg1 : i32, i32
  }
  func.func @transform_3(%arg0: i32, %arg1: i32, %arg2: i32) -> (i32, i32) {
    %c0_i32 = arith.constant 0 : i32
    return %arg0, %arg1 : i32, i32
  }
}

module attributes {stable_mosaic.version = 11 : i64} {
  func.func @_fused_matmul_kernel(%arg0: i32, %arg1: i32, %arg2: i32, %arg3: memref<16x128xbf16, #tpu.memory_space<vmem>>, %arg4: memref<128x128xbf16, #tpu.memory_space<vmem>>, %arg5: memref<1x128xf32, #tpu.memory_space<vmem>>, %arg6: memref<16x128xf32, #tpu.memory_space<vmem>>, %arg7: memref<16x128xf32, #tpu.memory_space<vmem>>) attributes {dimension_semantics = [#tpu.dimension_semantics<parallel>, #tpu.dimension_semantics<parallel>, #tpu.dimension_semantics<arbitrary>], iteration_bounds = array<i64: 1, 1, 1>, scalar_prefetch = 0 : i64, scratch_operands = 1 : i64, tpu.core_type = #tpu.core_type<tc>, window_params = [{transform_indices = @transform_0, window_bounds = array<i64: 16, 128>}, {transform_indices = @transform_1, window_bounds = array<i64: 128, 128>}, {transform_indices = @transform_2, window_bounds = array<i64: 1, 128>}, {transform_indices = @transform_3, window_bounds = array<i64: 16, 128>}]} {
    %c0_i32 = arith.constant 0 : i32
    %0 = arith.cmpi eq, %arg2, %c0_i32 : i32
    %1 = arith.extui %0 : i1 to i32
    %c0_i32_0 = arith.constant 0 : i32
    %2 = arith.cmpi ne, %1, %c0_i32_0 : i32
    scf.if %2 {
      %cst_10 = arith.constant 0.000000e+00 : f32
      %12 = vector.broadcast %cst_10 : f32 to vector<16x128xf32>
      %c0_11 = arith.constant 0 : index
      %c0_12 = arith.constant 0 : index
      %13 = vector.load %arg7[%c0_11, %c0_12] : memref<16x128xf32, #tpu.memory_space<vmem>>, vector<16x128xf32>
      tpu.vector_store %arg7[%c0_11, %c0_12], %12 {strides = array<i32>} : memref<16x128xf32, #tpu.memory_space<vmem>>, vector<16x128xf32>,
    } else {
    }
    %c0 = arith.constant 0 : index
    %c0_1 = arith.constant 0 : index
    %3 = vector.load %arg7[%c0, %c0_1] : memref<16x128xf32, #tpu.memory_space<vmem>>, vector<16x128xf32>
    %c0_2 = arith.constant 0 : index
    %c0_3 = arith.constant 0 : index
    %4 = vector.load %arg3[%c0_2, %c0_3] : memref<16x128xbf16, #tpu.memory_space<vmem>>, vector<16x128xbf16>
    %c0_4 = arith.constant 0 : index
    %c0_5 = arith.constant 0 : index
    %5 = vector.load %arg4[%c0_4, %c0_5] : memref<128x128xbf16, #tpu.memory_space<vmem>>, vector<128x128xbf16>
    %cst = arith.constant dense<0.000000e+00> : vector<16x128xf32>
    %6 = tpu.matmul %4, %5, %cst {dimension_numbers = #tpu.dot_dimension_numbers<[1], [0], [0], [1], [0, 0, 1, 1], [], []>} : vector<16x128xbf16>, vector<128x128xbf16>, vector<16x128xf32> -> vector<16x128xf32>
    %7 = arith.addf %3, %6 : vector<16x128xf32>
    %c0_6 = arith.constant 0 : index
    %c0_7 = arith.constant 0 : index
    %8 = vector.load %arg7[%c0_6, %c0_7] : memref<16x128xf32, #tpu.memory_space<vmem>>, vector<16x128xf32>
    tpu.vector_store %arg7[%c0_6, %c0_7], %7 {strides = array<i32>} : memref<16x128xf32, #tpu.memory_space<vmem>>, vector<16x128xf32>,
    %c0_i32_8 = arith.constant 0 : i32
    %9 = arith.cmpi eq, %arg2, %c0_i32_8 : i32
    %10 = arith.extui %9 : i1 to i32
    %c0_i32_9 = arith.constant 0 : i32
    %11 = arith.cmpi ne, %10, %c0_i32_9 : i32
    scf.if %11 {
      %c0_10 = arith.constant 0 : index
      %c0_11 = arith.constant 0 : index
      %12 = vector.load %arg7[%c0_10, %c0_11] : memref<16x128xf32, #tpu.memory_space<vmem>>, vector<16x128xf32>
      %c0_12 = arith.constant 0 : index
      %c0_13 = arith.constant 0 : index
      %13 = vector.load %arg5[%c0_12, %c0_13] : memref<1x128xf32, #tpu.memory_space<vmem>>, vector<1x128xf32>
      %14 = vector.broadcast %13 : vector<1x128xf32> to vector<16x128xf32>
      %15 = arith.addf %12, %14 : vector<16x128xf32>
      %c0_14 = arith.constant 0 : index
      %c0_15 = arith.constant 0 : index
      %16 = vector.load %arg6[%c0_14, %c0_15] : memref<16x128xf32, #tpu.memory_space<vmem>>, vector<16x128xf32>
      tpu.vector_store %arg6[%c0_14, %c0_15], %15 {strides = array<i32>} : memref<16x128xf32, #tpu.memory_space<vmem>>, vector<16x128xf32>,
    } else {
    }
    return
  }
  func.func @transform_0(%arg0: i32, %arg1: i32, %arg2: i32) -> (i32, i32) {
    %c0_i32 = arith.constant 0 : i32
    return %arg0, %arg2 : i32, i32
  }
  func.func @transform_1(%arg0: i32, %arg1: i32, %arg2: i32) -> (i32, i32) {
    %c0_i32 = arith.constant 0 : i32
    return %arg2, %arg1 : i32, i32
  }
  func.func @transform_2(%arg0: i32, %arg1: i32, %arg2: i32) -> (i32, i32) {
    %c0_i32 = arith.constant 0 : i32
    %c0_i32_0 = arith.constant 0 : i32
    return %c0_i32, %arg1 : i32, i32
  }
  func.func @transform_3(%arg0: i32, %arg1: i32, %arg2: i32) -> (i32, i32) {
    %c0_i32 = arith.constant 0 : i32
    return %arg0, %arg1 : i32, i32
  }
}

module attributes {stable_mosaic.version = 11 : i64} {
  func.func @_layernorm_kernel(%arg0: i32, %arg1: memref<16x128xf32, #tpu.memory_space<vmem>>, %arg2: memref<1x128xf32, #tpu.memory_space<vmem>>, %arg3: memref<1x128xf32, #tpu.memory_space<vmem>>, %arg4: memref<16x128xf32, #tpu.memory_space<vmem>>) attributes {dimension_semantics = [#tpu.dimension_semantics<parallel>], iteration_bounds = array<i64: 1>, scalar_prefetch = 0 : i64, scratch_operands = 0 : i64, tpu.core_type = #tpu.core_type<tc>, window_params = [{transform_indices = @transform_0, window_bounds = array<i64: 16, 128>}, {pipeline_mode = #tpu.pipeline_mode<synchronous>, transform_indices = @transform_1, window_bounds = array<i64: 1, 128>}, {pipeline_mode = #tpu.pipeline_mode<synchronous>, transform_indices = @transform_2, window_bounds = array<i64: 1, 128>}, {transform_indices = @transform_3, window_bounds = array<i64: 16, 128>}]} {
    %c0 = arith.constant 0 : index
    %c0_0 = arith.constant 0 : index
    %0 = vector.load %arg1[%c0, %c0_0] : memref<16x128xf32, #tpu.memory_space<vmem>>, vector<16x128xf32>
    %1 = tpu.iota {dimensions = array<i32: 1>} : vector<16x128xi32>
    %c32_i32 = arith.constant 32 : i32
    %2 = vector.broadcast %c32_i32 : i32 to vector<16x128xi32>
    %3 = arith.cmpi slt, %1, %2 : vector<16x128xi32>
    %cst = arith.constant 0.000000e+00 : f32
    %4 = vector.broadcast %cst : f32 to vector<16x128xf32>
    %5 = arith.select %3, %0, %4 : vector<16x128xi1>, vector<16x128xf32>
    %cst_1 = arith.constant dense<0.000000e+00> : vector<16xf32>
    %6 = vector.multi_reduction <add>, %5, %cst_1 [1] : vector<16x128xf32> to vector<16xf32>
    %7 = vector.shape_cast %6 : vector<16xf32> to vector<16x1xf32>
    %cst_2 = arith.constant 3.125000e-02 : f32
    %8 = vector.broadcast %cst_2 : f32 to vector<16x1xf32>
    %9 = arith.mulf %7, %8 : vector<16x1xf32>
    %10 = vector.broadcast %9 : vector<16x1xf32> to vector<16x128xf32>
    %11 = arith.subf %0, %10 : vector<16x128xf32>
    %cst_3 = arith.constant 0.000000e+00 : f32
    %12 = vector.broadcast %cst_3 : f32 to vector<16x128xf32>
    %13 = arith.select %3, %11, %12 : vector<16x128xi1>, vector<16x128xf32>
    %14 = arith.mulf %13, %13 : vector<16x128xf32>
    %cst_4 = arith.constant dense<0.000000e+00> : vector<16xf32>
    %15 = vector.multi_reduction <add>, %14, %cst_4 [1] : vector<16x128xf32> to vector<16xf32>
    %16 = vector.shape_cast %15 : vector<16xf32> to vector<16x1xf32>
    %cst_5 = arith.constant 3.125000e-02 : f32
    %17 = vector.broadcast %cst_5 : f32 to vector<16x1xf32>
    %18 = arith.mulf %16, %17 : vector<16x1xf32>
    %cst_6 = arith.constant 9.99999996E-13 : f32
    %19 = vector.broadcast %cst_6 : f32 to vector<16x1xf32>
    %20 = arith.addf %18, %19 : vector<16x1xf32>
    %21 = math.rsqrt %20 : vector<16x1xf32>
    %22 = vector.broadcast %21 : vector<16x1xf32> to vector<16x128xf32>
    %23 = arith.mulf %13, %22 : vector<16x128xf32>
    %c0_7 = arith.constant 0 : index
    %c0_8 = arith.constant 0 : index
    %24 = vector.load %arg2[%c0_7, %c0_8] : memref<1x128xf32, #tpu.memory_space<vmem>>, vector<1x128xf32>
    %25 = vector.broadcast %24 : vector<1x128xf32> to vector<16x128xf32>
    %26 = arith.mulf %23, %25 : vector<16x128xf32>
    %c0_9 = arith.constant 0 : index
    %c0_10 = arith.constant 0 : index
    %27 = vector.load %arg3[%c0_9, %c0_10] : memref<1x128xf32, #tpu.memory_space<vmem>>, vector<1x128xf32>
    %28 = vector.broadcast %27 : vector<1x128xf32> to vector<16x128xf32>
    %29 = arith.addf %26, %28 : vector<16x128xf32>
    %c0_11 = arith.constant 0 : index
    %c0_12 = arith.constant 0 : index
    %30 = vector.load %arg4[%c0_11, %c0_12] : memref<16x128xf32, #tpu.memory_space<vmem>>, vector<16x128xf32>
    tpu.vector_store %arg4[%c0_11, %c0_12], %29 {strides = array<i32>} : memref<16x128xf32, #tpu.memory_space<vmem>>, vector<16x128xf32>,
    return
  }
  func.func @transform_0(%arg0: i32) -> (i32, i32) {
    %c0_i32 = arith.constant 0 : i32
    %c0_i32_0 = arith.constant 0 : i32
    return %arg0, %c0_i32 : i32, i32
  }
  func.func @transform_1(%arg0: i32) -> (i32, i32) {
    %c0_i32 = arith.constant 0 : i32
    %c0_i32_0 = arith.constant 0 : i32
    %c0_i32_1 = arith.constant 0 : i32
    return %c0_i32, %c0_i32_0 : i32, i32
  }
  func.func @transform_2(%arg0: i32) -> (i32, i32) {
    %c0_i32 = arith.constant 0 : i32
    %c0_i32_0 = arith.constant 0 : i32
    %c0_i32_1 = arith.constant 0 : i32
    return %c0_i32, %c0_i32_0 : i32, i32
  }
  func.func @transform_3(%arg0: i32) -> (i32, i32) {
    %c0_i32 = arith.constant 0 : i32
    %c0_i32_0 = arith.constant 0 : i32
    return %arg0, %c0_i32 : i32, i32
  }
}

module attributes {stable_mosaic.version = 11 : i64} {
  func.func @_flash_attn_kernel(%arg0: i32, %arg1: i32, %arg2: memref<1x8x8xbf16, #tpu.memory_space<vmem>>, %arg3: memref<1x8x8xbf16, #tpu.memory_space<vmem>>, %arg4: memref<1x8x8xbf16, #tpu.memory_space<vmem>>, %arg5: memref<1x1x8xf32, #tpu.memory_space<vmem>>, %arg6: memref<1x8x8xf32, #tpu.memory_space<vmem>>, %arg7: memref<1x8x1xf32, #tpu.memory_space<vmem>>, %arg8: memref<1x8x1xf32, #tpu.memory_space<vmem>>, %arg9: memref<1x8x8xf32, #tpu.memory_space<vmem>>) attributes {dimension_semantics = [#tpu.dimension_semantics<parallel>, #tpu.dimension_semantics<arbitrary>], iteration_bounds = array<i64: 8, 1>, scalar_prefetch = 0 : i64, scratch_operands = 3 : i64, tpu.core_type = #tpu.core_type<tc>, window_params = [{transform_indices = @transform_0, window_bounds = array<i64: 1, 8, 8>}, {transform_indices = @transform_1, window_bounds = array<i64: 1, 8, 8>}, {transform_indices = @transform_2, window_bounds = array<i64: 1, 8, 8>}, {transform_indices = @transform_3, window_bounds = array<i64: 1, 1, 8>}, {transform_indices = @transform_4, window_bounds = array<i64: 1, 8, 8>}]} {
    %c0_i32 = arith.constant 0 : i32
    %0 = arith.cmpi eq, %arg1, %c0_i32 : i32
    %1 = arith.extui %0 : i1 to i32
    %c0_i32_0 = arith.constant 0 : i32
    %2 = arith.cmpi ne, %1, %c0_i32_0 : i32
    scf.if %2 {
      %cst_39 = arith.constant -1.000000e+30 : f32
      %39 = vector.broadcast %cst_39 : f32 to vector<1x8x1xf32>
      %c0_40 = arith.constant 0 : index
      %c0_41 = arith.constant 0 : index
      %c0_42 = arith.constant 0 : index
      %40 = vector.load %arg7[%c0_40, %c0_41, %c0_42] : memref<1x8x1xf32, #tpu.memory_space<vmem>>, vector<1x8x1xf32>
      tpu.vector_store %arg7[%c0_40, %c0_41, %c0_42], %39 {strides = array<i32>} : memref<1x8x1xf32, #tpu.memory_space<vmem>>, vector<1x8x1xf32>,
      %cst_43 = arith.constant 0.000000e+00 : f32
      %41 = vector.broadcast %cst_43 : f32 to vector<1x8x1xf32>
      %c0_44 = arith.constant 0 : index
      %c0_45 = arith.constant 0 : index
      %c0_46 = arith.constant 0 : index
      %42 = vector.load %arg8[%c0_44, %c0_45, %c0_46] : memref<1x8x1xf32, #tpu.memory_space<vmem>>, vector<1x8x1xf32>
      tpu.vector_store %arg8[%c0_44, %c0_45, %c0_46], %41 {strides = array<i32>} : memref<1x8x1xf32, #tpu.memory_space<vmem>>, vector<1x8x1xf32>,
      %cst_47 = arith.constant 0.000000e+00 : f32
      %43 = vector.broadcast %cst_47 : f32 to vector<1x8x8xf32>
      %c0_48 = arith.constant 0 : index
      %c0_49 = arith.constant 0 : index
      %c0_50 = arith.constant 0 : index
      %44 = vector.load %arg9[%c0_48, %c0_49, %c0_50] : memref<1x8x8xf32, #tpu.memory_space<vmem>>, vector<1x8x8xf32>
      tpu.vector_store %arg9[%c0_48, %c0_49, %c0_50], %43 {strides = array<i32>} : memref<1x8x8xf32, #tpu.memory_space<vmem>>, vector<1x8x8xf32>,
    } else {
    }
    %c0 = arith.constant 0 : index
    %c0_1 = arith.constant 0 : index
    %c0_2 = arith.constant 0 : index
    %3 = vector.load %arg2[%c0, %c0_1, %c0_2] : memref<1x8x8xbf16, #tpu.memory_space<vmem>>, vector<1x8x8xbf16>
    %c0_3 = arith.constant 0 : index
    %c0_4 = arith.constant 0 : index
    %c0_5 = arith.constant 0 : index
    %4 = vector.load %arg3[%c0_3, %c0_4, %c0_5] : memref<1x8x8xbf16, #tpu.memory_space<vmem>>, vector<1x8x8xbf16>
    "tpu.trace_start"() <{level = 10 : i32, message = "bqd,bkd->bqk"}> : () -> ()
    %cst = arith.constant dense<0.000000e+00> : vector<1x8x8xf32>
    %5 = tpu.matmul %3, %4, %cst {dimension_numbers = #tpu.dot_dimension_numbers<[2], [2], [1], [1], [0, 0, 0, 1, 1, 1], [0], [0]>} : vector<1x8x8xbf16>, vector<1x8x8xbf16>, vector<1x8x8xf32> -> vector<1x8x8xf32>
    "tpu.trace_stop"() : () -> ()
    %cst_6 = arith.constant 0.353553385 : f32
    %6 = vector.broadcast %cst_6 : f32 to vector<1x8x8xf32>
    %7 = arith.mulf %5, %6 : vector<1x8x8xf32>
    %c0_7 = arith.constant 0 : index
    %c0_8 = arith.constant 0 : index
    %c0_9 = arith.constant 0 : index
    %8 = vector.load %arg5[%c0_7, %c0_8, %c0_9] : memref<1x1x8xf32, #tpu.memory_space<vmem>>, vector<1x1x8xf32>
    %9 = vector.broadcast %8 : vector<1x1x8xf32> to vector<1x8x8xf32>
    %10 = arith.addf %7, %9 : vector<1x8x8xf32>
    %c0_10 = arith.constant 0 : index
    %c0_11 = arith.constant 0 : index
    %c0_12 = arith.constant 0 : index
    %11 = vector.load %arg7[%c0_10, %c0_11, %c0_12] : memref<1x8x1xf32, #tpu.memory_space<vmem>>, vector<1x8x1xf32>
    %cst_13 = arith.constant dense<0xFF800000> : vector<1x8xf32>
    %12 = vector.multi_reduction <maximumf>, %10, %cst_13 [2] : vector<1x8x8xf32> to vector<1x8xf32>
    %13 = vector.shape_cast %12 : vector<1x8xf32> to vector<1x8x1xf32>
    %14 = arith.maximumf %11, %13 : vector<1x8x1xf32>
    %c0_14 = arith.constant 0 : index
    %c0_15 = arith.constant 0 : index
    %c0_16 = arith.constant 0 : index
    %15 = vector.load %arg7[%c0_14, %c0_15, %c0_16] : memref<1x8x1xf32, #tpu.memory_space<vmem>>, vector<1x8x1xf32>
    %16 = arith.subf %15, %14 : vector<1x8x1xf32>
    %17 = math.exp %16 : vector<1x8x1xf32>
    %18 = vector.broadcast %14 : vector<1x8x1xf32> to vector<1x8x8xf32>
    %19 = arith.subf %10, %18 : vector<1x8x8xf32>
    %20 = math.exp %19 : vector<1x8x8xf32>
    %c0_17 = arith.constant 0 : index
    %c0_18 = arith.constant 0 : index
    %c0_19 = arith.constant 0 : index
    %21 = vector.load %arg8[%c0_17, %c0_18, %c0_19] : memref<1x8x1xf32, #tpu.memory_space<vmem>>, vector<1x8x1xf32>
    %22 = arith.mulf %17, %21 : vector<1x8x1xf32>
    %cst_20 = arith.constant dense<0.000000e+00> : vector<1x8xf32>
    %23 = vector.multi_reduction <add>, %20, %cst_20 [2] : vector<1x8x8xf32> to vector<1x8xf32>
    %24 = vector.shape_cast %23 : vector<1x8xf32> to vector<1x8x1xf32>
    %25 = arith.addf %22, %24 : vector<1x8x1xf32>
    %c0_21 = arith.constant 0 : index
    %c0_22 = arith.constant 0 : index
    %c0_23 = arith.constant 0 : index
    %26 = vector.load %arg8[%c0_21, %c0_22, %c0_23] : memref<1x8x1xf32, #tpu.memory_space<vmem>>, vector<1x8x1xf32>
    tpu.vector_store %arg8[%c0_21, %c0_22, %c0_23], %25 {strides = array<i32>} : memref<1x8x1xf32, #tpu.memory_space<vmem>>, vector<1x8x1xf32>,
    %c0_24 = arith.constant 0 : index
    %c0_25 = arith.constant 0 : index
    %c0_26 = arith.constant 0 : index
    %27 = vector.load %arg9[%c0_24, %c0_25, %c0_26] : memref<1x8x8xf32, #tpu.memory_space<vmem>>, vector<1x8x8xf32>
    %28 = vector.broadcast %17 : vector<1x8x1xf32> to vector<1x8x8xf32>
    %29 = arith.mulf %28, %27 : vector<1x8x8xf32>
    %30 = arith.truncf %20 : vector<1x8x8xf32> to vector<1x8x8xbf16>
    %c0_27 = arith.constant 0 : index
    %c0_28 = arith.constant 0 : index
    %c0_29 = arith.constant 0 : index
    %31 = vector.load %arg4[%c0_27, %c0_28, %c0_29] : memref<1x8x8xbf16, #tpu.memory_space<vmem>>, vector<1x8x8xbf16>
    "tpu.trace_start"() <{level = 10 : i32, message = "bqk,bkd->bqd"}> : () -> ()
    %cst_30 = arith.constant dense<0.000000e+00> : vector<1x8x8xf32>
    %32 = tpu.matmul %30, %31, %cst_30 {dimension_numbers = #tpu.dot_dimension_numbers<[2], [1], [1], [2], [0, 0, 0, 1, 1, 2], [0], [0]>} : vector<1x8x8xbf16>, vector<1x8x8xbf16>, vector<1x8x8xf32> -> vector<1x8x8xf32>
    "tpu.trace_stop"() : () -> ()
    %33 = arith.addf %29, %32 : vector<1x8x8xf32>
    %c0_31 = arith.constant 0 : index
    %c0_32 = arith.constant 0 : index
    %c0_33 = arith.constant 0 : index
    %34 = vector.load %arg9[%c0_31, %c0_32, %c0_33] : memref<1x8x8xf32, #tpu.memory_space<vmem>>, vector<1x8x8xf32>
    tpu.vector_store %arg9[%c0_31, %c0_32, %c0_33], %33 {strides = array<i32>} : memref<1x8x8xf32, #tpu.memory_space<vmem>>, vector<1x8x8xf32>,
    %c0_34 = arith.constant 0 : index
    %c0_35 = arith.constant 0 : index
    %c0_36 = arith.constant 0 : index
    %35 = vector.load %arg7[%c0_34, %c0_35, %c0_36] : memref<1x8x1xf32, #tpu.memory_space<vmem>>, vector<1x8x1xf32>
    tpu.vector_store %arg7[%c0_34, %c0_35, %c0_36], %14 {strides = array<i32>} : memref<1x8x1xf32, #tpu.memory_space<vmem>>, vector<1x8x1xf32>,
    %c0_i32_37 = arith.constant 0 : i32
    %36 = arith.cmpi eq, %arg1, %c0_i32_37 : i32
    %37 = arith.extui %36 : i1 to i32
    %c0_i32_38 = arith.constant 0 : i32
    %38 = arith.cmpi ne, %37, %c0_i32_38 : i32
    scf.if %38 {
      %c0_39 = arith.constant 0 : index
      %c0_40 = arith.constant 0 : index
      %c0_41 = arith.constant 0 : index
      %39 = vector.load %arg9[%c0_39, %c0_40, %c0_41] : memref<1x8x8xf32, #tpu.memory_space<vmem>>, vector<1x8x8xf32>
      %c0_42 = arith.constant 0 : index
      %c0_43 = arith.constant 0 : index
      %c0_44 = arith.constant 0 : index
      %40 = vector.load %arg8[%c0_42, %c0_43, %c0_44] : memref<1x8x1xf32, #tpu.memory_space<vmem>>, vector<1x8x1xf32>
      %41 = tpu.reciprocal %40 {approx = true} : vector<1x8x1xf32> -> vector<1x8x1xf32>
      %42 = vector.broadcast %41 : vector<1x8x1xf32> to vector<1x8x8xf32>
      %43 = arith.mulf %39, %42 : vector<1x8x8xf32>
      %c0_45 = arith.constant 0 : index
      %c0_46 = arith.constant 0 : index
      %c0_47 = arith.constant 0 : index
      %44 = vector.load %arg6[%c0_45, %c0_46, %c0_47] : memref<1x8x8xf32, #tpu.memory_space<vmem>>, vector<1x8x8xf32>
      tpu.vector_store %arg6[%c0_45, %c0_46, %c0_47], %43 {strides = array<i32>} : memref<1x8x8xf32, #tpu.memory_space<vmem>>, vector<1x8x8xf32>,
    } else {
    }
    return
  }
  func.func @transform_0(%arg0: i32, %arg1: i32) -> (i32, i32, i32) {
    %c0_i32 = arith.constant 0 : i32
    %c0_i32_0 = arith.constant 0 : i32
    %c0_i32_1 = arith.constant 0 : i32
    return %arg0, %c0_i32, %c0_i32_0 : i32, i32, i32
  }
  func.func @transform_1(%arg0: i32, %arg1: i32) -> (i32, i32, i32) {
    %c0_i32 = arith.constant 0 : i32
    %c0_i32_0 = arith.constant 0 : i32
    return %arg0, %arg1, %c0_i32 : i32, i32, i32
  }
  func.func @transform_2(%arg0: i32, %arg1: i32) -> (i32, i32, i32) {
    %c0_i32 = arith.constant 0 : i32
    %c0_i32_0 = arith.constant 0 : i32
    return %arg0, %arg1, %c0_i32 : i32, i32, i32
  }
  func.func @transform_3(%arg0: i32, %arg1: i32) -> (i32, i32, i32) {
    %c0_i32 = arith.constant 0 : i32
    %c0_i32_0 = arith.constant 0 : i32
    return %arg0, %c0_i32, %arg1 : i32, i32, i32
  }
  func.func @transform_4(%arg0: i32, %arg1: i32) -> (i32, i32, i32) {
    %c0_i32 = arith.constant 0 : i32
    %c0_i32_0 = arith.constant 0 : i32
    %c0_i32_1 = arith.constant 0 : i32
    return %arg0, %c0_i32, %c0_i32_0 : i32, i32, i32
  }
}

module attributes {stable_mosaic.version = 11 : i64} {
  func.func @_fused_matmul_kernel(%arg0: i32, %arg1: i32, %arg2: i32, %arg3: memref<16x128xbf16, #tpu.memory_space<vmem>>, %arg4: memref<128x128xbf16, #tpu.memory_space<vmem>>, %arg5: memref<1x128xf32, #tpu.memory_space<vmem>>, %arg6: memref<16x128xf32, #tpu.memory_space<vmem>>, %arg7: memref<16x128xf32, #tpu.memory_space<vmem>>) attributes {dimension_semantics = [#tpu.dimension_semantics<parallel>, #tpu.dimension_semantics<parallel>, #tpu.dimension_semantics<arbitrary>], iteration_bounds = array<i64: 1, 1, 1>, scalar_prefetch = 0 : i64, scratch_operands = 1 : i64, tpu.core_type = #tpu.core_type<tc>, window_params = [{transform_indices = @transform_0, window_bounds = array<i64: 16, 128>}, {transform_indices = @transform_1, window_bounds = array<i64: 128, 128>}, {transform_indices = @transform_2, window_bounds = array<i64: 1, 128>}, {transform_indices = @transform_3, window_bounds = array<i64: 16, 128>}]} {
    %c0_i32 = arith.constant 0 : i32
    %0 = arith.cmpi eq, %arg2, %c0_i32 : i32
    %1 = arith.extui %0 : i1 to i32
    %c0_i32_0 = arith.constant 0 : i32
    %2 = arith.cmpi ne, %1, %c0_i32_0 : i32
    scf.if %2 {
      %cst_10 = arith.constant 0.000000e+00 : f32
      %12 = vector.broadcast %cst_10 : f32 to vector<16x128xf32>
      %c0_11 = arith.constant 0 : index
      %c0_12 = arith.constant 0 : index
      %13 = vector.load %arg7[%c0_11, %c0_12] : memref<16x128xf32, #tpu.memory_space<vmem>>, vector<16x128xf32>
      tpu.vector_store %arg7[%c0_11, %c0_12], %12 {strides = array<i32>} : memref<16x128xf32, #tpu.memory_space<vmem>>, vector<16x128xf32>,
    } else {
    }
    %c0 = arith.constant 0 : index
    %c0_1 = arith.constant 0 : index
    %3 = vector.load %arg7[%c0, %c0_1] : memref<16x128xf32, #tpu.memory_space<vmem>>, vector<16x128xf32>
    %c0_2 = arith.constant 0 : index
    %c0_3 = arith.constant 0 : index
    %4 = vector.load %arg3[%c0_2, %c0_3] : memref<16x128xbf16, #tpu.memory_space<vmem>>, vector<16x128xbf16>
    %c0_4 = arith.constant 0 : index
    %c0_5 = arith.constant 0 : index
    %5 = vector.load %arg4[%c0_4, %c0_5] : memref<128x128xbf16, #tpu.memory_space<vmem>>, vector<128x128xbf16>
    %cst = arith.constant dense<0.000000e+00> : vector<16x128xf32>
    %6 = tpu.matmul %4, %5, %cst {dimension_numbers = #tpu.dot_dimension_numbers<[1], [0], [0], [1], [0, 0, 1, 1], [], []>} : vector<16x128xbf16>, vector<128x128xbf16>, vector<16x128xf32> -> vector<16x128xf32>
    %7 = arith.addf %3, %6 : vector<16x128xf32>
    %c0_6 = arith.constant 0 : index
    %c0_7 = arith.constant 0 : index
    %8 = vector.load %arg7[%c0_6, %c0_7] : memref<16x128xf32, #tpu.memory_space<vmem>>, vector<16x128xf32>
    tpu.vector_store %arg7[%c0_6, %c0_7], %7 {strides = array<i32>} : memref<16x128xf32, #tpu.memory_space<vmem>>, vector<16x128xf32>,
    %c0_i32_8 = arith.constant 0 : i32
    %9 = arith.cmpi eq, %arg2, %c0_i32_8 : i32
    %10 = arith.extui %9 : i1 to i32
    %c0_i32_9 = arith.constant 0 : i32
    %11 = arith.cmpi ne, %10, %c0_i32_9 : i32
    scf.if %11 {
      %c0_10 = arith.constant 0 : index
      %c0_11 = arith.constant 0 : index
      %12 = vector.load %arg7[%c0_10, %c0_11] : memref<16x128xf32, #tpu.memory_space<vmem>>, vector<16x128xf32>
      %c0_12 = arith.constant 0 : index
      %c0_13 = arith.constant 0 : index
      %13 = vector.load %arg5[%c0_12, %c0_13] : memref<1x128xf32, #tpu.memory_space<vmem>>, vector<1x128xf32>
      %14 = vector.broadcast %13 : vector<1x128xf32> to vector<16x128xf32>
      %15 = arith.addf %12, %14 : vector<16x128xf32>
      %cst_14 = arith.constant 5.000000e-01 : f32
      %16 = vector.broadcast %cst_14 : f32 to vector<16x128xf32>
      %17 = arith.mulf %16, %15 : vector<16x128xf32>
      %18 = arith.mulf %15, %15 : vector<16x128xf32>
      %19 = arith.mulf %18, %15 : vector<16x128xf32>
      %cst_15 = arith.constant 4.471500e-02 : f32
      %20 = vector.broadcast %cst_15 : f32 to vector<16x128xf32>
      %21 = arith.mulf %20, %19 : vector<16x128xf32>
      %22 = arith.addf %15, %21 : vector<16x128xf32>
      %cst_16 = arith.constant 0.797884583 : f32
      %23 = vector.broadcast %cst_16 : f32 to vector<16x128xf32>
      %24 = arith.mulf %23, %22 : vector<16x128xf32>
      %25 = math.tanh %24 : vector<16x128xf32>
      %cst_17 = arith.constant 1.000000e+00 : f32
      %26 = vector.broadcast %cst_17 : f32 to vector<16x128xf32>
      %27 = arith.addf %26, %25 : vector<16x128xf32>
      %28 = arith.mulf %17, %27 : vector<16x128xf32>
      %c0_18 = arith.constant 0 : index
      %c0_19 = arith.constant 0 : index
      %29 = vector.load %arg6[%c0_18, %c0_19] : memref<16x128xf32, #tpu.memory_space<vmem>>, vector<16x128xf32>
      tpu.vector_store %arg6[%c0_18, %c0_19], %28 {strides = array<i32>} : memref<16x128xf32, #tpu.memory_space<vmem>>, vector<16x128xf32>,
    } else {
    }
    return
  }
  func.func @transform_0(%arg0: i32, %arg1: i32, %arg2: i32) -> (i32, i32) {
    %c0_i32 = arith.constant 0 : i32
    return %arg0, %arg2 : i32, i32
  }
  func.func @transform_1(%arg0: i32, %arg1: i32, %arg2: i32) -> (i32, i32) {
    %c0_i32 = arith.constant 0 : i32
    return %arg2, %arg1 : i32, i32
  }
  func.func @transform_2(%arg0: i32, %arg1: i32, %arg2: i32) -> (i32, i32) {
    %c0_i32 = arith.constant 0 : i32
    %c0_i32_0 = arith.constant 0 : i32
    return %c0_i32, %arg1 : i32, i32
  }
  func.func @transform_3(%arg0: i32, %arg1: i32, %arg2: i32) -> (i32, i32) {
    %c0_i32 = arith.constant 0 : i32
    return %arg0, %arg1 : i32, i32
  }
}

module attributes {stable_mosaic.version = 11 : i64} {
  func.func @_fused_matmul_kernel(%arg0: i32, %arg1: i32, %arg2: i32, %arg3: memref<16x128xbf16, #tpu.memory_space<vmem>>, %arg4: memref<128x128xbf16, #tpu.memory_space<vmem>>, %arg5: memref<1x128xf32, #tpu.memory_space<vmem>>, %arg6: memref<16x128xf32, #tpu.memory_space<vmem>>, %arg7: memref<1x128xf32, #tpu.memory_space<vmem>>, %arg8: memref<1x128xf32, #tpu.memory_space<vmem>>, %arg9: memref<16x128xf32, #tpu.memory_space<vmem>>, %arg10: memref<16x128xf32, #tpu.memory_space<vmem>>) attributes {dimension_semantics = [#tpu.dimension_semantics<parallel>, #tpu.dimension_semantics<parallel>, #tpu.dimension_semantics<arbitrary>], iteration_bounds = array<i64: 1, 1, 1>, scalar_prefetch = 0 : i64, scratch_operands = 1 : i64, tpu.core_type = #tpu.core_type<tc>, window_params = [{transform_indices = @transform_0, window_bounds = array<i64: 16, 128>}, {transform_indices = @transform_1, window_bounds = array<i64: 128, 128>}, {transform_indices = @transform_2, window_bounds = array<i64: 1, 128>}, {transform_indices = @transform_3, window_bounds = array<i64: 16, 128>}, {transform_indices = @transform_4, window_bounds = array<i64: 1, 128>}, {transform_indices = @transform_5, window_bounds = array<i64: 1, 128>}, {transform_indices = @transform_6, window_bounds = array<i64: 16, 128>}]} {
    %c0_i32 = arith.constant 0 : i32
    %0 = arith.cmpi eq, %arg2, %c0_i32 : i32
    %1 = arith.extui %0 : i1 to i32
    %c0_i32_0 = arith.constant 0 : i32
    %2 = arith.cmpi ne, %1, %c0_i32_0 : i32
    scf.if %2 {
      %cst_10 = arith.constant 0.000000e+00 : f32
      %12 = vector.broadcast %cst_10 : f32 to vector<16x128xf32>
      %c0_11 = arith.constant 0 : index
      %c0_12 = arith.constant 0 : index
      %13 = vector.load %arg10[%c0_11, %c0_12] : memref<16x128xf32, #tpu.memory_space<vmem>>, vector<16x128xf32>
      tpu.vector_store %arg10[%c0_11, %c0_12], %12 {strides = array<i32>} : memref<16x128xf32, #tpu.memory_space<vmem>>, vector<16x128xf32>,
    } else {
    }
    %c0 = arith.constant 0 : index
    %c0_1 = arith.constant 0 : index
    %3 = vector.load %arg10[%c0, %c0_1] : memref<16x128xf32, #tpu.memory_space<vmem>>, vector<16x128xf32>
    %c0_2 = arith.constant 0 : index
    %c0_3 = arith.constant 0 : index
    %4 = vector.load %arg3[%c0_2, %c0_3] : memref<16x128xbf16, #tpu.memory_space<vmem>>, vector<16x128xbf16>
    %c0_4 = arith.constant 0 : index
    %c0_5 = arith.constant 0 : index
    %5 = vector.load %arg4[%c0_4, %c0_5] : memref<128x128xbf16, #tpu.memory_space<vmem>>, vector<128x128xbf16>
    %cst = arith.constant dense<0.000000e+00> : vector<16x128xf32>
    %6 = tpu.matmul %4, %5, %cst {dimension_numbers = #tpu.dot_dimension_numbers<[1], [0], [0], [1], [0, 0, 1, 1], [], []>} : vector<16x128xbf16>, vector<128x128xbf16>, vector<16x128xf32> -> vector<16x128xf32>
    %7 = arith.addf %3, %6 : vector<16x128xf32>
    %c0_6 = arith.constant 0 : index
    %c0_7 = arith.constant 0 : index
    %8 = vector.load %arg10[%c0_6, %c0_7] : memref<16x128xf32, #tpu.memory_space<vmem>>, vector<16x128xf32>
    tpu.vector_store %arg10[%c0_6, %c0_7], %7 {strides = array<i32>} : memref<16x128xf32, #tpu.memory_space<vmem>>, vector<16x128xf32>,
    %c0_i32_8 = arith.constant 0 : i32
    %9 = arith.cmpi eq, %arg2, %c0_i32_8 : i32
    %10 = arith.extui %9 : i1 to i32
    %c0_i32_9 = arith.constant 0 : i32
    %11 = arith.cmpi ne, %10, %c0_i32_9 : i32
    scf.if %11 {
      %c0_10 = arith.constant 0 : index
      %c0_11 = arith.constant 0 : index
      %12 = vector.load %arg10[%c0_10, %c0_11] : memref<16x128xf32, #tpu.memory_space<vmem>>, vector<16x128xf32>
      %c0_12 = arith.constant 0 : index
      %c0_13 = arith.constant 0 : index
      %13 = vector.load %arg5[%c0_12, %c0_13] : memref<1x128xf32, #tpu.memory_space<vmem>>, vector<1x128xf32>
      %14 = vector.broadcast %13 : vector<1x128xf32> to vector<16x128xf32>
      %15 = arith.addf %12, %14 : vector<16x128xf32>
      %c0_14 = arith.constant 0 : index
      %c0_15 = arith.constant 0 : index
      %16 = vector.load %arg6[%c0_14, %c0_15] : memref<16x128xf32, #tpu.memory_space<vmem>>, vector<16x128xf32>
      %17 = arith.addf %15, %16 : vector<16x128xf32>
      %18 = tpu.iota {dimensions = array<i32: 1>} : vector<16x128xi32>
      %c32_i32 = arith.constant 32 : i32
      %19 = vector.broadcast %c32_i32 : i32 to vector<16x128xi32>
      %20 = arith.cmpi slt, %18, %19 : vector<16x128xi32>
      %cst_16 = arith.constant 0.000000e+00 : f32
      %21 = vector.broadcast %cst_16 : f32 to vector<16x128xf32>
      %22 = arith.select %20, %17, %21 : vector<16x128xi1>, vector<16x128xf32>
      %cst_17 = arith.constant dense<0.000000e+00> : vector<16xf32>
      %23 = vector.multi_reduction <add>, %22, %cst_17 [1] : vector<16x128xf32> to vector<16xf32>
      %24 = vector.shape_cast %23 : vector<16xf32> to vector<16x1xf32>
      %cst_18 = arith.constant 3.125000e-02 : f32
      %25 = vector.broadcast %cst_18 : f32 to vector<16x1xf32>
      %26 = arith.mulf %24, %25 : vector<16x1xf32>
      %27 = vector.broadcast %26 : vector<16x1xf32> to vector<16x128xf32>
      %28 = arith.subf %17, %27 : vector<16x128xf32>
      %cst_19 = arith.constant 0.000000e+00 : f32
      %29 = vector.broadcast %cst_19 : f32 to vector<16x128xf32>
      %30 = arith.select %20, %28, %29 : vector<16x128xi1>, vector<16x128xf32>
      %31 = arith.mulf %30, %30 : vector<16x128xf32>
      %cst_20 = arith.constant dense<0.000000e+00> : vector<16xf32>
      %32 = vector.multi_reduction <add>, %31, %cst_20 [1] : vector<16x128xf32> to vector<16xf32>
      %33 = vector.shape_cast %32 : vector<16xf32> to vector<16x1xf32>
      %cst_21 = arith.constant 3.125000e-02 : f32
      %34 = vector.broadcast %cst_21 : f32 to vector<16x1xf32>
      %35 = arith.mulf %33, %34 : vector<16x1xf32>
      %cst_22 = arith.constant 9.99999996E-13 : f32
      %36 = vector.broadcast %cst_22 : f32 to vector<16x1xf32>
      %37 = arith.addf %35, %36 : vector<16x1xf32>
      %38 = math.rsqrt %37 : vector<16x1xf32>
      %39 = vector.broadcast %38 : vector<16x1xf32> to vector<16x128xf32>
      %40 = arith.mulf %30, %39 : vector<16x128xf32>
      %c0_23 = arith.constant 0 : index
      %c0_24 = arith.constant 0 : index
      %41 = vector.load %arg7[%c0_23, %c0_24] : memref<1x128xf32, #tpu.memory_space<vmem>>, vector<1x128xf32>
      %42 = vector.broadcast %41 : vector<1x128xf32> to vector<16x128xf32>
      %43 = arith.mulf %40, %42 : vector<16x128xf32>
      %c0_25 = arith.constant 0 : index
      %c0_26 = arith.constant 0 : index
      %44 = vector.load %arg8[%c0_25, %c0_26] : memref<1x128xf32, #tpu.memory_space<vmem>>, vector<1x128xf32>
      %45 = vector.broadcast %44 : vector<1x128xf32> to vector<16x128xf32>
      %46 = arith.addf %43, %45 : vector<16x128xf32>
      %c0_27 = arith.constant 0 : index
      %c0_28 = arith.constant 0 : index
      %47 = vector.load %arg9[%c0_27, %c0_28] : memref<16x128xf32, #tpu.memory_space<vmem>>, vector<16x128xf32>
      tpu.vector_store %arg9[%c0_27, %c0_28], %46 {strides = array<i32>} : memref<16x128xf32, #tpu.memory_space<vmem>>, vector<16x128xf32>,
    } else {
    }
    return
  }
  func.func @transform_0(%arg0: i32, %arg1: i32, %arg2: i32) -> (i32, i32) {
    %c0_i32 = arith.constant 0 : i32
    return %arg0, %arg2 : i32, i32
  }
  func.func @transform_1(%arg0: i32, %arg1: i32, %arg2: i32) -> (i32, i32) {
    %c0_i32 = arith.constant 0 : i32
    return %arg2, %arg1 : i32, i32
  }
  func.func @transform_2(%arg0: i32, %arg1: i32, %arg2: i32) -> (i32, i32) {
    %c0_i32 = arith.constant 0 : i32
    %c0_i32_0 = arith.constant 0 : i32
    return %c0_i32, %arg1 : i32, i32
  }
  func.func @transform_3(%arg0: i32, %arg1: i32, %arg2: i32) -> (i32, i32) {
    %c0_i32 = arith.constant 0 : i32
    return %arg0, %arg1 : i32, i32
  }
  func.func @transform_4(%arg0: i32, %arg1: i32, %arg2: i32) -> (i32, i32) {
    %c0_i32 = arith.constant 0 : i32
    %c0_i32_0 = arith.constant 0 : i32
    return %c0_i32, %arg1 : i32, i32
  }
  func.func @transform_5(%arg0: i32, %arg1: i32, %arg2: i32) -> (i32, i32) {
    %c0_i32 = arith.constant 0 : i32
    %c0_i32_0 = arith.constant 0 : i32
    return %c0_i32, %arg1 : i32, i32
  }
  func.func @transform_6(%arg0: i32, %arg1: i32, %arg2: i32) -> (i32, i32) {
    %c0_i32 = arith.constant 0 : i32
    return %arg0, %arg1 : i32, i32
  }
}

module attributes {stable_mosaic.version = 11 : i64} {
  func.func @_flash_attn_kernel(%arg0: i32, %arg1: i32, %arg2: memref<1x8x8xbf16, #tpu.memory_space<vmem>>, %arg3: memref<1x16x8xbf16, #tpu.memory_space<vmem>>, %arg4: memref<1x16x8xbf16, #tpu.memory_space<vmem>>, %arg5: memref<1x1x16xf32, #tpu.memory_space<vmem>>, %arg6: memref<1x8x8xf32, #tpu.memory_space<vmem>>, %arg7: memref<1x8x1xf32, #tpu.memory_space<vmem>>, %arg8: memref<1x8x1xf32, #tpu.memory_space<vmem>>, %arg9: memref<1x8x8xf32, #tpu.memory_space<vmem>>) attributes {dimension_semantics = [#tpu.dimension_semantics<parallel>, #tpu.dimension_semantics<arbitrary>], iteration_bounds = array<i64: 8, 1>, scalar_prefetch = 0 : i64, scratch_operands = 3 : i64, tpu.core_type = #tpu.core_type<tc>, window_params = [{transform_indices = @transform_0, window_bounds = array<i64: 1, 8, 8>}, {transform_indices = @transform_1, window_bounds = array<i64: 1, 16, 8>}, {transform_indices = @transform_2, window_bounds = array<i64: 1, 16, 8>}, {transform_indices = @transform_3, window_bounds = array<i64: 1, 1, 16>}, {transform_indices = @transform_4, window_bounds = array<i64: 1, 8, 8>}]} {
    %c0_i32 = arith.constant 0 : i32
    %0 = arith.cmpi eq, %arg1, %c0_i32 : i32
    %1 = arith.extui %0 : i1 to i32
    %c0_i32_0 = arith.constant 0 : i32
    %2 = arith.cmpi ne, %1, %c0_i32_0 : i32
    scf.if %2 {
      %cst_39 = arith.constant -1.000000e+30 : f32
      %39 = vector.broadcast %cst_39 : f32 to vector<1x8x1xf32>
      %c0_40 = arith.constant 0 : index
      %c0_41 = arith.constant 0 : index
      %c0_42 = arith.constant 0 : index
      %40 = vector.load %arg7[%c0_40, %c0_41, %c0_42] : memref<1x8x1xf32, #tpu.memory_space<vmem>>, vector<1x8x1xf32>
      tpu.vector_store %arg7[%c0_40, %c0_41, %c0_42], %39 {strides = array<i32>} : memref<1x8x1xf32, #tpu.memory_space<vmem>>, vector<1x8x1xf32>,
      %cst_43 = arith.constant 0.000000e+00 : f32
      %41 = vector.broadcast %cst_43 : f32 to vector<1x8x1xf32>
      %c0_44 = arith.constant 0 : index
      %c0_45 = arith.constant 0 : index
      %c0_46 = arith.constant 0 : index
      %42 = vector.load %arg8[%c0_44, %c0_45, %c0_46] : memref<1x8x1xf32, #tpu.memory_space<vmem>>, vector<1x8x1xf32>
      tpu.vector_store %arg8[%c0_44, %c0_45, %c0_46], %41 {strides = array<i32>} : memref<1x8x1xf32, #tpu.memory_space<vmem>>, vector<1x8x1xf32>,
      %cst_47 = arith.constant 0.000000e+00 : f32
      %43 = vector.broadcast %cst_47 : f32 to vector<1x8x8xf32>
      %c0_48 = arith.constant 0 : index
      %c0_49 = arith.constant 0 : index
      %c0_50 = arith.constant 0 : index
      %44 = vector.load %arg9[%c0_48, %c0_49, %c0_50] : memref<1x8x8xf32, #tpu.memory_space<vmem>>, vector<1x8x8xf32>
      tpu.vector_store %arg9[%c0_48, %c0_49, %c0_50], %43 {strides = array<i32>} : memref<1x8x8xf32, #tpu.memory_space<vmem>>, vector<1x8x8xf32>,
    } else {
    }
    %c0 = arith.constant 0 : index
    %c0_1 = arith.constant 0 : index
    %c0_2 = arith.constant 0 : index
    %3 = vector.load %arg2[%c0, %c0_1, %c0_2] : memref<1x8x8xbf16, #tpu.memory_space<vmem>>, vector<1x8x8xbf16>
    %c0_3 = arith.constant 0 : index
    %c0_4 = arith.constant 0 : index
    %c0_5 = arith.constant 0 : index
    %4 = vector.load %arg3[%c0_3, %c0_4, %c0_5] : memref<1x16x8xbf16, #tpu.memory_space<vmem>>, vector<1x16x8xbf16>
    "tpu.trace_start"() <{level = 10 : i32, message = "bqd,bkd->bqk"}> : () -> ()
    %cst = arith.constant dense<0.000000e+00> : vector<1x8x16xf32>
    %5 = tpu.matmul %3, %4, %cst {dimension_numbers = #tpu.dot_dimension_numbers<[2], [2], [1], [1], [0, 0, 0, 1, 1, 1], [0], [0]>} : vector<1x8x8xbf16>, vector<1x16x8xbf16>, vector<1x8x16xf32> -> vector<1x8x16xf32>
    "tpu.trace_stop"() : () -> ()
    %cst_6 = arith.constant 0.353553385 : f32
    %6 = vector.broadcast %cst_6 : f32 to vector<1x8x16xf32>
    %7 = arith.mulf %5, %6 : vector<1x8x16xf32>
    %c0_7 = arith.constant 0 : index
    %c0_8 = arith.constant 0 : index
    %c0_9 = arith.constant 0 : index
    %8 = vector.load %arg5[%c0_7, %c0_8, %c0_9] : memref<1x1x16xf32, #tpu.memory_space<vmem>>, vector<1x1x16xf32>
    %9 = vector.broadcast %8 : vector<1x1x16xf32> to vector<1x8x16xf32>
    %10 = arith.addf %7, %9 : vector<1x8x16xf32>
    %c0_10 = arith.constant 0 : index
    %c0_11 = arith.constant 0 : index
    %c0_12 = arith.constant 0 : index
    %11 = vector.load %arg7[%c0_10, %c0_11, %c0_12] : memref<1x8x1xf32, #tpu.memory_space<vmem>>, vector<1x8x1xf32>
    %cst_13 = arith.constant dense<0xFF800000> : vector<1x8xf32>
    %12 = vector.multi_reduction <maximumf>, %10, %cst_13 [2] : vector<1x8x16xf32> to vector<1x8xf32>
    %13 = vector.shape_cast %12 : vector<1x8xf32> to vector<1x8x1xf32>
    %14 = arith.maximumf %11, %13 : vector<1x8x1xf32>
    %c0_14 = arith.constant 0 : index
    %c0_15 = arith.constant 0 : index
    %c0_16 = arith.constant 0 : index
    %15 = vector.load %arg7[%c0_14, %c0_15, %c0_16] : memref<1x8x1xf32, #tpu.memory_space<vmem>>, vector<1x8x1xf32>
    %16 = arith.subf %15, %14 : vector<1x8x1xf32>
    %17 = math.exp %16 : vector<1x8x1xf32>
    %18 = vector.broadcast %14 : vector<1x8x1xf32> to vector<1x8x16xf32>
    %19 = arith.subf %10, %18 : vector<1x8x16xf32>
    %20 = math.exp %19 : vector<1x8x16xf32>
    %c0_17 = arith.constant 0 : index
    %c0_18 = arith.constant 0 : index
    %c0_19 = arith.constant 0 : index
    %21 = vector.load %arg8[%c0_17, %c0_18, %c0_19] : memref<1x8x1xf32, #tpu.memory_space<vmem>>, vector<1x8x1xf32>
    %22 = arith.mulf %17, %21 : vector<1x8x1xf32>
    %cst_20 = arith.constant dense<0.000000e+00> : vector<1x8xf32>
    %23 = vector.multi_reduction <add>, %20, %cst_20 [2] : vector<1x8x16xf32> to vector<1x8xf32>
    %24 = vector.shape_cast %23 : vector<1x8xf32> to vector<1x8x1xf32>
    %25 = arith.addf %22, %24 : vector<1x8x1xf32>
    %c0_21 = arith.constant 0 : index
    %c0_22 = arith.constant 0 : index
    %c0_23 = arith.constant 0 : index
    %26 = vector.load %arg8[%c0_21, %c0_22, %c0_23] : memref<1x8x1xf32, #tpu.memory_space<vmem>>, vector<1x8x1xf32>
    tpu.vector_store %arg8[%c0_21, %c0_22, %c0_23], %25 {strides = array<i32>} : memref<1x8x1xf32, #tpu.memory_space<vmem>>, vector<1x8x1xf32>,
    %c0_24 = arith.constant 0 : index
    %c0_25 = arith.constant 0 : index
    %c0_26 = arith.constant 0 : index
    %27 = vector.load %arg9[%c0_24, %c0_25, %c0_26] : memref<1x8x8xf32, #tpu.memory_space<vmem>>, vector<1x8x8xf32>
    %28 = vector.broadcast %17 : vector<1x8x1xf32> to vector<1x8x8xf32>
    %29 = arith.mulf %28, %27 : vector<1x8x8xf32>
    %30 = arith.truncf %20 : vector<1x8x16xf32> to vector<1x8x16xbf16>
    %c0_27 = arith.constant 0 : index
    %c0_28 = arith.constant 0 : index
    %c0_29 = arith.constant 0 : index
    %31 = vector.load %arg4[%c0_27, %c0_28, %c0_29] : memref<1x16x8xbf16, #tpu.memory_space<vmem>>, vector<1x16x8xbf16>
    "tpu.trace_start"() <{level = 10 : i32, message = "bqk,bkd->bqd"}> : () -> ()
    %cst_30 = arith.constant dense<0.000000e+00> : vector<1x8x8xf32>
    %32 = tpu.matmul %30, %31, %cst_30 {dimension_numbers = #tpu.dot_dimension_numbers<[2], [1], [1], [2], [0, 0, 0, 1, 1, 2], [0], [0]>} : vector<1x8x16xbf16>, vector<1x16x8xbf16>, vector<1x8x8xf32> -> vector<1x8x8xf32>
    "tpu.trace_stop"() : () -> ()
    %33 = arith.addf %29, %32 : vector<1x8x8xf32>
    %c0_31 = arith.constant 0 : index
    %c0_32 = arith.constant 0 : index
    %c0_33 = arith.constant 0 : index
    %34 = vector.load %arg9[%c0_31, %c0_32, %c0_33] : memref<1x8x8xf32, #tpu.memory_space<vmem>>, vector<1x8x8xf32>
    tpu.vector_store %arg9[%c0_31, %c0_32, %c0_33], %33 {strides = array<i32>} : memref<1x8x8xf32, #tpu.memory_space<vmem>>, vector<1x8x8xf32>,
    %c0_34 = arith.constant 0 : index
    %c0_35 = arith.constant 0 : index
    %c0_36 = arith.constant 0 : index
    %35 = vector.load %arg7[%c0_34, %c0_35, %c0_36] : memref<1x8x1xf32, #tpu.memory_space<vmem>>, vector<1x8x1xf32>
    tpu.vector_store %arg7[%c0_34, %c0_35, %c0_36], %14 {strides = array<i32>} : memref<1x8x1xf32, #tpu.memory_space<vmem>>, vector<1x8x1xf32>,
    %c0_i32_37 = arith.constant 0 : i32
    %36 = arith.cmpi eq, %arg1, %c0_i32_37 : i32
    %37 = arith.extui %36 : i1 to i32
    %c0_i32_38 = arith.constant 0 : i32
    %38 = arith.cmpi ne, %37, %c0_i32_38 : i32
    scf.if %38 {
      %c0_39 = arith.constant 0 : index
      %c0_40 = arith.constant 0 : index
      %c0_41 = arith.constant 0 : index
      %39 = vector.load %arg9[%c0_39, %c0_40, %c0_41] : memref<1x8x8xf32, #tpu.memory_space<vmem>>, vector<1x8x8xf32>
      %c0_42 = arith.constant 0 : index
      %c0_43 = arith.constant 0 : index
      %c0_44 = arith.constant 0 : index
      %40 = vector.load %arg8[%c0_42, %c0_43, %c0_44] : memref<1x8x1xf32, #tpu.memory_space<vmem>>, vector<1x8x1xf32>
      %41 = tpu.reciprocal %40 {approx = true} : vector<1x8x1xf32> -> vector<1x8x1xf32>
      %42 = vector.broadcast %41 : vector<1x8x1xf32> to vector<1x8x8xf32>
      %43 = arith.mulf %39, %42 : vector<1x8x8xf32>
      %c0_45 = arith.constant 0 : index
      %c0_46 = arith.constant 0 : index
      %c0_47 = arith.constant 0 : index
      %44 = vector.load %arg6[%c0_45, %c0_46, %c0_47] : memref<1x8x8xf32, #tpu.memory_space<vmem>>, vector<1x8x8xf32>
      tpu.vector_store %arg6[%c0_45, %c0_46, %c0_47], %43 {strides = array<i32>} : memref<1x8x8xf32, #tpu.memory_space<vmem>>, vector<1x8x8xf32>,
    } else {
    }
    return
  }
  func.func @transform_0(%arg0: i32, %arg1: i32) -> (i32, i32, i32) {
    %c0_i32 = arith.constant 0 : i32
    %c0_i32_0 = arith.constant 0 : i32
    %c0_i32_1 = arith.constant 0 : i32
    return %arg0, %c0_i32, %c0_i32_0 : i32, i32, i32
  }
  func.func @transform_1(%arg0: i32, %arg1: i32) -> (i32, i32, i32) {
    %c0_i32 = arith.constant 0 : i32
    %c0_i32_0 = arith.constant 0 : i32
    return %arg0, %arg1, %c0_i32 : i32, i32, i32
  }
  func.func @transform_2(%arg0: i32, %arg1: i32) -> (i32, i32, i32) {
    %c0_i32 = arith.constant 0 : i32
    %c0_i32_0 = arith.constant 0 : i32
    return %arg0, %arg1, %c0_i32 : i32, i32, i32
  }
  func.func @transform_3(%arg0: i32, %arg1: i32) -> (i32, i32, i32) {
    %c0_i32 = arith.constant 0 : i32
    %c0_i32_0 = arith.constant 0 : i32
    return %arg0, %c0_i32, %arg1 : i32, i32, i32
  }
  func.func @transform_4(%arg0: i32, %arg1: i32) -> (i32, i32, i32) {
    %c0_i32 = arith.constant 0 : i32
    %c0_i32_0 = arith.constant 0 : i32
    %c0_i32_1 = arith.constant 0 : i32
    return %arg0, %c0_i32, %c0_i32_0 : i32, i32, i32
  }
}

module attributes {stable_mosaic.version = 11 : i64} {
  func.func @_fused_matmul_kernel(%arg0: i32, %arg1: i32, %arg2: i32, %arg3: memref<8x128xbf16, #tpu.memory_space<vmem>>, %arg4: memref<128x128xbf16, #tpu.memory_space<vmem>>, %arg5: memref<1x128xf32, #tpu.memory_space<vmem>>, %arg6: memref<8x128xf32, #tpu.memory_space<vmem>>, %arg7: memref<8x128xf32, #tpu.memory_space<vmem>>) attributes {dimension_semantics = [#tpu.dimension_semantics<parallel>, #tpu.dimension_semantics<parallel>, #tpu.dimension_semantics<arbitrary>], iteration_bounds = array<i64: 1, 1, 1>, scalar_prefetch = 0 : i64, scratch_operands = 1 : i64, tpu.core_type = #tpu.core_type<tc>, window_params = [{transform_indices = @transform_0, window_bounds = array<i64: 8, 128>}, {transform_indices = @transform_1, window_bounds = array<i64: 128, 128>}, {transform_indices = @transform_2, window_bounds = array<i64: 1, 128>}, {transform_indices = @transform_3, window_bounds = array<i64: 8, 128>}]} {
    %c0_i32 = arith.constant 0 : i32
    %0 = arith.cmpi eq, %arg2, %c0_i32 : i32
    %1 = arith.extui %0 : i1 to i32
    %c0_i32_0 = arith.constant 0 : i32
    %2 = arith.cmpi ne, %1, %c0_i32_0 : i32
    scf.if %2 {
      %cst_10 = arith.constant 0.000000e+00 : f32
      %12 = vector.broadcast %cst_10 : f32 to vector<8x128xf32>
      %c0_11 = arith.constant 0 : index
      %c0_12 = arith.constant 0 : index
      %13 = vector.load %arg7[%c0_11, %c0_12] : memref<8x128xf32, #tpu.memory_space<vmem>>, vector<8x128xf32>
      tpu.vector_store %arg7[%c0_11, %c0_12], %12 {strides = array<i32>} : memref<8x128xf32, #tpu.memory_space<vmem>>, vector<8x128xf32>,
    } else {
    }
    %c0 = arith.constant 0 : index
    %c0_1 = arith.constant 0 : index
    %3 = vector.load %arg7[%c0, %c0_1] : memref<8x128xf32, #tpu.memory_space<vmem>>, vector<8x128xf32>
    %c0_2 = arith.constant 0 : index
    %c0_3 = arith.constant 0 : index
    %4 = vector.load %arg3[%c0_2, %c0_3] : memref<8x128xbf16, #tpu.memory_space<vmem>>, vector<8x128xbf16>
    %c0_4 = arith.constant 0 : index
    %c0_5 = arith.constant 0 : index
    %5 = vector.load %arg4[%c0_4, %c0_5] : memref<128x128xbf16, #tpu.memory_space<vmem>>, vector<128x128xbf16>
    %cst = arith.constant dense<0.000000e+00> : vector<8x128xf32>
    %6 = tpu.matmul %4, %5, %cst {dimension_numbers = #tpu.dot_dimension_numbers<[1], [0], [0], [1], [0, 0, 1, 1], [], []>} : vector<8x128xbf16>, vector<128x128xbf16>, vector<8x128xf32> -> vector<8x128xf32>
    %7 = arith.addf %3, %6 : vector<8x128xf32>
    %c0_6 = arith.constant 0 : index
    %c0_7 = arith.constant 0 : index
    %8 = vector.load %arg7[%c0_6, %c0_7] : memref<8x128xf32, #tpu.memory_space<vmem>>, vector<8x128xf32>
    tpu.vector_store %arg7[%c0_6, %c0_7], %7 {strides = array<i32>} : memref<8x128xf32, #tpu.memory_space<vmem>>, vector<8x128xf32>,
    %c0_i32_8 = arith.constant 0 : i32
    %9 = arith.cmpi eq, %arg2, %c0_i32_8 : i32
    %10 = arith.extui %9 : i1 to i32
    %c0_i32_9 = arith.constant 0 : i32
    %11 = arith.cmpi ne, %10, %c0_i32_9 : i32
    scf.if %11 {
      %c0_10 = arith.constant 0 : index
      %c0_11 = arith.constant 0 : index
      %12 = vector.load %arg7[%c0_10, %c0_11] : memref<8x128xf32, #tpu.memory_space<vmem>>, vector<8x128xf32>
      %c0_12 = arith.constant 0 : index
      %c0_13 = arith.constant 0 : index
      %13 = vector.load %arg5[%c0_12, %c0_13] : memref<1x128xf32, #tpu.memory_space<vmem>>, vector<1x128xf32>
      %14 = vector.broadcast %13 : vector<1x128xf32> to vector<8x128xf32>
      %15 = arith.addf %12, %14 : vector<8x128xf32>
      %16 = math.tanh %15 : vector<8x128xf32>
      %c0_14 = arith.constant 0 : index
      %c0_15 = arith.constant 0 : index
      %17 = vector.load %arg6[%c0_14, %c0_15] : memref<8x128xf32, #tpu.memory_space<vmem>>, vector<8x128xf32>
      tpu.vector_store %arg6[%c0_14, %c0_15], %16 {strides = array<i32>} : memref<8x128xf32, #tpu.memory_space<vmem>>, vector<8x128xf32>,
    } else {
    }
    return
  }
  func.func @transform_0(%arg0: i32, %arg1: i32, %arg2: i32) -> (i32, i32) {
    %c0_i32 = arith.constant 0 : i32
    return %arg0, %arg2 : i32, i32
  }
  func.func @transform_1(%arg0: i32, %arg1: i32, %arg2: i32) -> (i32, i32) {
    %c0_i32 = arith.constant 0 : i32
    return %arg2, %arg1 : i32, i32
  }
  func.func @transform_2(%arg0: i32, %arg1: i32, %arg2: i32) -> (i32, i32) {
    %c0_i32 = arith.constant 0 : i32
    %c0_i32_0 = arith.constant 0 : i32
    return %c0_i32, %arg1 : i32, i32
  }
  func.func @transform_3(%arg0: i32, %arg1: i32, %arg2: i32) -> (i32, i32) {
    %c0_i32 = arith.constant 0 : i32
    return %arg0, %arg1 : i32, i32
  }
}

module attributes {stable_mosaic.version = 11 : i64} {
  func.func @_fused_matmul_kernel(%arg0: i32, %arg1: i32, %arg2: i32, %arg3: memref<24x128xbf16, #tpu.memory_space<vmem>>, %arg4: memref<128x128xbf16, #tpu.memory_space<vmem>>, %arg5: memref<1x128xf32, #tpu.memory_space<vmem>>, %arg6: memref<24x128xf32, #tpu.memory_space<vmem>>, %arg7: memref<24x128xf32, #tpu.memory_space<vmem>>) attributes {dimension_semantics = [#tpu.dimension_semantics<parallel>, #tpu.dimension_semantics<parallel>, #tpu.dimension_semantics<arbitrary>], iteration_bounds = array<i64: 1, 1, 1>, scalar_prefetch = 0 : i64, scratch_operands = 1 : i64, tpu.core_type = #tpu.core_type<tc>, window_params = [{transform_indices = @transform_0, window_bounds = array<i64: 24, 128>}, {transform_indices = @transform_1, window_bounds = array<i64: 128, 128>}, {transform_indices = @transform_2, window_bounds = array<i64: 1, 128>}, {transform_indices = @transform_3, window_bounds = array<i64: 24, 128>}]} {
    %c0_i32 = arith.constant 0 : i32
    %0 = arith.cmpi eq, %arg2, %c0_i32 : i32
    %1 = arith.extui %0 : i1 to i32
    %c0_i32_0 = arith.constant 0 : i32
    %2 = arith.cmpi ne, %1, %c0_i32_0 : i32
    scf.if %2 {
      %cst_10 = arith.constant 0.000000e+00 : f32
      %12 = vector.broadcast %cst_10 : f32 to vector<24x128xf32>
      %c0_11 = arith.constant 0 : index
      %c0_12 = arith.constant 0 : index
      %13 = vector.load %arg7[%c0_11, %c0_12] : memref<24x128xf32, #tpu.memory_space<vmem>>, vector<24x128xf32>
      tpu.vector_store %arg7[%c0_11, %c0_12], %12 {strides = array<i32>} : memref<24x128xf32, #tpu.memory_space<vmem>>, vector<24x128xf32>,
    } else {
    }
    %c0 = arith.constant 0 : index
    %c0_1 = arith.constant 0 : index
    %3 = vector.load %arg7[%c0, %c0_1] : memref<24x128xf32, #tpu.memory_space<vmem>>, vector<24x128xf32>
    %c0_2 = arith.constant 0 : index
    %c0_3 = arith.constant 0 : index
    %4 = vector.load %arg3[%c0_2, %c0_3] : memref<24x128xbf16, #tpu.memory_space<vmem>>, vector<24x128xbf16>
    %c0_4 = arith.constant 0 : index
    %c0_5 = arith.constant 0 : index
    %5 = vector.load %arg4[%c0_4, %c0_5] : memref<128x128xbf16, #tpu.memory_space<vmem>>, vector<128x128xbf16>
    %cst = arith.constant dense<0.000000e+00> : vector<24x128xf32>
    %6 = tpu.matmul %4, %5, %cst {dimension_numbers = #tpu.dot_dimension_numbers<[1], [0], [0], [1], [0, 0, 1, 1], [], []>} : vector<24x128xbf16>, vector<128x128xbf16>, vector<24x128xf32> -> vector<24x128xf32>
    %7 = arith.addf %3, %6 : vector<24x128xf32>
    %c0_6 = arith.constant 0 : index
    %c0_7 = arith.constant 0 : index
    %8 = vector.load %arg7[%c0_6, %c0_7] : memref<24x128xf32, #tpu.memory_space<vmem>>, vector<24x128xf32>
    tpu.vector_store %arg7[%c0_6, %c0_7], %7 {strides = array<i32>} : memref<24x128xf32, #tpu.memory_space<vmem>>, vector<24x128xf32>,
    %c0_i32_8 = arith.constant 0 : i32
    %9 = arith.cmpi eq, %arg2, %c0_i32_8 : i32
    %10 = arith.extui %9 : i1 to i32
    %c0_i32_9 = arith.constant 0 : i32
    %11 = arith.cmpi ne, %10, %c0_i32_9 : i32
    scf.if %11 {
      %c0_10 = arith.constant 0 : index
      %c0_11 = arith.constant 0 : index
      %12 = vector.load %arg7[%c0_10, %c0_11] : memref<24x128xf32, #tpu.memory_space<vmem>>, vector<24x128xf32>
      %c0_12 = arith.constant 0 : index
      %c0_13 = arith.constant 0 : index
      %13 = vector.load %arg5[%c0_12, %c0_13] : memref<1x128xf32, #tpu.memory_space<vmem>>, vector<1x128xf32>
      %14 = vector.broadcast %13 : vector<1x128xf32> to vector<24x128xf32>
      %15 = arith.addf %12, %14 : vector<24x128xf32>
      %c0_14 = arith.constant 0 : index
      %c0_15 = arith.constant 0 : index
      %16 = vector.load %arg6[%c0_14, %c0_15] : memref<24x128xf32, #tpu.memory_space<vmem>>, vector<24x128xf32>
      tpu.vector_store %arg6[%c0_14, %c0_15], %15 {strides = array<i32>} : memref<24x128xf32, #tpu.memory_space<vmem>>, vector<24x128xf32>,
    } else {
    }
    return
  }
  func.func @transform_0(%arg0: i32, %arg1: i32, %arg2: i32) -> (i32, i32) {
    %c0_i32 = arith.constant 0 : i32
    return %arg0, %arg2 : i32, i32
  }
  func.func @transform_1(%arg0: i32, %arg1: i32, %arg2: i32) -> (i32, i32) {
    %c0_i32 = arith.constant 0 : i32
    return %arg2, %arg1 : i32, i32
  }
  func.func @transform_2(%arg0: i32, %arg1: i32, %arg2: i32) -> (i32, i32) {
    %c0_i32 = arith.constant 0 : i32
    %c0_i32_0 = arith.constant 0 : i32
    return %c0_i32, %arg1 : i32, i32
  }
  func.func @transform_3(%arg0: i32, %arg1: i32, %arg2: i32) -> (i32, i32) {
    %c0_i32 = arith.constant 0 : i32
    return %arg0, %arg1 : i32, i32
  }
}

module attributes {stable_mosaic.version = 11 : i64} {
  func.func @_flash_attn_kernel(%arg0: i32, %arg1: i32, %arg2: memref<1x16x8xbf16, #tpu.memory_space<vmem>>, %arg3: memref<1x16x8xbf16, #tpu.memory_space<vmem>>, %arg4: memref<1x16x8xbf16, #tpu.memory_space<vmem>>, %arg5: memref<1x1x16xf32, #tpu.memory_space<vmem>>, %arg6: memref<1x16x8xf32, #tpu.memory_space<vmem>>, %arg7: memref<1x16x1xf32, #tpu.memory_space<vmem>>, %arg8: memref<1x16x1xf32, #tpu.memory_space<vmem>>, %arg9: memref<1x16x8xf32, #tpu.memory_space<vmem>>) attributes {dimension_semantics = [#tpu.dimension_semantics<parallel>, #tpu.dimension_semantics<arbitrary>], iteration_bounds = array<i64: 8, 1>, scalar_prefetch = 0 : i64, scratch_operands = 3 : i64, tpu.core_type = #tpu.core_type<tc>, window_params = [{transform_indices = @transform_0, window_bounds = array<i64: 1, 16, 8>}, {transform_indices = @transform_1, window_bounds = array<i64: 1, 16, 8>}, {transform_indices = @transform_2, window_bounds = array<i64: 1, 16, 8>}, {transform_indices = @transform_3, window_bounds = array<i64: 1, 1, 16>}, {transform_indices = @transform_4, window_bounds = array<i64: 1, 16, 8>}]} {
    %c0_i32 = arith.constant 0 : i32
    %0 = arith.cmpi eq, %arg1, %c0_i32 : i32
    %1 = arith.extui %0 : i1 to i32
    %c0_i32_0 = arith.constant 0 : i32
    %2 = arith.cmpi ne, %1, %c0_i32_0 : i32
    scf.if %2 {
      %cst_39 = arith.constant -1.000000e+30 : f32
      %39 = vector.broadcast %cst_39 : f32 to vector<1x16x1xf32>
      %c0_40 = arith.constant 0 : index
      %c0_41 = arith.constant 0 : index
      %c0_42 = arith.constant 0 : index
      %40 = vector.load %arg7[%c0_40, %c0_41, %c0_42] : memref<1x16x1xf32, #tpu.memory_space<vmem>>, vector<1x16x1xf32>
      tpu.vector_store %arg7[%c0_40, %c0_41, %c0_42], %39 {strides = array<i32>} : memref<1x16x1xf32, #tpu.memory_space<vmem>>, vector<1x16x1xf32>,
      %cst_43 = arith.constant 0.000000e+00 : f32
      %41 = vector.broadcast %cst_43 : f32 to vector<1x16x1xf32>
      %c0_44 = arith.constant 0 : index
      %c0_45 = arith.constant 0 : index
      %c0_46 = arith.constant 0 : index
      %42 = vector.load %arg8[%c0_44, %c0_45, %c0_46] : memref<1x16x1xf32, #tpu.memory_space<vmem>>, vector<1x16x1xf32>
      tpu.vector_store %arg8[%c0_44, %c0_45, %c0_46], %41 {strides = array<i32>} : memref<1x16x1xf32, #tpu.memory_space<vmem>>, vector<1x16x1xf32>,
      %cst_47 = arith.constant 0.000000e+00 : f32
      %43 = vector.broadcast %cst_47 : f32 to vector<1x16x8xf32>
      %c0_48 = arith.constant 0 : index
      %c0_49 = arith.constant 0 : index
      %c0_50 = arith.constant 0 : index
      %44 = vector.load %arg9[%c0_48, %c0_49, %c0_50] : memref<1x16x8xf32, #tpu.memory_space<vmem>>, vector<1x16x8xf32>
      tpu.vector_store %arg9[%c0_48, %c0_49, %c0_50], %43 {strides = array<i32>} : memref<1x16x8xf32, #tpu.memory_space<vmem>>, vector<1x16x8xf32>,
    } else {
    }
    %c0 = arith.constant 0 : index
    %c0_1 = arith.constant 0 : index
    %c0_2 = arith.constant 0 : index
    %3 = vector.load %arg2[%c0, %c0_1, %c0_2] : memref<1x16x8xbf16, #tpu.memory_space<vmem>>, vector<1x16x8xbf16>
    %c0_3 = arith.constant 0 : index
    %c0_4 = arith.constant 0 : index
    %c0_5 = arith.constant 0 : index
    %4 = vector.load %arg3[%c0_3, %c0_4, %c0_5] : memref<1x16x8xbf16, #tpu.memory_space<vmem>>, vector<1x16x8xbf16>
    "tpu.trace_start"() <{level = 10 : i32, message = "bqd,bkd->bqk"}> : () -> ()
    %cst = arith.constant dense<0.000000e+00> : vector<1x16x16xf32>
    %5 = tpu.matmul %3, %4, %cst {dimension_numbers = #tpu.dot_dimension_numbers<[2], [2], [1], [1], [0, 0, 0, 1, 1, 1], [0], [0]>} : vector<1x16x8xbf16>, vector<1x16x8xbf16>, vector<1x16x16xf32> -> vector<1x16x16xf32>
    "tpu.trace_stop"() : () -> ()
    %cst_6 = arith.constant 0.353553385 : f32
    %6 = vector.broadcast %cst_6 : f32 to vector<1x16x16xf32>
    %7 = arith.mulf %5, %6 : vector<1x16x16xf32>
    %c0_7 = arith.constant 0 : index
    %c0_8 = arith.constant 0 : index
    %c0_9 = arith.constant 0 : index
    %8 = vector.load %arg5[%c0_7, %c0_8, %c0_9] : memref<1x1x16xf32, #tpu.memory_space<vmem>>, vector<1x1x16xf32>
    %9 = vector.broadcast %8 : vector<1x1x16xf32> to vector<1x16x16xf32>
    %10 = arith.addf %7, %9 : vector<1x16x16xf32>
    %c0_10 = arith.constant 0 : index
    %c0_11 = arith.constant 0 : index
    %c0_12 = arith.constant 0 : index
    %11 = vector.load %arg7[%c0_10, %c0_11, %c0_12] : memref<1x16x1xf32, #tpu.memory_space<vmem>>, vector<1x16x1xf32>
    %cst_13 = arith.constant dense<0xFF800000> : vector<1x16xf32>
    %12 = vector.multi_reduction <maximumf>, %10, %cst_13 [2] : vector<1x16x16xf32> to vector<1x16xf32>
    %13 = vector.shape_cast %12 : vector<1x16xf32> to vector<1x16x1xf32>
    %14 = arith.maximumf %11, %13 : vector<1x16x1xf32>
    %c0_14 = arith.constant 0 : index
    %c0_15 = arith.constant 0 : index
    %c0_16 = arith.constant 0 : index
    %15 = vector.load %arg7[%c0_14, %c0_15, %c0_16] : memref<1x16x1xf32, #tpu.memory_space<vmem>>, vector<1x16x1xf32>
    %16 = arith.subf %15, %14 : vector<1x16x1xf32>
    %17 = math.exp %16 : vector<1x16x1xf32>
    %18 = vector.broadcast %14 : vector<1x16x1xf32> to vector<1x16x16xf32>
    %19 = arith.subf %10, %18 : vector<1x16x16xf32>
    %20 = math.exp %19 : vector<1x16x16xf32>
    %c0_17 = arith.constant 0 : index
    %c0_18 = arith.constant 0 : index
    %c0_19 = arith.constant 0 : index
    %21 = vector.load %arg8[%c0_17, %c0_18, %c0_19] : memref<1x16x1xf32, #tpu.memory_space<vmem>>, vector<1x16x1xf32>
    %22 = arith.mulf %17, %21 : vector<1x16x1xf32>
    %cst_20 = arith.constant dense<0.000000e+00> : vector<1x16xf32>
    %23 = vector.multi_reduction <add>, %20, %cst_20 [2] : vector<1x16x16xf32> to vector<1x16xf32>
    %24 = vector.shape_cast %23 : vector<1x16xf32> to vector<1x16x1xf32>
    %25 = arith.addf %22, %24 : vector<1x16x1xf32>
    %c0_21 = arith.constant 0 : index
    %c0_22 = arith.constant 0 : index
    %c0_23 = arith.constant 0 : index
    %26 = vector.load %arg8[%c0_21, %c0_22, %c0_23] : memref<1x16x1xf32, #tpu.memory_space<vmem>>, vector<1x16x1xf32>
    tpu.vector_store %arg8[%c0_21, %c0_22, %c0_23], %25 {strides = array<i32>} : memref<1x16x1xf32, #tpu.memory_space<vmem>>, vector<1x16x1xf32>,
    %c0_24 = arith.constant 0 : index
    %c0_25 = arith.constant 0 : index
    %c0_26 = arith.constant 0 : index
    %27 = vector.load %arg9[%c0_24, %c0_25, %c0_26] : memref<1x16x8xf32, #tpu.memory_space<vmem>>, vector<1x16x8xf32>
    %28 = vector.broadcast %17 : vector<1x16x1xf32> to vector<1x16x8xf32>
    %29 = arith.mulf %28, %27 : vector<1x16x8xf32>
    %30 = arith.truncf %20 : vector<1x16x16xf32> to vector<1x16x16xbf16>
    %c0_27 = arith.constant 0 : index
    %c0_28 = arith.constant 0 : index
    %c0_29 = arith.constant 0 : index
    %31 = vector.load %arg4[%c0_27, %c0_28, %c0_29] : memref<1x16x8xbf16, #tpu.memory_space<vmem>>, vector<1x16x8xbf16>
    "tpu.trace_start"() <{level = 10 : i32, message = "bqk,bkd->bqd"}> : () -> ()
    %cst_30 = arith.constant dense<0.000000e+00> : vector<1x16x8xf32>
    %32 = tpu.matmul %30, %31, %cst_30 {dimension_numbers = #tpu.dot_dimension_numbers<[2], [1], [1], [2], [0, 0, 0, 1, 1, 2], [0], [0]>} : vector<1x16x16xbf16>, vector<1x16x8xbf16>, vector<1x16x8xf32> -> vector<1x16x8xf32>
    "tpu.trace_stop"() : () -> ()
    %33 = arith.addf %29, %32 : vector<1x16x8xf32>
    %c0_31 = arith.constant 0 : index
    %c0_32 = arith.constant 0 : index
    %c0_33 = arith.constant 0 : index
    %34 = vector.load %arg9[%c0_31, %c0_32, %c0_33] : memref<1x16x8xf32, #tpu.memory_space<vmem>>, vector<1x16x8xf32>
    tpu.vector_store %arg9[%c0_31, %c0_32, %c0_33], %33 {strides = array<i32>} : memref<1x16x8xf32, #tpu.memory_space<vmem>>, vector<1x16x8xf32>,
    %c0_34 = arith.constant 0 : index
    %c0_35 = arith.constant 0 : index
    %c0_36 = arith.constant 0 : index
    %35 = vector.load %arg7[%c0_34, %c0_35, %c0_36] : memref<1x16x1xf32, #tpu.memory_space<vmem>>, vector<1x16x1xf32>
    tpu.vector_store %arg7[%c0_34, %c0_35, %c0_36], %14 {strides = array<i32>} : memref<1x16x1xf32, #tpu.memory_space<vmem>>, vector<1x16x1xf32>,
    %c0_i32_37 = arith.constant 0 : i32
    %36 = arith.cmpi eq, %arg1, %c0_i32_37 : i32
    %37 = arith.extui %36 : i1 to i32
    %c0_i32_38 = arith.constant 0 : i32
    %38 = arith.cmpi ne, %37, %c0_i32_38 : i32
    scf.if %38 {
      %c0_39 = arith.constant 0 : index
      %c0_40 = arith.constant 0 : index
      %c0_41 = arith.constant 0 : index
      %39 = vector.load %arg9[%c0_39, %c0_40, %c0_41] : memref<1x16x8xf32, #tpu.memory_space<vmem>>, vector<1x16x8xf32>
      %c0_42 = arith.constant 0 : index
      %c0_43 = arith.constant 0 : index
      %c0_44 = arith.constant 0 : index
      %40 = vector.load %arg8[%c0_42, %c0_43, %c0_44] : memref<1x16x1xf32, #tpu.memory_space<vmem>>, vector<1x16x1xf32>
      %41 = tpu.reciprocal %40 {approx = true} : vector<1x16x1xf32> -> vector<1x16x1xf32>
      %42 = vector.broadcast %41 : vector<1x16x1xf32> to vector<1x16x8xf32>
      %43 = arith.mulf %39, %42 : vector<1x16x8xf32>
      %c0_45 = arith.constant 0 : index
      %c0_46 = arith.constant 0 : index
      %c0_47 = arith.constant 0 : index
      %44 = vector.load %arg6[%c0_45, %c0_46, %c0_47] : memref<1x16x8xf32, #tpu.memory_space<vmem>>, vector<1x16x8xf32>
      tpu.vector_store %arg6[%c0_45, %c0_46, %c0_47], %43 {strides = array<i32>} : memref<1x16x8xf32, #tpu.memory_space<vmem>>, vector<1x16x8xf32>,
    } else {
    }
    return
  }
  func.func @transform_0(%arg0: i32, %arg1: i32) -> (i32, i32, i32) {
    %c0_i32 = arith.constant 0 : i32
    %c0_i32_0 = arith.constant 0 : i32
    %c0_i32_1 = arith.constant 0 : i32
    return %arg0, %c0_i32, %c0_i32_0 : i32, i32, i32
  }
  func.func @transform_1(%arg0: i32, %arg1: i32) -> (i32, i32, i32) {
    %c0_i32 = arith.constant 0 : i32
    %c0_i32_0 = arith.constant 0 : i32
    return %arg0, %arg1, %c0_i32 : i32, i32, i32
  }
  func.func @transform_2(%arg0: i32, %arg1: i32) -> (i32, i32, i32) {
    %c0_i32 = arith.constant 0 : i32
    %c0_i32_0 = arith.constant 0 : i32
    return %arg0, %arg1, %c0_i32 : i32, i32, i32
  }
  func.func @transform_3(%arg0: i32, %arg1: i32) -> (i32, i32, i32) {
    %c0_i32 = arith.constant 0 : i32
    %c0_i32_0 = arith.constant 0 : i32
    return %arg0, %c0_i32, %arg1 : i32, i32, i32
  }
  func.func @transform_4(%arg0: i32, %arg1: i32) -> (i32, i32, i32) {
    %c0_i32 = arith.constant 0 : i32
    %c0_i32_0 = arith.constant 0 : i32
    %c0_i32_1 = arith.constant 0 : i32
    return %arg0, %c0_i32, %c0_i32_0 : i32, i32, i32
  }
}

module attributes {stable_mosaic.version = 11 : i64} {
  func.func @_fused_matmul_kernel(%arg0: i32, %arg1: i32, %arg2: i32, %arg3: memref<24x128xbf16, #tpu.memory_space<vmem>>, %arg4: memref<128x128xbf16, #tpu.memory_space<vmem>>, %arg5: memref<1x128xf32, #tpu.memory_space<vmem>>, %arg6: memref<24x128xf32, #tpu.memory_space<vmem>>, %arg7: memref<1x128xf32, #tpu.memory_space<vmem>>, %arg8: memref<1x128xf32, #tpu.memory_space<vmem>>, %arg9: memref<24x128xf32, #tpu.memory_space<vmem>>, %arg10: memref<24x128xf32, #tpu.memory_space<vmem>>) attributes {dimension_semantics = [#tpu.dimension_semantics<parallel>, #tpu.dimension_semantics<parallel>, #tpu.dimension_semantics<arbitrary>], iteration_bounds = array<i64: 1, 1, 1>, scalar_prefetch = 0 : i64, scratch_operands = 1 : i64, tpu.core_type = #tpu.core_type<tc>, window_params = [{transform_indices = @transform_0, window_bounds = array<i64: 24, 128>}, {transform_indices = @transform_1, window_bounds = array<i64: 128, 128>}, {transform_indices = @transform_2, window_bounds = array<i64: 1, 128>}, {transform_indices = @transform_3, window_bounds = array<i64: 24, 128>}, {transform_indices = @transform_4, window_bounds = array<i64: 1, 128>}, {transform_indices = @transform_5, window_bounds = array<i64: 1, 128>}, {transform_indices = @transform_6, window_bounds = array<i64: 24, 128>}]} {
    %c0_i32 = arith.constant 0 : i32
    %0 = arith.cmpi eq, %arg2, %c0_i32 : i32
    %1 = arith.extui %0 : i1 to i32
    %c0_i32_0 = arith.constant 0 : i32
    %2 = arith.cmpi ne, %1, %c0_i32_0 : i32
    scf.if %2 {
      %cst_10 = arith.constant 0.000000e+00 : f32
      %12 = vector.broadcast %cst_10 : f32 to vector<24x128xf32>
      %c0_11 = arith.constant 0 : index
      %c0_12 = arith.constant 0 : index
      %13 = vector.load %arg10[%c0_11, %c0_12] : memref<24x128xf32, #tpu.memory_space<vmem>>, vector<24x128xf32>
      tpu.vector_store %arg10[%c0_11, %c0_12], %12 {strides = array<i32>} : memref<24x128xf32, #tpu.memory_space<vmem>>, vector<24x128xf32>,
    } else {
    }
    %c0 = arith.constant 0 : index
    %c0_1 = arith.constant 0 : index
    %3 = vector.load %arg10[%c0, %c0_1] : memref<24x128xf32, #tpu.memory_space<vmem>>, vector<24x128xf32>
    %c0_2 = arith.constant 0 : index
    %c0_3 = arith.constant 0 : index
    %4 = vector.load %arg3[%c0_2, %c0_3] : memref<24x128xbf16, #tpu.memory_space<vmem>>, vector<24x128xbf16>
    %c0_4 = arith.constant 0 : index
    %c0_5 = arith.constant 0 : index
    %5 = vector.load %arg4[%c0_4, %c0_5] : memref<128x128xbf16, #tpu.memory_space<vmem>>, vector<128x128xbf16>
    %cst = arith.constant dense<0.000000e+00> : vector<24x128xf32>
    %6 = tpu.matmul %4, %5, %cst {dimension_numbers = #tpu.dot_dimension_numbers<[1], [0], [0], [1], [0, 0, 1, 1], [], []>} : vector<24x128xbf16>, vector<128x128xbf16>, vector<24x128xf32> -> vector<24x128xf32>
    %7 = arith.addf %3, %6 : vector<24x128xf32>
    %c0_6 = arith.constant 0 : index
    %c0_7 = arith.constant 0 : index
    %8 = vector.load %arg10[%c0_6, %c0_7] : memref<24x128xf32, #tpu.memory_space<vmem>>, vector<24x128xf32>
    tpu.vector_store %arg10[%c0_6, %c0_7], %7 {strides = array<i32>} : memref<24x128xf32, #tpu.memory_space<vmem>>, vector<24x128xf32>,
    %c0_i32_8 = arith.constant 0 : i32
    %9 = arith.cmpi eq, %arg2, %c0_i32_8 : i32
    %10 = arith.extui %9 : i1 to i32
    %c0_i32_9 = arith.constant 0 : i32
    %11 = arith.cmpi ne, %10, %c0_i32_9 : i32
    scf.if %11 {
      %c0_10 = arith.constant 0 : index
      %c0_11 = arith.constant 0 : index
      %12 = vector.load %arg10[%c0_10, %c0_11] : memref<24x128xf32, #tpu.memory_space<vmem>>, vector<24x128xf32>
      %c0_12 = arith.constant 0 : index
      %c0_13 = arith.constant 0 : index
      %13 = vector.load %arg5[%c0_12, %c0_13] : memref<1x128xf32, #tpu.memory_space<vmem>>, vector<1x128xf32>
      %14 = vector.broadcast %13 : vector<1x128xf32> to vector<24x128xf32>
      %15 = arith.addf %12, %14 : vector<24x128xf32>
      %c0_14 = arith.constant 0 : index
      %c0_15 = arith.constant 0 : index
      %16 = vector.load %arg6[%c0_14, %c0_15] : memref<24x128xf32, #tpu.memory_space<vmem>>, vector<24x128xf32>
      %17 = arith.addf %15, %16 : vector<24x128xf32>
      %18 = tpu.iota {dimensions = array<i32: 1>} : vector<24x128xi32>
      %c32_i32 = arith.constant 32 : i32
      %19 = vector.broadcast %c32_i32 : i32 to vector<24x128xi32>
      %20 = arith.cmpi slt, %18, %19 : vector<24x128xi32>
      %cst_16 = arith.constant 0.000000e+00 : f32
      %21 = vector.broadcast %cst_16 : f32 to vector<24x128xf32>
      %22 = arith.select %20, %17, %21 : vector<24x128xi1>, vector<24x128xf32>
      %cst_17 = arith.constant dense<0.000000e+00> : vector<24xf32>
      %23 = vector.multi_reduction <add>, %22, %cst_17 [1] : vector<24x128xf32> to vector<24xf32>
      %24 = vector.shape_cast %23 : vector<24xf32> to vector<24x1xf32>
      %cst_18 = arith.constant 3.125000e-02 : f32
      %25 = vector.broadcast %cst_18 : f32 to vector<24x1xf32>
      %26 = arith.mulf %24, %25 : vector<24x1xf32>
      %27 = vector.broadcast %26 : vector<24x1xf32> to vector<24x128xf32>
      %28 = arith.subf %17, %27 : vector<24x128xf32>
      %cst_19 = arith.constant 0.000000e+00 : f32
      %29 = vector.broadcast %cst_19 : f32 to vector<24x128xf32>
      %30 = arith.select %20, %28, %29 : vector<24x128xi1>, vector<24x128xf32>
      %31 = arith.mulf %30, %30 : vector<24x128xf32>
      %cst_20 = arith.constant dense<0.000000e+00> : vector<24xf32>
      %32 = vector.multi_reduction <add>, %31, %cst_20 [1] : vector<24x128xf32> to vector<24xf32>
      %33 = vector.shape_cast %32 : vector<24xf32> to vector<24x1xf32>
      %cst_21 = arith.constant 3.125000e-02 : f32
      %34 = vector.broadcast %cst_21 : f32 to vector<24x1xf32>
      %35 = arith.mulf %33, %34 : vector<24x1xf32>
      %cst_22 = arith.constant 9.99999996E-13 : f32
      %36 = vector.broadcast %cst_22 : f32 to vector<24x1xf32>
      %37 = arith.addf %35, %36 : vector<24x1xf32>
      %38 = math.rsqrt %37 : vector<24x1xf32>
      %39 = vector.broadcast %38 : vector<24x1xf32> to vector<24x128xf32>
      %40 = arith.mulf %30, %39 : vector<24x128xf32>
      %c0_23 = arith.constant 0 : index
      %c0_24 = arith.constant 0 : index
      %41 = vector.load %arg7[%c0_23, %c0_24] : memref<1x128xf32, #tpu.memory_space<vmem>>, vector<1x128xf32>
      %42 = vector.broadcast %41 : vector<1x128xf32> to vector<24x128xf32>
      %43 = arith.mulf %40, %42 : vector<24x128xf32>
      %c0_25 = arith.constant 0 : index
      %c0_26 = arith.constant 0 : index
      %44 = vector.load %arg8[%c0_25, %c0_26] : memref<1x128xf32, #tpu.memory_space<vmem>>, vector<1x128xf32>
      %45 = vector.broadcast %44 : vector<1x128xf32> to vector<24x128xf32>
      %46 = arith.addf %43, %45 : vector<24x128xf32>
      %c0_27 = arith.constant 0 : index
      %c0_28 = arith.constant 0 : index
      %47 = vector.load %arg9[%c0_27, %c0_28] : memref<24x128xf32, #tpu.memory_space<vmem>>, vector<24x128xf32>
      tpu.vector_store %arg9[%c0_27, %c0_28], %46 {strides = array<i32>} : memref<24x128xf32, #tpu.memory_space<vmem>>, vector<24x128xf32>,
    } else {
    }
    return
  }
  func.func @transform_0(%arg0: i32, %arg1: i32, %arg2: i32) -> (i32, i32) {
    %c0_i32 = arith.constant 0 : i32
    return %arg0, %arg2 : i32, i32
  }
  func.func @transform_1(%arg0: i32, %arg1: i32, %arg2: i32) -> (i32, i32) {
    %c0_i32 = arith.constant 0 : i32
    return %arg2, %arg1 : i32, i32
  }
  func.func @transform_2(%arg0: i32, %arg1: i32, %arg2: i32) -> (i32, i32) {
    %c0_i32 = arith.constant 0 : i32
    %c0_i32_0 = arith.constant 0 : i32
    return %c0_i32, %arg1 : i32, i32
  }
  func.func @transform_3(%arg0: i32, %arg1: i32, %arg2: i32) -> (i32, i32) {
    %c0_i32 = arith.constant 0 : i32
    return %arg0, %arg1 : i32, i32
  }
  func.func @transform_4(%arg0: i32, %arg1: i32, %arg2: i32) -> (i32, i32) {
    %c0_i32 = arith.constant 0 : i32
    %c0_i32_0 = arith.constant 0 : i32
    return %c0_i32, %arg1 : i32, i32
  }
  func.func @transform_5(%arg0: i32, %arg1: i32, %arg2: i32) -> (i32, i32) {
    %c0_i32 = arith.constant 0 : i32
    %c0_i32_0 = arith.constant 0 : i32
    return %c0_i32, %arg1 : i32, i32
  }
  func.func @transform_6(%arg0: i32, %arg1: i32, %arg2: i32) -> (i32, i32) {
    %c0_i32 = arith.constant 0 : i32
    return %arg0, %arg1 : i32, i32
  }
}

module attributes {stable_mosaic.version = 11 : i64} {
  func.func @_fused_matmul_kernel(%arg0: i32, %arg1: i32, %arg2: i32, %arg3: memref<24x128xbf16, #tpu.memory_space<vmem>>, %arg4: memref<128x128xbf16, #tpu.memory_space<vmem>>, %arg5: memref<1x128xf32, #tpu.memory_space<vmem>>, %arg6: memref<24x128xf32, #tpu.memory_space<vmem>>, %arg7: memref<24x128xf32, #tpu.memory_space<vmem>>) attributes {dimension_semantics = [#tpu.dimension_semantics<parallel>, #tpu.dimension_semantics<parallel>, #tpu.dimension_semantics<arbitrary>], iteration_bounds = array<i64: 1, 1, 1>, scalar_prefetch = 0 : i64, scratch_operands = 1 : i64, tpu.core_type = #tpu.core_type<tc>, window_params = [{transform_indices = @transform_0, window_bounds = array<i64: 24, 128>}, {transform_indices = @transform_1, window_bounds = array<i64: 128, 128>}, {transform_indices = @transform_2, window_bounds = array<i64: 1, 128>}, {transform_indices = @transform_3, window_bounds = array<i64: 24, 128>}]} {
    %c0_i32 = arith.constant 0 : i32
    %0 = arith.cmpi eq, %arg2, %c0_i32 : i32
    %1 = arith.extui %0 : i1 to i32
    %c0_i32_0 = arith.constant 0 : i32
    %2 = arith.cmpi ne, %1, %c0_i32_0 : i32
    scf.if %2 {
      %cst_10 = arith.constant 0.000000e+00 : f32
      %12 = vector.broadcast %cst_10 : f32 to vector<24x128xf32>
      %c0_11 = arith.constant 0 : index
      %c0_12 = arith.constant 0 : index
      %13 = vector.load %arg7[%c0_11, %c0_12] : memref<24x128xf32, #tpu.memory_space<vmem>>, vector<24x128xf32>
      tpu.vector_store %arg7[%c0_11, %c0_12], %12 {strides = array<i32>} : memref<24x128xf32, #tpu.memory_space<vmem>>, vector<24x128xf32>,
    } else {
    }
    %c0 = arith.constant 0 : index
    %c0_1 = arith.constant 0 : index
    %3 = vector.load %arg7[%c0, %c0_1] : memref<24x128xf32, #tpu.memory_space<vmem>>, vector<24x128xf32>
    %c0_2 = arith.constant 0 : index
    %c0_3 = arith.constant 0 : index
    %4 = vector.load %arg3[%c0_2, %c0_3] : memref<24x128xbf16, #tpu.memory_space<vmem>>, vector<24x128xbf16>
    %c0_4 = arith.constant 0 : index
    %c0_5 = arith.constant 0 : index
    %5 = vector.load %arg4[%c0_4, %c0_5] : memref<128x128xbf16, #tpu.memory_space<vmem>>, vector<128x128xbf16>
    %cst = arith.constant dense<0.000000e+00> : vector<24x128xf32>
    %6 = tpu.matmul %4, %5, %cst {dimension_numbers = #tpu.dot_dimension_numbers<[1], [0], [0], [1], [0, 0, 1, 1], [], []>} : vector<24x128xbf16>, vector<128x128xbf16>, vector<24x128xf32> -> vector<24x128xf32>
    %7 = arith.addf %3, %6 : vector<24x128xf32>
    %c0_6 = arith.constant 0 : index
    %c0_7 = arith.constant 0 : index
    %8 = vector.load %arg7[%c0_6, %c0_7] : memref<24x128xf32, #tpu.memory_space<vmem>>, vector<24x128xf32>
    tpu.vector_store %arg7[%c0_6, %c0_7], %7 {strides = array<i32>} : memref<24x128xf32, #tpu.memory_space<vmem>>, vector<24x128xf32>,
    %c0_i32_8 = arith.constant 0 : i32
    %9 = arith.cmpi eq, %arg2, %c0_i32_8 : i32
    %10 = arith.extui %9 : i1 to i32
    %c0_i32_9 = arith.constant 0 : i32
    %11 = arith.cmpi ne, %10, %c0_i32_9 : i32
    scf.if %11 {
      %c0_10 = arith.constant 0 : index
      %c0_11 = arith.constant 0 : index
      %12 = vector.load %arg7[%c0_10, %c0_11] : memref<24x128xf32, #tpu.memory_space<vmem>>, vector<24x128xf32>
      %c0_12 = arith.constant 0 : index
      %c0_13 = arith.constant 0 : index
      %13 = vector.load %arg5[%c0_12, %c0_13] : memref<1x128xf32, #tpu.memory_space<vmem>>, vector<1x128xf32>
      %14 = vector.broadcast %13 : vector<1x128xf32> to vector<24x128xf32>
      %15 = arith.addf %12, %14 : vector<24x128xf32>
      %cst_14 = arith.constant 5.000000e-01 : f32
      %16 = vector.broadcast %cst_14 : f32 to vector<24x128xf32>
      %17 = arith.mulf %16, %15 : vector<24x128xf32>
      %18 = arith.mulf %15, %15 : vector<24x128xf32>
      %19 = arith.mulf %18, %15 : vector<24x128xf32>
      %cst_15 = arith.constant 4.471500e-02 : f32
      %20 = vector.broadcast %cst_15 : f32 to vector<24x128xf32>
      %21 = arith.mulf %20, %19 : vector<24x128xf32>
      %22 = arith.addf %15, %21 : vector<24x128xf32>
      %cst_16 = arith.constant 0.797884583 : f32
      %23 = vector.broadcast %cst_16 : f32 to vector<24x128xf32>
      %24 = arith.mulf %23, %22 : vector<24x128xf32>
      %25 = math.tanh %24 : vector<24x128xf32>
      %cst_17 = arith.constant 1.000000e+00 : f32
      %26 = vector.broadcast %cst_17 : f32 to vector<24x128xf32>
      %27 = arith.addf %26, %25 : vector<24x128xf32>
      %28 = arith.mulf %17, %27 : vector<24x128xf32>
      %c0_18 = arith.constant 0 : index
      %c0_19 = arith.constant 0 : index
      %29 = vector.load %arg6[%c0_18, %c0_19] : memref<24x128xf32, #tpu.memory_space<vmem>>, vector<24x128xf32>
      tpu.vector_store %arg6[%c0_18, %c0_19], %28 {strides = array<i32>} : memref<24x128xf32, #tpu.memory_space<vmem>>, vector<24x128xf32>,
    } else {
    }
    return
  }
  func.func @transform_0(%arg0: i32, %arg1: i32, %arg2: i32) -> (i32, i32) {
    %c0_i32 = arith.constant 0 : i32
    return %arg0, %arg2 : i32, i32
  }
  func.func @transform_1(%arg0: i32, %arg1: i32, %arg2: i32) -> (i32, i32) {
    %c0_i32 = arith.constant 0 : i32
    return %arg2, %arg1 : i32, i32
  }
  func.func @transform_2(%arg0: i32, %arg1: i32, %arg2: i32) -> (i32, i32) {
    %c0_i32 = arith.constant 0 : i32
    %c0_i32_0 = arith.constant 0 : i32
    return %c0_i32, %arg1 : i32, i32
  }
  func.func @transform_3(%arg0: i32, %arg1: i32, %arg2: i32) -> (i32, i32) {
    %c0_i32 = arith.constant 0 : i32
    return %arg0, %arg1 : i32, i32
  }
}

module attributes {stable_mosaic.version = 11 : i64} {
  func.func @_fused_matmul_kernel(%arg0: i32, %arg1: i32, %arg2: i32, %arg3: memref<8x128xbf16, #tpu.memory_space<vmem>>, %arg4: memref<128x128xbf16, #tpu.memory_space<vmem>>, %arg5: memref<1x128xf32, #tpu.memory_space<vmem>>, %arg6: memref<8x128xf32, #tpu.memory_space<vmem>>, %arg7: memref<8x128xf32, #tpu.memory_space<vmem>>) attributes {dimension_semantics = [#tpu.dimension_semantics<parallel>, #tpu.dimension_semantics<parallel>, #tpu.dimension_semantics<arbitrary>], iteration_bounds = array<i64: 1, 1, 1>, scalar_prefetch = 0 : i64, scratch_operands = 1 : i64, tpu.core_type = #tpu.core_type<tc>, window_params = [{transform_indices = @transform_0, window_bounds = array<i64: 8, 128>}, {transform_indices = @transform_1, window_bounds = array<i64: 128, 128>}, {transform_indices = @transform_2, window_bounds = array<i64: 1, 128>}, {transform_indices = @transform_3, window_bounds = array<i64: 8, 128>}]} {
    %c0_i32 = arith.constant 0 : i32
    %0 = arith.cmpi eq, %arg2, %c0_i32 : i32
    %1 = arith.extui %0 : i1 to i32
    %c0_i32_0 = arith.constant 0 : i32
    %2 = arith.cmpi ne, %1, %c0_i32_0 : i32
    scf.if %2 {
      %cst_10 = arith.constant 0.000000e+00 : f32
      %12 = vector.broadcast %cst_10 : f32 to vector<8x128xf32>
      %c0_11 = arith.constant 0 : index
      %c0_12 = arith.constant 0 : index
      %13 = vector.load %arg7[%c0_11, %c0_12] : memref<8x128xf32, #tpu.memory_space<vmem>>, vector<8x128xf32>
      tpu.vector_store %arg7[%c0_11, %c0_12], %12 {strides = array<i32>} : memref<8x128xf32, #tpu.memory_space<vmem>>, vector<8x128xf32>,
    } else {
    }
    %c0 = arith.constant 0 : index
    %c0_1 = arith.constant 0 : index
    %3 = vector.load %arg7[%c0, %c0_1] : memref<8x128xf32, #tpu.memory_space<vmem>>, vector<8x128xf32>
    %c0_2 = arith.constant 0 : index
    %c0_3 = arith.constant 0 : index
    %4 = vector.load %arg3[%c0_2, %c0_3] : memref<8x128xbf16, #tpu.memory_space<vmem>>, vector<8x128xbf16>
    %c0_4 = arith.constant 0 : index
    %c0_5 = arith.constant 0 : index
    %5 = vector.load %arg4[%c0_4, %c0_5] : memref<128x128xbf16, #tpu.memory_space<vmem>>, vector<128x128xbf16>
    %cst = arith.constant dense<0.000000e+00> : vector<8x128xf32>
    %6 = tpu.matmul %4, %5, %cst {dimension_numbers = #tpu.dot_dimension_numbers<[1], [0], [0], [1], [0, 0, 1, 1], [], []>} : vector<8x128xbf16>, vector<128x128xbf16>, vector<8x128xf32> -> vector<8x128xf32>
    %7 = arith.addf %3, %6 : vector<8x128xf32>
    %c0_6 = arith.constant 0 : index
    %c0_7 = arith.constant 0 : index
    %8 = vector.load %arg7[%c0_6, %c0_7] : memref<8x128xf32, #tpu.memory_space<vmem>>, vector<8x128xf32>
    tpu.vector_store %arg7[%c0_6, %c0_7], %7 {strides = array<i32>} : memref<8x128xf32, #tpu.memory_space<vmem>>, vector<8x128xf32>,
    %c0_i32_8 = arith.constant 0 : i32
    %9 = arith.cmpi eq, %arg2, %c0_i32_8 : i32
    %10 = arith.extui %9 : i1 to i32
    %c0_i32_9 = arith.constant 0 : i32
    %11 = arith.cmpi ne, %10, %c0_i32_9 : i32
    scf.if %11 {
      %c0_10 = arith.constant 0 : index
      %c0_11 = arith.constant 0 : index
      %12 = vector.load %arg7[%c0_10, %c0_11] : memref<8x128xf32, #tpu.memory_space<vmem>>, vector<8x128xf32>
      %c0_12 = arith.constant 0 : index
      %c0_13 = arith.constant 0 : index
      %13 = vector.load %arg5[%c0_12, %c0_13] : memref<1x128xf32, #tpu.memory_space<vmem>>, vector<1x128xf32>
      %14 = vector.broadcast %13 : vector<1x128xf32> to vector<8x128xf32>
      %15 = arith.addf %12, %14 : vector<8x128xf32>
      %c0_14 = arith.constant 0 : index
      %c0_15 = arith.constant 0 : index
      %16 = vector.load %arg6[%c0_14, %c0_15] : memref<8x128xf32, #tpu.memory_space<vmem>>, vector<8x128xf32>
      tpu.vector_store %arg6[%c0_14, %c0_15], %15 {strides = array<i32>} : memref<8x128xf32, #tpu.memory_space<vmem>>, vector<8x128xf32>,
    } else {
    }
    return
  }
  func.func @transform_0(%arg0: i32, %arg1: i32, %arg2: i32) -> (i32, i32) {
    %c0_i32 = arith.constant 0 : i32
    return %arg0, %arg2 : i32, i32
  }
  func.func @transform_1(%arg0: i32, %arg1: i32, %arg2: i32) -> (i32, i32) {
    %c0_i32 = arith.constant 0 : i32
    return %arg2, %arg1 : i32, i32
  }
  func.func @transform_2(%arg0: i32, %arg1: i32, %arg2: i32) -> (i32, i32) {
    %c0_i32 = arith.constant 0 : i32
    %c0_i32_0 = arith.constant 0 : i32
    return %c0_i32, %arg1 : i32, i32
  }
  func.func @transform_3(%arg0: i32, %arg1: i32, %arg2: i32) -> (i32, i32) {
    %c0_i32 = arith.constant 0 : i32
    return %arg0, %arg1 : i32, i32
  }
}

</mosaic_0001>

<bundles_post_ra>
// kernel: tombert_with_resnet_forward.29
= control target key start
LH: loop header
LB: loop body
LE: loop exit
PB: predicated region body
PF: predicated region fallthrough
CT: control target
= control target key end

     0   :  { %s558_s1 = inlined_call_operand.vmem [shape: bf16[128,128], index: 1, kind: input, shape index: {}]   ;;  %s559_s2 = inlined_call_operand.vmem [shape: f32[1,128], index: 2, kind: input, shape index: {}]   ;;  %s560_s0 = inlined_call_operand.vmem [shape: bf16[128,128], index: 0, kind: input, shape index: {}]   ;;  %s561_s3 = inlined_call_operand.vmem [shape: f32[128,128], index: 3, kind: output, shape index: {}]  }
   0x1   :  { %v413_v0 = vld [vmem:[%s558_s1 + $0x38] sm:$0xff]  ;;  %v412_v1 = vld [vmem:[%s558_s1 + $0x30] sm:$0xff]  ;;  %v411_v2 = vld [vmem:[%s558_s1 + $0x28] sm:$0xff] }
   0x2   :  { %178 = vmatpush.bf16.msra.mxu0 %v413_v0  ;;  %414 = vmatpush.bf16.msra.mxu1 %v413_v0  ;;  %v410_v3 = vld [vmem:[%s558_s1 + $0x20] sm:$0xff]  ;;  %v409_v4 = vld [vmem:[%s558_s1 + $0x18] sm:$0xff]  ;;  %v408_v5 = vld [vmem:[%s558_s1 + $0x10] sm:$0xff] }
   0x3   :  { %415 = vmatpush.bf16.msra.mxu2 %v413_v0  ;;  %416 = vmatpush.bf16.msra.mxu3 %v413_v0  ;;  %v407_v6 = vld [vmem:[%s558_s1 + $0x8] sm:$0xff]  ;;  %v406_v7 = vld [vmem:[%s558_s1] sm:$0xff]  ;;  %v400_v9 = vld [vmem:[%s560_s0 + $0x10] sm:$0xff] }
   0x4   :  { %v398_v8 = vld [vmem:[%s560_s0] sm:$0xff]  ;;  %v404_v11 = vld [vmem:[%s560_s0 + $0x30] sm:$0xff]  ;;  %v399_v12 = vld [vmem:[%s560_s0 + $0x8] sm:$0xff] }
   0x5   :  { %v402_v10 = vld [vmem:[%s560_s0 + $0x20] sm:$0xff]  ;;  %v401_v13 = vld [vmem:[%s560_s0 + $0x18] sm:$0xff]  ;;  %v403_v14 = vld [vmem:[%s560_s0 + $0x28] sm:$0xff] }
   0x6   :  { %179 = vmatpush.bf16.msra.mxu0 %v412_v1  ;;  %417 = vmatpush.bf16.msra.mxu1 %v412_v1  ;;  %v405_v15 = vld [vmem:[%s560_s0 + $0x38] sm:$0xff]  ;;  %v438_v16 = vld [vmem:[%s559_s2] ss:$0 sm:$0xff] }
   0x7   :  { %418 = vmatpush.bf16.msra.mxu2 %v412_v1  ;;  %419 = vmatpush.bf16.msra.mxu3 %v412_v1 }
   0xa   :  { %180 = vmatpush.bf16.msra.mxu0 %v411_v2  ;;  %420 = vmatpush.bf16.msra.mxu1 %v411_v2 }
   0xb   :  { %421 = vmatpush.bf16.msra.mxu2 %v411_v2  ;;  %422 = vmatpush.bf16.msra.mxu3 %v411_v2 }
   0xe   :  { %181 = vmatpush.bf16.msra.mxu0 %v410_v3  ;;  %423 = vmatpush.bf16.msra.mxu1 %v410_v3 }
   0xf   :  { %424 = vmatpush.bf16.msra.mxu2 %v410_v3  ;;  %425 = vmatpush.bf16.msra.mxu3 %v410_v3 }
  0x12   :  { %182 = vmatpush.bf16.msra.mxu0 %v409_v4  ;;  %426 = vmatpush.bf16.msra.mxu1 %v409_v4 }
  0x13   :  { %427 = vmatpush.bf16.msra.mxu2 %v409_v4  ;;  %428 = vmatpush.bf16.msra.mxu3 %v409_v4 }
  0x16   :  { %183 = vmatpush.bf16.msra.mxu0 %v408_v5  ;;  %429 = vmatpush.bf16.msra.mxu1 %v408_v5 }
  0x17   :  { %430 = vmatpush.bf16.msra.mxu2 %v408_v5  ;;  %431 = vmatpush.bf16.msra.mxu3 %v408_v5 }
  0x1a   :  { %184 = vmatpush.bf16.msra.mxu0 %v407_v6  ;;  %432 = vmatpush.bf16.msra.mxu1 %v407_v6 }
  0x1b   :  { %433 = vmatpush.bf16.msra.mxu2 %v407_v6  ;;  %434 = vmatpush.bf16.msra.mxu3 %v407_v6 }
  0x1e   :  { %185 = vmatpush.bf16.msra.mxu0 %v406_v7  ;;  %435 = vmatpush.bf16.msra.mxu1 %v406_v7 }
  0x1f   :  { %436 = vmatpush.bf16.msra.mxu2 %v406_v7  ;;  %437 = vmatpush.bf16.msra.mxu3 %v406_v7 }
  0x21   :  { %186 = vmatmul.bf16.vlgmr.msra.gmra.mxu0 %v398_v8  ;;  %196 = vmatmul.bf16.vlgmr.msra.gmra.mxu1 %v400_v9 }
  0x22   :  { %206 = vmatmul.bf16.vlgmr.msra.gmra.mxu2 %v402_v10  ;;  %216 = vmatmul.bf16.vlgmr.msra.gmra.mxu3 %v404_v11 }
  0x31   :  { %191 = vmatmul.bf16.gmra.mxu0 %v399_v12  ;;  %201 = vmatmul.bf16.gmra.mxu1 %v401_v13 }
  0x32   :  { %211 = vmatmul.bf16.gmra.mxu2 %v403_v14  ;;  %221 = vmatmul.bf16.gmra.mxu3 %v405_v15 }
  0x9e   :  { %v187_v17 = vpop.f32.mrf.mxu0  ;;  %v197_v18 = vpop.f32.mrf.mxu1 }
  0x9f   :  { %v282_v19 = vadd.f32 %v438_v16, %v187_v17  ;;  %v286_v20 = vadd.f32 %v438_v16, %v197_v18 }
  0xa1   :  { %v298_v21 = vmax.f32 %v282_v19, 0.0  ;;  %v302_v22 = vmax.f32 %v286_v20, 0.0 }
  0xa3   :  { %314 = vst [vmem:[%s561_s3] sm:$0xff] %v298_v21 }
  0xa4   :  { %318 = vst [vmem:[%s561_s3 + $0x20] sm:$0xff] %v302_v22 }
  0xa5   :  { %v207_v23 = vpop.f32.mrf.mxu2  ;;  %v217_v24 = vpop.f32.mrf.mxu3 }
  0xa6   :  { %v290_v25 = vadd.f32 %v438_v16, %v207_v23  ;;  %v294_v26 = vadd.f32 %v438_v16, %v217_v24  ;;  %v189_v27 = vpop.f32.mrf.mxu0  ;;  %v199_v28 = vpop.f32.mrf.mxu1 }
  0xa7   :  { %v283_v29 = vadd.f32 %v438_v16, %v189_v27  ;;  %v287_v30 = vadd.f32 %v438_v16, %v199_v28 }
  0xa8   :  { %v306_v31 = vmax.f32 %v290_v25, 0.0  ;;  %v310_v32 = vmax.f32 %v294_v26, 0.0 }
  0xa9   :  { %v299_v33 = vmax.f32 %v283_v29, 0.0  ;;  %v303_v34 = vmax.f32 %v287_v30, 0.0 }
  0xaa   :  { %322 = vst [vmem:[%s561_s3 + $0x40] sm:$0xff] %v306_v31 }
  0xab   :  { %326 = vst [vmem:[%s561_s3 + $0x60] sm:$0xff] %v310_v32 }
  0xac   :  { %315 = vst [vmem:[%s561_s3 + $0x8] sm:$0xff] %v299_v33 }
  0xad   :  { %319 = vst [vmem:[%s561_s3 + $0x28] sm:$0xff] %v303_v34  ;;  %v209_v35 = vpop.f32.mrf.mxu2  ;;  %v219_v36 = vpop.f32.mrf.mxu3 }
  0xae   :  { %v291_v37 = vadd.f32 %v438_v16, %v209_v35  ;;  %v295_v38 = vadd.f32 %v438_v16, %v219_v36  ;;  %v192_v39 = vpop.f32.mrf.mxu0  ;;  %v202_v40 = vpop.f32.mrf.mxu1 }
  0xaf   :  { %v284_v41 = vadd.f32 %v438_v16, %v192_v39  ;;  %v288_v42 = vadd.f32 %v438_v16, %v202_v40 }
  0xb0   :  { %v307_v43 = vmax.f32 %v291_v37, 0.0  ;;  %v311_v44 = vmax.f32 %v295_v38, 0.0 }
  0xb1   :  { %v300_v45 = vmax.f32 %v284_v41, 0.0  ;;  %v304_v46 = vmax.f32 %v288_v42, 0.0 }
  0xb2   :  { %323 = vst [vmem:[%s561_s3 + $0x48] sm:$0xff] %v307_v43 }
  0xb3   :  { %327 = vst [vmem:[%s561_s3 + $0x68] sm:$0xff] %v311_v44 }
  0xb4   :  { %316 = vst [vmem:[%s561_s3 + $0x10] sm:$0xff] %v300_v45 }
  0xb5   :  { %320 = vst [vmem:[%s561_s3 + $0x30] sm:$0xff] %v304_v46  ;;  %v212_v47 = vpop.f32.mrf.mxu2  ;;  %v222_v48 = vpop.f32.mrf.mxu3 }
  0xb6   :  { %v292_v49 = vadd.f32 %v438_v16, %v212_v47  ;;  %v296_v50 = vadd.f32 %v438_v16, %v222_v48  ;;  %v194_v51 = vpop.f32.mrf.mxu0  ;;  %v204_v52 = vpop.f32.mrf.mxu1 }
  0xb7   :  { %v285_v53 = vadd.f32 %v438_v16, %v194_v51  ;;  %v289_v54 = vadd.f32 %v438_v16, %v204_v52 }
  0xb8   :  { %v308_v55 = vmax.f32 %v292_v49, 0.0  ;;  %v312_v56 = vmax.f32 %v296_v50, 0.0 }
  0xb9   :  { %v301_v57 = vmax.f32 %v285_v53, 0.0  ;;  %v305_v58 = vmax.f32 %v289_v54, 0.0 }
  0xba   :  { %324 = vst [vmem:[%s561_s3 + $0x50] sm:$0xff] %v308_v55 }
  0xbb   :  { %328 = vst [vmem:[%s561_s3 + $0x70] sm:$0xff] %v312_v56 }
  0xbc   :  { %317 = vst [vmem:[%s561_s3 + $0x18] sm:$0xff] %v301_v57 }
  0xbd   :  { %321 = vst [vmem:[%s561_s3 + $0x38] sm:$0xff] %v305_v58  ;;  %v214_v59 = vpop.f32.mrf.mxu2  ;;  %v224_v60 = vpop.f32.mrf.mxu3 }
  0xbe   :  { %v293_v61 = vadd.f32 %v438_v16, %v214_v59  ;;  %v297_v62 = vadd.f32 %v438_v16, %v224_v60 }
  0xc0   :  { %v309_v63 = vmax.f32 %v293_v61, 0.0  ;;  %v313_v0 = vmax.f32 %v297_v62, 0.0 }
  0xc2   :  { %325 = vst [vmem:[%s561_s3 + $0x58] sm:$0xff] %v309_v63 }
  0xc3   :  { %329 = vst [vmem:[%s561_s3 + $0x78] sm:$0xff] %v313_v0 }

// kernel: tombert_with_resnet_forward.30
= control target key start
LH: loop header
LB: loop body
LE: loop exit
PB: predicated region body
PF: predicated region fallthrough
CT: control target
= control target key end

     0   :  { %s475_s1 = inlined_call_operand.vmem [shape: bf16[256,128], index: 1, kind: input, shape index: {}]   ;;  %s476_s0 = inlined_call_operand.vmem [shape: bf16[32,256], index: 0, kind: input, shape index: {}]   ;;  %s477_s2 = inlined_call_operand.vmem [shape: f32[1,128], index: 2, kind: input, shape index: {}]   ;;  %s478_s3 = inlined_call_operand.vmem [shape: f32[32,128], index: 3, kind: output, shape index: {}]  }
   0x1   :  { %v342_v0 = vld [vmem:[%s475_s1 + $0x38] sm:$0xff]  ;;  %v341_v2 = vld [vmem:[%s475_s1 + $0x30] sm:$0xff]  ;;  %v340_v4 = vld [vmem:[%s475_s1 + $0x28] sm:$0xff] }
   0x2   :  { %v350_v1 = vld [vmem:[%s475_s1 + $0x78] sm:$0xff]  ;;  %178 = vmatpush.bf16.msra.mxu0 %v342_v0  ;;  %351 = vmatpush.bf16.msra.mxu2 %v342_v0  ;;  %v349_v3 = vld [vmem:[%s475_s1 + $0x70] sm:$0xff]  ;;  %v348_v5 = vld [vmem:[%s475_s1 + $0x68] sm:$0xff] }
   0x3   :  { %197 = vmatpush.bf16.msra.mxu1 %v350_v1  ;;  %359 = vmatpush.bf16.msra.mxu3 %v350_v1  ;;  %v339_v6 = vld [vmem:[%s475_s1 + $0x20] sm:$0xff]  ;;  %v338_v8 = vld [vmem:[%s475_s1 + $0x18] sm:$0xff]  ;;  %v337_v10 = vld [vmem:[%s475_s1 + $0x10] sm:$0xff] }
   0x4   :  { %v347_v7 = vld [vmem:[%s475_s1 + $0x60] sm:$0xff]  ;;  %v346_v9 = vld [vmem:[%s475_s1 + $0x58] sm:$0xff]  ;;  %v345_v11 = vld [vmem:[%s475_s1 + $0x50] sm:$0xff] }
   0x5   :  { %v336_v12 = vld [vmem:[%s475_s1 + $0x8] sm:$0xff]  ;;  %v335_v14 = vld [vmem:[%s475_s1] sm:$0xff]  ;;  %v261_v18 = vld [vmem:[%s476_s0 + $0x10] sm:$0xf] }
   0x6   :  { %179 = vmatpush.bf16.msra.mxu0 %v341_v2  ;;  %352 = vmatpush.bf16.msra.mxu2 %v341_v2  ;;  %v344_v13 = vld [vmem:[%s475_s1 + $0x48] sm:$0xff]  ;;  %v343_v15 = vld [vmem:[%s475_s1 + $0x40] sm:$0xff]  ;;  %v334_v19 = vld [vmem:[%s476_s0 + $0x14] sm:$0xf0] }
   0x7   :  { %198 = vmatpush.bf16.msra.mxu1 %v349_v3  ;;  %360 = vmatpush.bf16.msra.mxu3 %v349_v3  ;;  %v253_v16 = vld [vmem:[%s476_s0] sm:$0xf]  ;;  %v332_v17 = vld [vmem:[%s476_s0 + $0x4] sm:$0xf0]  ;;  %v331_v20 = vld [vmem:[%s476_s0 + $0x4] sm:$0xf]  ;;  %v262_v25 = vor.u32 %v334_v19, %v261_v18 }
   0x8   :  { %v255_v21 = vld [vmem:[%s476_s0 + $0x8] sm:$0xf0]  ;;  %v333_v22 = vld [vmem:[%s476_s0 + $0x14] sm:$0xf]  ;;  %v263_v23 = vld [vmem:[%s476_s0 + $0x18] sm:$0xf0]  ;;  %v254_v24 = vor.u32 %v332_v17, %v253_v16 }
   0x9   :  { %v258_v26 = vor.u32 %v331_v20, %v255_v21  ;;  %v266_v27 = vor.u32 %v333_v22, %v263_v23  ;;  %v367_v29 = vld [vmem:[%s477_s2] ss:$0 sm:$0xff] }
   0xa   :  { %180 = vmatpush.bf16.msra.mxu0 %v340_v4  ;;  %353 = vmatpush.bf16.msra.mxu2 %v340_v4 }
   0xb   :  { %199 = vmatpush.bf16.msra.mxu1 %v348_v5  ;;  %361 = vmatpush.bf16.msra.mxu3 %v348_v5 }
   0xe   :  { %181 = vmatpush.bf16.msra.mxu0 %v339_v6  ;;  %354 = vmatpush.bf16.msra.mxu2 %v339_v6 }
   0xf   :  { %200 = vmatpush.bf16.msra.mxu1 %v347_v7  ;;  %362 = vmatpush.bf16.msra.mxu3 %v347_v7 }
  0x12   :  { %182 = vmatpush.bf16.msra.mxu0 %v338_v8  ;;  %355 = vmatpush.bf16.msra.mxu2 %v338_v8 }
  0x13   :  { %201 = vmatpush.bf16.msra.mxu1 %v346_v9  ;;  %363 = vmatpush.bf16.msra.mxu3 %v346_v9 }
  0x16   :  { %183 = vmatpush.bf16.msra.mxu0 %v337_v10  ;;  %356 = vmatpush.bf16.msra.mxu2 %v337_v10 }
  0x17   :  { %202 = vmatpush.bf16.msra.mxu1 %v345_v11  ;;  %364 = vmatpush.bf16.msra.mxu3 %v345_v11 }
  0x1a   :  { %184 = vmatpush.bf16.msra.mxu0 %v336_v12  ;;  %357 = vmatpush.bf16.msra.mxu2 %v336_v12 }
  0x1b   :  { %203 = vmatpush.bf16.msra.mxu1 %v344_v13  ;;  %365 = vmatpush.bf16.msra.mxu3 %v344_v13 }
  0x1e   :  { %185 = vmatpush.bf16.msra.mxu0 %v335_v14  ;;  %358 = vmatpush.bf16.msra.mxu2 %v335_v14 }
  0x1f   :  { %204 = vmatpush.bf16.msra.mxu1 %v343_v15  ;;  %366 = vmatpush.bf16.msra.mxu3 %v343_v15 }
  0x21   :  { %186 = vmatmul.bf16.vlgmr.msra.gmra.mxu0 %v254_v24  ;;  %191 = vmatmul.bf16.vlgmr.msra.gmra.mxu2 %v262_v25 }
  0x22   :  { %205 = vmatmul.bf16.vlgmr.msra.gmra.mxu1 %v258_v26  ;;  %210 = vmatmul.bf16.vlgmr.msra.gmra.mxu3 %v266_v27 }
  0x9e   :  { %v187_v28 = vpop.f32.mrf.mxu0 }
  0x9f   :  { %v206_v30 = vpop.f32.mrf.mxu1 }
  0xa0   :  { %v207_v31 = vadd.f32 %v206_v30, %v187_v28 }
  0xa2   :  { %v235_v32 = vadd.f32 %v367_v29, %v207_v31 }
  0xa4   :  { %v239_v33 = vmax.f32 %v235_v32, 0.0  ;;  %v192_v34 = vpop.f32.mrf.mxu2 }
  0xa5   :  { %v211_v35 = vpop.f32.mrf.mxu3 }
  0xa6   :  { %243 = vst [vmem:[%s478_s3] sm:$0xff] %v239_v33  ;;  %v212_v36 = vadd.f32 %v211_v35, %v192_v34  ;;  %v189_v37 = vpop.f32.mrf.mxu0 }
  0xa7   :  { %v208_v38 = vpop.f32.mrf.mxu1 }
  0xa8   :  { %v237_v39 = vadd.f32 %v367_v29, %v212_v36  ;;  %v209_v40 = vadd.f32 %v208_v38, %v189_v37 }
  0xaa   :  { %v241_v41 = vmax.f32 %v237_v39, 0.0  ;;  %v236_v42 = vadd.f32 %v367_v29, %v209_v40 }
  0xac   :  { %245 = vst [vmem:[%s478_s3 + $0x10] sm:$0xff] %v241_v41  ;;  %v240_v43 = vmax.f32 %v236_v42, 0.0  ;;  %v194_v44 = vpop.f32.mrf.mxu2 }
  0xad   :  { %v213_v45 = vpop.f32.mrf.mxu3 }
  0xae   :  { %244 = vst [vmem:[%s478_s3 + $0x8] sm:$0xff] %v240_v43  ;;  %v214_v46 = vadd.f32 %v213_v45, %v194_v44 }
  0xb0   :  { %v238_v47 = vadd.f32 %v367_v29, %v214_v46 }
  0xb2   :  { %v242_v48 = vmax.f32 %v238_v47, 0.0 }
  0xb4   :  { %246 = vst [vmem:[%s478_s3 + $0x18] sm:$0xff] %v242_v48 }

// kernel: tombert_with_resnet_forward.43
= control target key start
LH: loop header
LB: loop body
LE: loop exit
PB: predicated region body
PF: predicated region fallthrough
CT: control target
= control target key end

     0   :  { %s280_s1 = inlined_call_operand.vmem [shape: bf16[128,128], index: 1, kind: input, shape index: {}]   ;;  %s281_s2 = inlined_call_operand.vmem [shape: f32[1,128], index: 2, kind: input, shape index: {}]   ;;  %s282_s0 = inlined_call_operand.vmem [shape: bf16[32,128], index: 0, kind: input, shape index: {}]   ;;  %s283_s3 = inlined_call_operand.vmem [shape: f32[32,128], index: 3, kind: output, shape index: {}]  }
   0x1   :  { %v205_v0 = vld [vmem:[%s280_s1 + $0x38] sm:$0xff]  ;;  %v204_v1 = vld [vmem:[%s280_s1 + $0x30] sm:$0xff]  ;;  %v203_v2 = vld [vmem:[%s280_s1 + $0x28] sm:$0xff] }
   0x2   :  { %106 = vmatpush.bf16.msra.mxu0 %v205_v0  ;;  %206 = vmatpush.bf16.msra.mxu1 %v205_v0  ;;  %v202_v3 = vld [vmem:[%s280_s1 + $0x20] sm:$0xff]  ;;  %v201_v4 = vld [vmem:[%s280_s1 + $0x18] sm:$0xff]  ;;  %v200_v5 = vld [vmem:[%s280_s1 + $0x10] sm:$0xff] }
   0x3   :  { %v199_v6 = vld [vmem:[%s280_s1 + $0x8] sm:$0xff]  ;;  %v198_v7 = vld [vmem:[%s280_s1] sm:$0xff] }
   0x4   :  { %v196_v8 = vld [vmem:[%s282_s0] sm:$0xff]  ;;  %v197_v9 = vld [vmem:[%s282_s0 + $0x8] sm:$0xff] }
   0x5   :  { %v214_v10 = vld [vmem:[%s281_s2] ss:$0 sm:$0xff] }
   0x6   :  { %107 = vmatpush.bf16.msra.mxu0 %v204_v1  ;;  %207 = vmatpush.bf16.msra.mxu1 %v204_v1 }
   0xa   :  { %108 = vmatpush.bf16.msra.mxu0 %v203_v2  ;;  %208 = vmatpush.bf16.msra.mxu1 %v203_v2 }
   0xe   :  { %109 = vmatpush.bf16.msra.mxu0 %v202_v3  ;;  %209 = vmatpush.bf16.msra.mxu1 %v202_v3 }
  0x12   :  { %110 = vmatpush.bf16.msra.mxu0 %v201_v4  ;;  %210 = vmatpush.bf16.msra.mxu1 %v201_v4 }
  0x16   :  { %111 = vmatpush.bf16.msra.mxu0 %v200_v5  ;;  %211 = vmatpush.bf16.msra.mxu1 %v200_v5 }
  0x1a   :  { %112 = vmatpush.bf16.msra.mxu0 %v199_v6  ;;  %212 = vmatpush.bf16.msra.mxu1 %v199_v6 }
  0x1e   :  { %113 = vmatpush.bf16.msra.mxu0 %v198_v7  ;;  %213 = vmatpush.bf16.msra.mxu1 %v198_v7 }
  0x21   :  { %114 = vmatmul.bf16.vlgmr.msra.gmra.mxu0 %v196_v8  ;;  %119 = vmatmul.bf16.vlgmr.msra.gmra.mxu1 %v197_v9 }
  0x9e   :  { %v115_v11 = vpop.f32.mrf.mxu0  ;;  %v120_v12 = vpop.f32.mrf.mxu1 }
  0x9f   :  { %v144_v13 = vadd.f32 %v214_v10, %v115_v11  ;;  %v146_v14 = vadd.f32 %v214_v10, %v120_v12 }
  0xa1   :  { %148 = vst [vmem:[%s283_s3] sm:$0xff] %v144_v13 }
  0xa2   :  { %150 = vst [vmem:[%s283_s3 + $0x10] sm:$0xff] %v146_v14 }
  0xa6   :  { %v117_v15 = vpop.f32.mrf.mxu0  ;;  %v122_v16 = vpop.f32.mrf.mxu1 }
  0xa7   :  { %v145_v17 = vadd.f32 %v214_v10, %v117_v15  ;;  %v147_v18 = vadd.f32 %v214_v10, %v122_v16 }
  0xa9   :  { %149 = vst [vmem:[%s283_s3 + $0x8] sm:$0xff] %v145_v17 }
  0xaa   :  { %151 = vst [vmem:[%s283_s3 + $0x18] sm:$0xff] %v147_v18 }

// kernel: tombert_with_resnet_forward.38
= control target key start
LH: loop header
LB: loop body
LE: loop exit
PB: predicated region body
PF: predicated region fallthrough
CT: control target
= control target key end

     0   :  { %s231_s1 = inlined_call_operand.vmem [shape: bf16[128,128], index: 1, kind: input, shape index: {}]   ;;  %s232_s2 = inlined_call_operand.vmem [shape: f32[1,128], index: 2, kind: input, shape index: {}]   ;;  %s233_s0 = inlined_call_operand.vmem [shape: bf16[16,128], index: 0, kind: input, shape index: {}]   ;;  %s234_s3 = inlined_call_operand.vmem [shape: f32[16,128], index: 3, kind: output, shape index: {}]  }
   0x1   :  { %v173_v0 = vld [vmem:[%s231_s1 + $0x38] sm:$0xff]  ;;  %v172_v1 = vld [vmem:[%s231_s1 + $0x30] sm:$0xff]  ;;  %v171_v2 = vld [vmem:[%s231_s1 + $0x28] sm:$0xff] }
   0x2   :  { %94 = vmatpush.bf16.msra.mxu0 %v173_v0  ;;  %v170_v3 = vld [vmem:[%s231_s1 + $0x20] sm:$0xff]  ;;  %v169_v4 = vld [vmem:[%s231_s1 + $0x18] sm:$0xff]  ;;  %v168_v5 = vld [vmem:[%s231_s1 + $0x10] sm:$0xff] }
   0x3   :  { %v167_v6 = vld [vmem:[%s231_s1 + $0x8] sm:$0xff]  ;;  %v166_v7 = vld [vmem:[%s231_s1] sm:$0xff] }
   0x4   :  { %v165_v8 = vld [vmem:[%s233_s0] sm:$0xff] }
   0x5   :  { %v174_v9 = vld [vmem:[%s232_s2] ss:$0 sm:$0xff] }
   0x6   :  { %95 = vmatpush.bf16.msra.mxu0 %v172_v1 }
   0xa   :  { %96 = vmatpush.bf16.msra.mxu0 %v171_v2 }
   0xe   :  { %97 = vmatpush.bf16.msra.mxu0 %v170_v3 }
  0x12   :  { %98 = vmatpush.bf16.msra.mxu0 %v169_v4 }
  0x16   :  { %99 = vmatpush.bf16.msra.mxu0 %v168_v5 }
  0x1a   :  { %100 = vmatpush.bf16.msra.mxu0 %v167_v6 }
  0x1e   :  { %101 = vmatpush.bf16.msra.mxu0 %v166_v7 }
  0x21   :  { %102 = vmatmul.bf16.vlgmr.msra.gmra.mxu0 %v165_v8 }
  0x9e   :  { %v103_v10 = vpop.f32.mrf.mxu0 }
  0x9f   :  { %v121_v11 = vadd.f32 %v174_v9, %v103_v10 }
  0xa1   :  { %123 = vst [vmem:[%s234_s3] sm:$0xff] %v121_v11 }
  0xa6   :  { %v105_v12 = vpop.f32.mrf.mxu0 }
  0xa7   :  { %v122_v13 = vadd.f32 %v174_v9, %v105_v12 }
  0xa9   :  { %124 = vst [vmem:[%s234_s3 + $0x8] sm:$0xff] %v122_v13 }

// kernel: tombert_with_resnet_forward.37
= control target key start
LH: loop header
LB: loop body
LE: loop exit
PB: predicated region body
PF: predicated region fallthrough
CT: control target
= control target key end

     0   :  { %v16_v0 = vlaneseq  ;;  %s129_s0 = inlined_call_operand.vmem [shape: f32[16,128], index: 0, kind: input, shape index: {}]   ;;  %s130_s1 = inlined_call_operand.vmem [shape: f32[1,128], index: 1, kind: input, shape index: {}]   ;;  %s131_s2 = inlined_call_operand.vmem [shape: f32[1,128], index: 2, kind: input, shape index: {}]   ;;  %s132_s3 = inlined_call_operand.vmem [shape: f32[16,128], index: 3, kind: output, shape index: {}]  }
   0x1   :  { %v14_v1 = vld [vmem:[%s129_s0] sm:$0xff]  ;;  %v15_v4 = vld [vmem:[%s129_s0 + $0x8] sm:$0xff] }
   0x2   :  { %v17_v2 = vand.u32 127, %v16_v0  ;;  %v81_v30 = vld [vmem:[%s130_s1] ss:$0 sm:$0xff] }
   0x3   :  { %v82_v33 = vld [vmem:[%s131_s2] ss:$0 sm:$0xff] }
   0x4   :  { %vm18_vm0 = vcmp.lt.s32.totalorder %v17_v2, 32 }
   0x5   :  { %v19_v3 = vsel %vm18_vm0, %v14_v1, 0.0  ;;  %v20_v5 = vsel %vm18_vm0, %v15_v4, 0.0 }
   0x6   :  { %21 = vadd.xlane.f32.xlu0 %v19_v3 }
   0xe   :  { %23 = vadd.xlane.f32.xlu0 %v20_v5 }
  0x79   :  { %v22_v6 = vpop.xlane.xlu0 %21 }
  0x7a   :  { %v25_v7 = vmul.f32 0.03125, %v22_v6 }
  0x7c   :  { %v27_v8 = vsub.f32 %v14_v1, %v25_v7 }
  0x7e   :  { %v29_v9 = vsel %vm18_vm0, %v27_v8, 0.0 }
  0x7f   :  { %v31_v10 = vmul.f32 %v29_v9, %v29_v9 }
  0x81   :  { %33 = vadd.xlane.f32.xlu1 %v31_v10  ;;  %v24_v11 = vpop.xlane.xlu0 %23 }
  0x82   :  { %v26_v12 = vmul.f32 0.03125, %v24_v11 }
  0x84   :  { %v28_v13 = vsub.f32 %v15_v4, %v26_v12 }
  0x86   :  { %v30_v14 = vsel %vm18_vm0, %v28_v13, 0.0 }
  0x87   :  { %v32_v15 = vmul.f32 %v30_v14, %v30_v14 }
  0x89   :  { %35 = vadd.xlane.f32.xlu1 %v32_v15 }
  0xf4   :  { %v34_v16 = vpop.xlane.xlu1 %33 }
  0xf5   :  { %v37_v17 = vmul.f32 0.03125, %v34_v16 }
  0xf7   :  { %v39_v18 = vadd.f32 1e-12, %v37_v17 }
  0xf9   :  { %83 = vrsqrt.f32 %v39_v18  ;;  %vm47_vm2 = vweird.f32 %v39_v18 }
  0xfc   :  { %v36_v19 = vpop.xlane.xlu1 %35 }
  0xfd   :  { %v38_v20 = vmul.f32 0.03125, %v36_v19 }
  0xff   :  { %v84_v21 = vpop.eup %83  ;;  %v40_v22 = vadd.f32 1e-12, %v38_v20 }
 0x100   :  { %v42_v23 = vmul.f32 %v84_v21, %v39_v18  ;;  %vm48_vm1 = vweird.f32 %v84_v21 }
 0x101   :  { %85 = vrsqrt.f32 %v40_v22  ;;  %vm49_vm3 = vmor %vm47_vm2, %vm48_vm1  ;;  %vm57_vm5 = vweird.f32 %v40_v22 }
 0x102   :  { %v43_v24 = vmul.f32 %v84_v21, %v42_v23 }
 0x104   :  { %v44_v25 = vmul.f32 0.5, %v43_v24 }
 0x106   :  { %v45_v26 = vsub.f32 1.5, %v44_v25 }
 0x107   :  { %v86_v27 = vpop.eup %85 }
 0x108   :  { %v46_v28 = vmul.f32 %v84_v21, %v45_v26  ;;  %v52_v29 = vmul.f32 %v86_v27, %v40_v22  ;;  %vm58_vm4 = vweird.f32 %v86_v27 }
 0x109   :  { %vm59_vm6 = vmor %vm57_vm5, %vm58_vm4 }
 0x10a   :  { %v50_v31 = vsel %vm49_vm3, %v84_v21, %v46_v28  ;;  %v53_v32 = vmul.f32 %v86_v27, %v52_v29 }
 0x10b   :  { %v61_v34 = vmul.f32 %v50_v31, %v29_v9 }
 0x10c   :  { %v54_v35 = vmul.f32 0.5, %v53_v32 }
 0x10d   :  { %v67_v36 = vmul.f32 %v81_v30, %v61_v34 }
 0x10e   :  { %v55_v37 = vsub.f32 1.5, %v54_v35 }
 0x10f   :  { %v73_v38 = vadd.f32 %v82_v33, %v67_v36 }
 0x110   :  { %v56_v39 = vmul.f32 %v86_v27, %v55_v37 }
 0x111   :  { %75 = vst [vmem:[%s132_s3] sm:$0xff] %v73_v38 }
 0x112   :  { %v60_v40 = vsel %vm59_vm6, %v86_v27, %v56_v39 }
 0x113   :  { %v62_v41 = vmul.f32 %v60_v40, %v30_v14 }
 0x115   :  { %v68_v42 = vmul.f32 %v81_v30, %v62_v41 }
 0x117   :  { %v74_v43 = vadd.f32 %v82_v33, %v68_v42 }
 0x119   :  { %76 = vst [vmem:[%s132_s3 + $0x8] sm:$0xff] %v74_v43 }

// kernel: tombert_with_resnet_forward.39
= control target key start
LH: loop header
LB: loop body
LE: loop exit
PB: predicated region body
PF: predicated region fallthrough
CT: control target
= control target key end

     0   :  { %s598_s15 = smov 0   ;;  %s600_s16 = smov 0   ;;  %s662_s0 = inlined_call_operand.vmem [shape: bf16[8,8,8], index: 0, kind: input, shape index: {}]   ;;  %s663_s1 = inlined_call_operand.vmem [shape: bf16[8,8,8], index: 1, kind: input, shape index: {}]   ;;  %s664_s2 = inlined_call_operand.vmem [shape: bf16[8,8,8], index: 2, kind: input, shape index: {}]   ;;  %s665_s3 = inlined_call_operand.vmem [shape: f32[8,1,8], index: 3, kind: input, shape index: {}]   ;;  %s666_s4 = inlined_call_operand.vmem [shape: f32[8,8,8], index: 4, kind: output, shape index: {}]  }
   0x1   :  { %s602_s17 = smov 0  }
   0x2 LB: > { %s26_s18 = sadd.s32 1, %s564_s16  ;;  %p500_p0 = scmp.ge.s32.totalorder %s568_s17, 1  ;;  %s568_s17 = sphi %s602_s17, %s14_s17   ;;  %s564_s16 = sphi %s600_s16, %s668_s16   ;;  %s560_s15 = sphi %s598_s15, %s667_s15  }
   0x3   : > { %p28_p1 = scmp.ge.s32.totalorder %s26_s18, 8  ;;  %p214_p2 = scmp.lt.s32.totalorder %s568_s17, 9 }
   0x5   : > { %s670_s18 = smov (%p28_p1, %s26_s18), 0  ;;  %p215_p3 = pnand %p500_p0, %p214_p2 }
   0x6   : > { %p258_p4 = scmp.lt.s32.totalorder (!%p215_p3), %s560_s15, 7 }
   0x7   : > { %218 = sbr.rel (%p215_p3) target bundleno = 627 (0x273), region = 36 }
   0xc   : > { %s672_s15 = smov (!%p258_p4, %s560_s15), 7  ;;  %vm294_vm0 = vcmask 64512   ;;  %vm291_vm1 = vcmask 7168   ;;  %v570_v3 = vmov -1e+30   ;;  %v571_v10 = vmov 0  }
   0xd   : > { %s619_s19 = sshll.u32 %s672_s15, 2  ;;  %s281_s28 = scalar_lea.vmem %s665_s3, %s672_s15  ;;  %292 = vst.msk [vmem:[#allocation2] sm:$0xff] %vm291_vm1, %v570_v3  ;;  %536 = vset.pattern.permute.xlu0 %v571_v10  ;;  %537 = vset.pattern.permute.xlu1 %v571_v10  ;;  %v572_v11 = vmov 0.0   ;;  %vm360_vm2 = vcmask 1043456  }
   0xe   : > { %s268_s22 = scalar_lea.vmem %s663_s1, %s619_s19  ;;  %s261_s25 = scalar_lea.vmem %s662_s0, %s619_s19  ;;  %v539_v4 = vld [vmem:[%s281_s28] ss:$0 sm:$0xff]  ;;  %538 = vset.pattern.permute.xlu2 %v571_v10  ;;  %293 = vst.msk [vmem:[#allocation3] sm:$0xff] %vm291_vm1, %v572_v11 }
   0xf   : > { %v297_v0 = vld [vmem:[%s268_s22] sm:$0xf]  ;;  %295 = vst.msk [vmem:[#allocation4] sm:$0xff] %vm294_vm0, %v572_v11  ;;  %s275_s5 = scalar_lea.vmem %s664_s2, %s619_s19  ;;  %s504_s6 = sshll.u32 %s672_s15, 3 }
  0x10   : > { %v303_v1 = vsel %vm294_vm0, %v297_v0, 0  ;;  %v296_v2 = vld [vmem:[%s261_s25] sm:$0xf]  ;;  %s285_s9 = scalar_lea.vmem %s666_s4, %s504_s6 }
  0x11   : > { %312 = vmatpush.bf16.xpose.msra.mxu0 %v303_v1  ;;  %v356_v16 = vld [vmem:[%s275_s5] sm:$0xf] }
  0x12   : > { %v362_v17 = vsel %vm360_vm2, %v356_v16, 0 }
  0x13   : > { %371 = vmatpush.bf16.msra.mxu1 %v362_v17 }
  0x14   : > { %v324_v12 = vld [vmem:[#allocation2] sm:$0xff] }
  0x15   : > { %v340_v26 = vld [vmem:[#allocation3] sm:$0xff] }
  0x16   : > { %v348_v34 = vld [vmem:[#allocation4] sm:$0xff] }
  0x18   : > { %505 = vmatmul.msk.bf16.vlgmr.msra.gmra.mxu0 %vm294_vm0, %v296_v2 }
  0x95   : > { %v314_v5 = vpop.f32.mrf.mxu0 }
  0x96   : > { %v318_v6 = vmul.f32 0.35355338, %v314_v5 }
  0x98   : > { %v323_v7 = vadd.f32 %v539_v4, %v318_v6 }
  0x9a   : > { %v325_v8 = vsel %vm294_vm0, %v323_v7, -inf }
  0x9b   : > { %326 = vmax.xlane.f32.xlu0 %v325_v8 }
  0x9d   : > { %v316_v9 = vpop.f32.mrf.mxu0 }
 0x10e   : > { %v327_v13 = vpop.xlane.xlu0 %326 }
 0x10f   : > { %v328_v14 = vmax.f32 %v324_v12, %v327_v13 }
 0x111   : > { %v329_v15 = vsub.f32 %v324_v12, %v328_v14  ;;  %379 = vst.msk [vmem:[#allocation2] sm:$0xff] %vm291_vm1, %v328_v14  ;;  %334 = vperm.xlu0 %536, %v328_v14  }
 0x113   : > { %v330_v24 = vmul.f32 1.442695, %v329_v15 }
 0x183   : > { %v335_v18 = vpop.permute.xlu0 %334 }
 0x184   : > { %v337_v19 = vsub.f32 %v323_v7, %v335_v18 }
 0x186   : > { %v338_v20 = vmul.f32 1.442695, %v337_v19 }
 0x188   : > { %540 = vpow2.f32 %v338_v20 }
 0x189   : > { %542 = vpow2.f32 %v330_v24 }
 0x18e   : > { %v541_v21 = vpop.eup %540 }
 0x18f   : > { %v342_v22 = vsel %vm294_vm0, %v541_v21, 0.0  ;;  %v355_v23 = vpack.c.bf16 %v541_v21, %v541_v21  ;;  %v543_v25 = vpop.eup %542 }
 0x190   : > { %343 = vadd.xlane.f32.xlu1 %v342_v22  ;;  %v341_v27 = vmul.f32 %v543_v25, %v340_v26 }
 0x191   : > { %506 = vmatmul.msk.bf16.vlgmr.msra.gmra.mxu1 %vm294_vm0, %v355_v23 }
 0x1a9   : > { %351 = vperm.xlu1 %537, %v543_v25  }
 0x203   : > { %v344_v28 = vpop.xlane.xlu1 %343 }
 0x204   : > { %v345_v29 = vadd.f32 %v344_v28, %v341_v27 }
 0x206   : > { %347 = vst.msk [vmem:[#allocation3] sm:$0xff] %vm291_vm1, %v345_v29 }
 0x20d   : > { %v384_v30 = vld [vmem:[#allocation3] sm:$0xff] }
 0x20e   : > { %v373_v31 = vpop.f32.mrf.mxu1  ;;  %544 = vrcp.f32 %v384_v30 }
 0x214   : > { %v545_v32 = vpop.eup %544 }
 0x215   : > { %388 = vperm.xlu2 %538, %v545_v32  }
 0x216   : > { %v375_v33 = vpop.f32.mrf.mxu1 }
 0x21b   : > { %v352_v35 = vpop.permute.xlu1 %351 }
 0x21c   : > { %v354_v36 = vmul.f32 %v352_v35, %v348_v34 }
 0x21e   : > { %v377_v37 = vadd.f32 %v373_v31, %v354_v36 }
 0x220   : > { %378 = vst.msk [vmem:[#allocation4] sm:$0xff] %vm294_vm0, %v377_v37 }
 0x227   : > { %v383_v38 = vld [vmem:[#allocation4] sm:$0xff] }
 0x26f   : > { %v389_v39 = vpop.permute.xlu2 %388 }
 0x270   : > { %v391_v40 = vmul.f32 %v389_v39, %v383_v38 }
 0x272   : > { %392 = vst.msk [vmem:[%s285_s9] sm:$0xff] %vm294_vm0, %v391_v40 }
 0x273 PF: > { %s14_s17 = sadd.s32 1, %s568_s17   ;;  %s667_s15 = smov %s564_s16 }
 0x274   : > { %p11_p5 = scmp.ge.s32.totalorder %s14_s17, 10   ;;  %s668_s16 = smov %s670_s18 }
 0x276   :  { %13 = sbr.rel (!%p11_p5) target bundleno = 2 (0x2), region = 83 }

// kernel: tombert_with_resnet_forward.41
= control target key start
LH: loop header
LB: loop body
LE: loop exit
PB: predicated region body
PF: predicated region fallthrough
CT: control target
= control target key end

     0   :  { %s253_s1 = inlined_call_operand.vmem [shape: bf16[128,128], index: 1, kind: input, shape index: {}]   ;;  %s254_s2 = inlined_call_operand.vmem [shape: f32[1,128], index: 2, kind: input, shape index: {}]   ;;  %s255_s0 = inlined_call_operand.vmem [shape: bf16[16,128], index: 0, kind: input, shape index: {}]   ;;  %s256_s3 = inlined_call_operand.vmem [shape: f32[16,128], index: 3, kind: output, shape index: {}]  }
   0x1   :  { %v191_v0 = vld [vmem:[%s253_s1 + $0x38] sm:$0xff]  ;;  %v190_v1 = vld [vmem:[%s253_s1 + $0x30] sm:$0xff]  ;;  %v189_v2 = vld [vmem:[%s253_s1 + $0x28] sm:$0xff] }
   0x2   :  { %94 = vmatpush.bf16.msra.mxu0 %v191_v0  ;;  %v188_v3 = vld [vmem:[%s253_s1 + $0x20] sm:$0xff]  ;;  %v187_v4 = vld [vmem:[%s253_s1 + $0x18] sm:$0xff]  ;;  %v186_v5 = vld [vmem:[%s253_s1 + $0x10] sm:$0xff] }
   0x3   :  { %v185_v6 = vld [vmem:[%s253_s1 + $0x8] sm:$0xff]  ;;  %v184_v7 = vld [vmem:[%s253_s1] sm:$0xff] }
   0x4   :  { %v183_v8 = vld [vmem:[%s255_s0] sm:$0xff] }
   0x5   :  { %v192_v9 = vld [vmem:[%s254_s2] ss:$0 sm:$0xff] }
   0x6   :  { %95 = vmatpush.bf16.msra.mxu0 %v190_v1 }
   0xa   :  { %96 = vmatpush.bf16.msra.mxu0 %v189_v2 }
   0xe   :  { %97 = vmatpush.bf16.msra.mxu0 %v188_v3 }
  0x12   :  { %98 = vmatpush.bf16.msra.mxu0 %v187_v4 }
  0x16   :  { %99 = vmatpush.bf16.msra.mxu0 %v186_v5 }
  0x1a   :  { %100 = vmatpush.bf16.msra.mxu0 %v185_v6 }
  0x1e   :  { %101 = vmatpush.bf16.msra.mxu0 %v184_v7 }
  0x21   :  { %102 = vmatmul.bf16.vlgmr.msra.gmra.mxu0 %v183_v8 }
  0x9e   :  { %v103_v10 = vpop.f32.mrf.mxu0 }
  0x9f   :  { %v121_v11 = vadd.f32 %v192_v9, %v103_v10 }
  0xa1   :  { %v125_v12 = vmul.f32 %v121_v11, %v121_v11  ;;  %v123_v25 = vmul.f32 0.5, %v121_v11 }
  0xa3   :  { %v127_v13 = vmul.f32 %v125_v12, %v121_v11 }
  0xa5   :  { %v129_v14 = vmul.f32 0.044715, %v127_v13 }
  0xa6   :  { %v105_v15 = vpop.f32.mrf.mxu0 }
  0xa7   :  { %v131_v16 = vadd.f32 %v129_v14, %v121_v11  ;;  %v122_v17 = vadd.f32 %v192_v9, %v105_v15 }
  0xa9   :  { %v133_v18 = vmul.f32 0.7978846, %v131_v16  ;;  %v126_v19 = vmul.f32 %v122_v17, %v122_v17  ;;  %v124_v29 = vmul.f32 0.5, %v122_v17 }
  0xab   :  { %193 = vtanh.f32 %v133_v18  ;;  %v128_v20 = vmul.f32 %v126_v19, %v122_v17 }
  0xad   :  { %v130_v21 = vmul.f32 0.044715, %v128_v20 }
  0xaf   :  { %v132_v22 = vadd.f32 %v130_v21, %v122_v17 }
  0xb1   :  { %v194_v23 = vpop.eup %193  ;;  %v134_v24 = vmul.f32 0.7978846, %v132_v22 }
  0xb2   :  { %v137_v26 = vadd.f32 1.0, %v194_v23 }
  0xb3   :  { %195 = vtanh.f32 %v134_v24 }
  0xb4   :  { %v139_v27 = vmul.f32 %v137_v26, %v123_v25 }
  0xb6   :  { %141 = vst [vmem:[%s256_s3] sm:$0xff] %v139_v27 }
  0xb9   :  { %v196_v28 = vpop.eup %195 }
  0xba   :  { %v138_v30 = vadd.f32 1.0, %v196_v28 }
  0xbc   :  { %v140_v31 = vmul.f32 %v138_v30, %v124_v29 }
  0xbe   :  { %142 = vst [vmem:[%s256_s3 + $0x8] sm:$0xff] %v140_v31 }

// kernel: tombert_with_resnet_forward.46
= control target key start
LH: loop header
LB: loop body
LE: loop exit
PB: predicated region body
PF: predicated region fallthrough
CT: control target
= control target key end

     0   :  { %s644_s15 = smov 0   ;;  %s646_s16 = smov 0   ;;  %s703_s0 = inlined_call_operand.vmem [shape: bf16[8,8,8], index: 0, kind: input, shape index: {}]   ;;  %s704_s1 = inlined_call_operand.vmem [shape: bf16[8,16,8], index: 1, kind: input, shape index: {}]   ;;  %s705_s2 = inlined_call_operand.vmem [shape: bf16[8,16,8], index: 2, kind: input, shape index: {}]   ;;  %s706_s3 = inlined_call_operand.vmem [shape: f32[8,1,16], index: 3, kind: input, shape index: {}]   ;;  %s707_s4 = inlined_call_operand.vmem [shape: f32[8,8,8], index: 4, kind: output, shape index: {}]  }
   0x1   :  { %s648_s17 = smov 0  }
   0x2 LB: > { %s26_s18 = sadd.s32 1, %s610_s16  ;;  %p532_p0 = scmp.ge.s32.totalorder %s614_s17, 1  ;;  %s614_s17 = sphi %s648_s17, %s14_s17   ;;  %s610_s16 = sphi %s646_s16, %s709_s16   ;;  %s606_s15 = sphi %s644_s15, %s708_s15  }
   0x3   : > { %p28_p1 = scmp.ge.s32.totalorder %s26_s18, 8  ;;  %p220_p2 = scmp.lt.s32.totalorder %s614_s17, 9 }
   0x5   : > { %s711_s18 = smov (%p28_p1, %s26_s18), 0  ;;  %p221_p3 = pnand %p532_p0, %p220_p2 }
   0x6   : > { %p268_p4 = scmp.lt.s32.totalorder (!%p221_p3), %s606_s15, 7 }
   0x7   : > { %224 = sbr.rel (%p221_p3) target bundleno = 627 (0x273), region = 36 }
   0xc   : > { %s713_s15 = smov (!%p268_p4, %s606_s15), 7  ;;  %vm310_vm0 = vcmask 64512   ;;  %vm307_vm1 = vcmask 7168   ;;  %v616_v3 = vmov -1e+30   ;;  %vm347_vm2 = vcmask 130048  }
   0xd   : > { %s662_s19 = sshll.u32 %s713_s15, 3  ;;  %s533_s23 = sshll.u32 %s713_s15, 2  ;;  %308 = vst.msk [vmem:[#allocation2] sm:$0xff] %vm307_vm1, %v616_v3  ;;  %v617_v10 = vmov 0   ;;  %v618_v11 = vmov 0.0  }
   0xe   : > { %s280_s22 = scalar_lea.vmem %s704_s1, %s662_s19  ;;  %s271_s26 = scalar_lea.vmem %s703_s0, %s533_s23  ;;  %582 = vset.pattern.permute.xlu0 %v617_v10  ;;  %583 = vset.pattern.permute.xlu1 %v617_v10  ;;  %309 = vst.msk [vmem:[#allocation3] sm:$0xff] %vm307_vm1, %v618_v11 }
   0xf   : > { %v553_v0 = vld [vmem:[%s280_s22] sm:$0xff]  ;;  %s297_s29 = scalar_lea.vmem %s706_s3, %s713_s15  ;;  %584 = vset.pattern.permute.xlu2 %v617_v10  ;;  %311 = vst.msk [vmem:[#allocation4] sm:$0xff] %vm310_vm0, %v618_v11  ;;  %s290_s6 = scalar_lea.vmem %s705_s2, %s662_s19 }
  0x10   : > { %v325_v1 = vsel %vm310_vm0, %v553_v0, 0  ;;  %v312_v2 = vld [vmem:[%s271_s26] sm:$0xf]  ;;  %s301_s9 = scalar_lea.vmem %s707_s4, %s662_s19 }
  0x11   : > { %334 = vmatpush.bf16.xpose.msra.mxu0 %v325_v1  ;;  %v585_v4 = vld [vmem:[%s297_s29] ss:$0 sm:$0xff] }
  0x12   : > { %v554_v16 = vld [vmem:[%s290_s6] sm:$0xff] }
  0x13   : > { %397 = vmatpush.bf16.msra.mxu1 %v554_v16 }
  0x14   : > { %v346_v12 = vld [vmem:[#allocation2] sm:$0xff] }
  0x15   : > { %v363_v25 = vld [vmem:[#allocation3] sm:$0xff] }
  0x16   : > { %v371_v33 = vld [vmem:[#allocation4] sm:$0xff] }
  0x18   : > { %543 = vmatmul.msk.bf16.vlgmr.msra.gmra.mxu0 %vm310_vm0, %v312_v2 }
  0x95   : > { %v336_v5 = vpop.f32.mrf.mxu0 }
  0x96   : > { %v340_v6 = vmul.f32 0.35355338, %v336_v5 }
  0x98   : > { %v345_v7 = vadd.f32 %v585_v4, %v340_v6 }
  0x9a   : > { %v348_v8 = vsel %vm347_vm2, %v345_v7, -inf }
  0x9b   : > { %349 = vmax.xlane.f32.xlu0 %v348_v8 }
  0x9d   : > { %v338_v9 = vpop.f32.mrf.mxu0 }
 0x10e   : > { %v350_v13 = vpop.xlane.xlu0 %349 }
 0x10f   : > { %v351_v14 = vmax.f32 %v346_v12, %v350_v13 }
 0x111   : > { %v352_v15 = vsub.f32 %v346_v12, %v351_v14  ;;  %405 = vst.msk [vmem:[#allocation2] sm:$0xff] %vm307_vm1, %v351_v14  ;;  %357 = vperm.xlu0 %582, %v351_v14  }
 0x113   : > { %v353_v23 = vmul.f32 1.442695, %v352_v15 }
 0x183   : > { %v358_v17 = vpop.permute.xlu0 %357 }
 0x184   : > { %v360_v18 = vsub.f32 %v345_v7, %v358_v17 }
 0x186   : > { %v361_v19 = vmul.f32 1.442695, %v360_v18 }
 0x188   : > { %586 = vpow2.f32 %v361_v19 }
 0x189   : > { %588 = vpow2.f32 %v353_v23 }
 0x18e   : > { %v587_v20 = vpop.eup %586 }
 0x18f   : > { %v365_v21 = vsel %vm347_vm2, %v587_v20, 0.0  ;;  %v378_v22 = vpack.c.bf16 %v587_v20, %v587_v20  ;;  %v589_v24 = vpop.eup %588 }
 0x190   : > { %366 = vadd.xlane.f32.xlu1 %v365_v21  ;;  %v364_v26 = vmul.f32 %v589_v24, %v363_v25 }
 0x191   : > { %548 = vmatmul.msk.bf16.vlgmr.msra.gmra.mxu1 %vm347_vm2, %v378_v22 }
 0x1a9   : > { %374 = vperm.xlu1 %583, %v589_v24  }
 0x203   : > { %v367_v27 = vpop.xlane.xlu1 %366 }
 0x204   : > { %v368_v28 = vadd.f32 %v367_v27, %v364_v26 }
 0x206   : > { %370 = vst.msk [vmem:[#allocation3] sm:$0xff] %vm307_vm1, %v368_v28 }
 0x20d   : > { %v410_v29 = vld [vmem:[#allocation3] sm:$0xff] }
 0x20e   : > { %v399_v30 = vpop.f32.mrf.mxu1  ;;  %590 = vrcp.f32 %v410_v29 }
 0x214   : > { %v591_v31 = vpop.eup %590 }
 0x215   : > { %414 = vperm.xlu2 %584, %v591_v31  }
 0x216   : > { %v401_v32 = vpop.f32.mrf.mxu1 }
 0x21b   : > { %v375_v34 = vpop.permute.xlu1 %374 }
 0x21c   : > { %v377_v35 = vmul.f32 %v375_v34, %v371_v33 }
 0x21e   : > { %v403_v36 = vadd.f32 %v399_v30, %v377_v35 }
 0x220   : > { %404 = vst.msk [vmem:[#allocation4] sm:$0xff] %vm310_vm0, %v403_v36 }
 0x227   : > { %v409_v37 = vld [vmem:[#allocation4] sm:$0xff] }
 0x26f   : > { %v415_v38 = vpop.permute.xlu2 %414 }
 0x270   : > { %v417_v39 = vmul.f32 %v415_v38, %v409_v37 }
 0x272   : > { %418 = vst.msk [vmem:[%s301_s9] sm:$0xff] %vm310_vm0, %v417_v39 }
 0x273 PF: > { %s14_s17 = sadd.s32 1, %s614_s17   ;;  %s708_s15 = smov %s610_s16 }
 0x274   : > { %p11_p5 = scmp.ge.s32.totalorder %s14_s17, 10   ;;  %s709_s16 = smov %s711_s18 }
 0x276   :  { %13 = sbr.rel (!%p11_p5) target bundleno = 2 (0x2), region = 83 }

// kernel: tombert_with_resnet_forward.40
= control target key start
LH: loop header
LB: loop body
LE: loop exit
PB: predicated region body
PF: predicated region fallthrough
CT: control target
= control target key end

     0   :  { %v136_v9 = vlaneseq  ;;  %s340_s1 = inlined_call_operand.vmem [shape: bf16[128,128], index: 1, kind: input, shape index: {}]   ;;  %s341_s2 = inlined_call_operand.vmem [shape: f32[1,128], index: 2, kind: input, shape index: {}]   ;;  %s342_s0 = inlined_call_operand.vmem [shape: bf16[16,128], index: 0, kind: input, shape index: {}]   ;;  %s343_s3 = inlined_call_operand.vmem [shape: f32[16,128], index: 3, kind: input, shape index: {}]   ;;  %s344_s4 = inlined_call_operand.vmem [shape: f32[1,128], index: 4, kind: input, shape index: {}]   ;;  %s345_s5 = inlined_call_operand.vmem [shape: f32[1,128], index: 5, kind: input, shape index: {}]   ;;  %s346_s6 = inlined_call_operand.vmem [shape: f32[16,128], index: 6, kind: output, shape index: {}]  }
   0x1   :  { %v245_v0 = vld [vmem:[%s340_s1 + $0x38] sm:$0xff]  ;;  %v244_v1 = vld [vmem:[%s340_s1 + $0x30] sm:$0xff]  ;;  %v243_v2 = vld [vmem:[%s340_s1 + $0x28] sm:$0xff] }
   0x2   :  { %103 = vmatpush.bf16.msra.mxu0 %v245_v0  ;;  %v242_v3 = vld [vmem:[%s340_s1 + $0x20] sm:$0xff]  ;;  %v241_v4 = vld [vmem:[%s340_s1 + $0x18] sm:$0xff]  ;;  %v240_v5 = vld [vmem:[%s340_s1 + $0x10] sm:$0xff]  ;;  %v137_v11 = vand.u32 127, %v136_v9 }
   0x3   :  { %v239_v6 = vld [vmem:[%s340_s1 + $0x8] sm:$0xff]  ;;  %v238_v7 = vld [vmem:[%s340_s1] sm:$0xff] }
   0x4   :  { %v237_v8 = vld [vmem:[%s342_s0] sm:$0xff]  ;;  %vm138_vm0 = vcmp.lt.s32.totalorder %v137_v11, 32  ;;  %v133_v18 = vld [vmem:[%s343_s3 + $0x8] sm:$0xff] }
   0x5   :  { %v246_v10 = vld [vmem:[%s341_s2] ss:$0 sm:$0xff] }
   0x6   :  { %104 = vmatpush.bf16.msra.mxu0 %v244_v1  ;;  %v132_v13 = vld [vmem:[%s343_s3] sm:$0xff] }
   0x7   :  { %v247_v46 = vld [vmem:[%s344_s4] ss:$0 sm:$0xff] }
   0x8   :  { %v248_v49 = vld [vmem:[%s345_s5] ss:$0 sm:$0xff] }
   0xa   :  { %105 = vmatpush.bf16.msra.mxu0 %v243_v2 }
   0xe   :  { %106 = vmatpush.bf16.msra.mxu0 %v242_v3 }
  0x12   :  { %107 = vmatpush.bf16.msra.mxu0 %v241_v4 }
  0x16   :  { %108 = vmatpush.bf16.msra.mxu0 %v240_v5 }
  0x1a   :  { %109 = vmatpush.bf16.msra.mxu0 %v239_v6 }
  0x1e   :  { %110 = vmatpush.bf16.msra.mxu0 %v238_v7 }
  0x21   :  { %111 = vmatmul.bf16.vlgmr.msra.gmra.mxu0 %v237_v8 }
  0x9e   :  { %v112_v12 = vpop.f32.mrf.mxu0 }
  0x9f   :  { %v130_v14 = vadd.f32 %v246_v10, %v112_v12 }
  0xa1   :  { %v134_v15 = vadd.f32 %v132_v13, %v130_v14 }
  0xa3   :  { %v139_v16 = vsel %vm138_vm0, %v134_v15, 0.0 }
  0xa4   :  { %141 = vadd.xlane.f32.xlu0 %v139_v16 }
  0xa6   :  { %v114_v17 = vpop.f32.mrf.mxu0 }
  0xa7   :  { %v131_v19 = vadd.f32 %v246_v10, %v114_v17 }
  0xa9   :  { %v135_v20 = vadd.f32 %v133_v18, %v131_v19 }
  0xab   :  { %v140_v21 = vsel %vm138_vm0, %v135_v20, 0.0 }
  0xac   :  { %143 = vadd.xlane.f32.xlu0 %v140_v21 }
 0x117   :  { %v142_v22 = vpop.xlane.xlu0 %141 }
 0x118   :  { %v145_v23 = vmul.f32 0.03125, %v142_v22 }
 0x11a   :  { %v147_v24 = vsub.f32 %v134_v15, %v145_v23 }
 0x11c   :  { %v149_v25 = vsel %vm138_vm0, %v147_v24, 0.0 }
 0x11d   :  { %v151_v26 = vmul.f32 %v149_v25, %v149_v25 }
 0x11f   :  { %153 = vadd.xlane.f32.xlu1 %v151_v26  ;;  %v144_v27 = vpop.xlane.xlu0 %143 }
 0x120   :  { %v146_v28 = vmul.f32 0.03125, %v144_v27 }
 0x122   :  { %v148_v29 = vsub.f32 %v135_v20, %v146_v28 }
 0x124   :  { %v150_v30 = vsel %vm138_vm0, %v148_v29, 0.0 }
 0x125   :  { %v152_v31 = vmul.f32 %v150_v30, %v150_v30 }
 0x127   :  { %155 = vadd.xlane.f32.xlu1 %v152_v31 }
 0x192   :  { %v154_v32 = vpop.xlane.xlu1 %153 }
 0x193   :  { %v157_v33 = vmul.f32 0.03125, %v154_v32 }
 0x195   :  { %v159_v34 = vadd.f32 1e-12, %v157_v33 }
 0x197   :  { %249 = vrsqrt.f32 %v159_v34  ;;  %vm167_vm2 = vweird.f32 %v159_v34 }
 0x19a   :  { %v156_v35 = vpop.xlane.xlu1 %155 }
 0x19b   :  { %v158_v36 = vmul.f32 0.03125, %v156_v35 }
 0x19d   :  { %v250_v37 = vpop.eup %249  ;;  %v160_v38 = vadd.f32 1e-12, %v158_v36 }
 0x19e   :  { %v162_v39 = vmul.f32 %v250_v37, %v159_v34  ;;  %vm168_vm1 = vweird.f32 %v250_v37 }
 0x19f   :  { %251 = vrsqrt.f32 %v160_v38  ;;  %vm169_vm3 = vmor %vm167_vm2, %vm168_vm1  ;;  %vm177_vm5 = vweird.f32 %v160_v38 }
 0x1a0   :  { %v163_v40 = vmul.f32 %v250_v37, %v162_v39 }
 0x1a2   :  { %v164_v41 = vmul.f32 0.5, %v163_v40 }
 0x1a4   :  { %v165_v42 = vsub.f32 1.5, %v164_v41 }
 0x1a5   :  { %v252_v43 = vpop.eup %251 }
 0x1a6   :  { %v166_v44 = vmul.f32 %v250_v37, %v165_v42  ;;  %v172_v45 = vmul.f32 %v252_v43, %v160_v38  ;;  %vm178_vm4 = vweird.f32 %v252_v43 }
 0x1a7   :  { %vm179_vm6 = vmor %vm177_vm5, %vm178_vm4 }
 0x1a8   :  { %v170_v47 = vsel %vm169_vm3, %v250_v37, %v166_v44  ;;  %v173_v48 = vmul.f32 %v252_v43, %v172_v45 }
 0x1a9   :  { %v181_v50 = vmul.f32 %v170_v47, %v149_v25 }
 0x1aa   :  { %v174_v51 = vmul.f32 0.5, %v173_v48 }
 0x1ab   :  { %v187_v52 = vmul.f32 %v247_v46, %v181_v50 }
 0x1ac   :  { %v175_v53 = vsub.f32 1.5, %v174_v51 }
 0x1ad   :  { %v193_v54 = vadd.f32 %v248_v49, %v187_v52 }
 0x1ae   :  { %v176_v55 = vmul.f32 %v252_v43, %v175_v53 }
 0x1af   :  { %195 = vst [vmem:[%s346_s6] sm:$0xff] %v193_v54 }
 0x1b0   :  { %v180_v56 = vsel %vm179_vm6, %v252_v43, %v176_v55 }
 0x1b1   :  { %v182_v57 = vmul.f32 %v180_v56, %v150_v30 }
 0x1b3   :  { %v188_v58 = vmul.f32 %v247_v46, %v182_v57 }
 0x1b5   :  { %v194_v59 = vadd.f32 %v248_v49, %v188_v58 }
 0x1b7   :  { %196 = vst [vmem:[%s346_s6 + $0x8] sm:$0xff] %v194_v59 }

// kernel: tombert_with_resnet_forward.50
= control target key start
LH: loop header
LB: loop body
LE: loop exit
PB: predicated region body
PF: predicated region fallthrough
CT: control target
= control target key end

     0   :  { %s211_s1 = inlined_call_operand.vmem [shape: bf16[128,128], index: 1, kind: input, shape index: {}]   ;;  %s212_s2 = inlined_call_operand.vmem [shape: f32[1,128], index: 2, kind: input, shape index: {}]   ;;  %s213_s0 = inlined_call_operand.vmem [shape: bf16[8,128], index: 0, kind: input, shape index: {}]   ;;  %s214_s3 = inlined_call_operand.vmem [shape: f32[8,128], index: 3, kind: output, shape index: {}]  }
   0x1   :  { %v154_v0 = vld [vmem:[%s211_s1 + $0x38] sm:$0xff]  ;;  %v153_v1 = vld [vmem:[%s211_s1 + $0x30] sm:$0xff]  ;;  %v152_v2 = vld [vmem:[%s211_s1 + $0x28] sm:$0xff] }
   0x2   :  { %85 = vmatpush.bf16.msra.mxu0 %v154_v0  ;;  %v151_v3 = vld [vmem:[%s211_s1 + $0x20] sm:$0xff]  ;;  %v150_v4 = vld [vmem:[%s211_s1 + $0x18] sm:$0xff]  ;;  %v149_v5 = vld [vmem:[%s211_s1 + $0x10] sm:$0xff] }
   0x3   :  { %v148_v6 = vld [vmem:[%s211_s1 + $0x8] sm:$0xff]  ;;  %v147_v7 = vld [vmem:[%s211_s1] sm:$0xff] }
   0x4   :  { %v20_v8 = vld [vmem:[%s213_s0] sm:$0xf] }
   0x5   :  { %v155_v9 = vld [vmem:[%s212_s2] ss:$0 sm:$0xff] }
   0x6   :  { %86 = vmatpush.bf16.msra.mxu0 %v153_v1 }
   0xa   :  { %87 = vmatpush.bf16.msra.mxu0 %v152_v2 }
   0xe   :  { %88 = vmatpush.bf16.msra.mxu0 %v151_v3 }
  0x12   :  { %89 = vmatpush.bf16.msra.mxu0 %v150_v4 }
  0x16   :  { %90 = vmatpush.bf16.msra.mxu0 %v149_v5 }
  0x1a   :  { %91 = vmatpush.bf16.msra.mxu0 %v148_v6 }
  0x1e   :  { %92 = vmatpush.bf16.msra.mxu0 %v147_v7 }
  0x21   :  { %93 = vmatmul.bf16.vlgmr.msra.gmra.mxu0 %v20_v8 }
  0x9e   :  { %v94_v10 = vpop.f32.mrf.mxu0 }
  0x9f   :  { %v108_v11 = vadd.f32 %v155_v9, %v94_v10 }
  0xa1   :  { %156 = vtanh.f32 %v108_v11 }
  0xa6   :  { %v96_v12 = vpop.f32.mrf.mxu0 }
  0xa7   :  { %v157_v13 = vpop.eup %156 }
  0xa8   :  { %110 = vst [vmem:[%s214_s3] sm:$0xff] %v157_v13 }

// kernel: tombert_with_resnet_forward.51
= control target key start
LH: loop header
LB: loop body
LE: loop exit
PB: predicated region body
PF: predicated region fallthrough
CT: control target
= control target key end

     0   :  { %s261_s1 = inlined_call_operand.vmem [shape: bf16[128,128], index: 1, kind: input, shape index: {}]   ;;  %s262_s2 = inlined_call_operand.vmem [shape: f32[1,128], index: 2, kind: input, shape index: {}]   ;;  %s263_s0 = inlined_call_operand.vmem [shape: bf16[24,128], index: 0, kind: input, shape index: {}]   ;;  %s264_s3 = inlined_call_operand.vmem [shape: f32[24,128], index: 3, kind: output, shape index: {}]  }
   0x1   :  { %v189_v0 = vld [vmem:[%s261_s1 + $0x38] sm:$0xff]  ;;  %v188_v1 = vld [vmem:[%s261_s1 + $0x30] sm:$0xff]  ;;  %v187_v2 = vld [vmem:[%s261_s1 + $0x28] sm:$0xff] }
   0x2   :  { %101 = vmatpush.bf16.msra.mxu0 %v189_v0  ;;  %190 = vmatpush.bf16.msra.mxu1 %v189_v0  ;;  %v186_v3 = vld [vmem:[%s261_s1 + $0x20] sm:$0xff]  ;;  %v185_v4 = vld [vmem:[%s261_s1 + $0x18] sm:$0xff]  ;;  %v184_v5 = vld [vmem:[%s261_s1 + $0x10] sm:$0xff] }
   0x3   :  { %v183_v6 = vld [vmem:[%s261_s1 + $0x8] sm:$0xff]  ;;  %v182_v9 = vld [vmem:[%s261_s1] sm:$0xff] }
   0x4   :  { %v26_v7 = vld [vmem:[%s263_s0 + $0x8] sm:$0xf]  ;;  %v181_v10 = vld [vmem:[%s263_s0] sm:$0xff] }
   0x5   :  { %v48_v8 = vunpack.c.l.b16 %v26_v7  ;;  %v198_v12 = vld [vmem:[%s262_s2] ss:$0 sm:$0xff] }
   0x6   :  { %102 = vmatpush.bf16.msra.mxu0 %v188_v1  ;;  %191 = vmatpush.bf16.msra.mxu1 %v188_v1 }
   0x7   :  { %v50_v11 = vpack.c.b16 %v48_v8, %v48_v8 }
   0xa   :  { %103 = vmatpush.bf16.msra.mxu0 %v187_v2  ;;  %192 = vmatpush.bf16.msra.mxu1 %v187_v2 }
   0xe   :  { %104 = vmatpush.bf16.msra.mxu0 %v186_v3  ;;  %193 = vmatpush.bf16.msra.mxu1 %v186_v3 }
  0x12   :  { %105 = vmatpush.bf16.msra.mxu0 %v185_v4  ;;  %194 = vmatpush.bf16.msra.mxu1 %v185_v4 }
  0x16   :  { %106 = vmatpush.bf16.msra.mxu0 %v184_v5  ;;  %195 = vmatpush.bf16.msra.mxu1 %v184_v5 }
  0x1a   :  { %107 = vmatpush.bf16.msra.mxu0 %v183_v6  ;;  %196 = vmatpush.bf16.msra.mxu1 %v183_v6 }
  0x1e   :  { %108 = vmatpush.bf16.msra.mxu0 %v182_v9  ;;  %197 = vmatpush.bf16.msra.mxu1 %v182_v9 }
  0x21   :  { %109 = vmatmul.bf16.vlgmr.msra.gmra.mxu0 %v181_v10  ;;  %114 = vmatmul.bf16.vlgmr.msra.gmra.mxu1 %v50_v11 }
  0x9e   :  { %v110_v13 = vpop.f32.mrf.mxu0  ;;  %v115_v14 = vpop.f32.mrf.mxu1 }
  0x9f   :  { %v135_v15 = vadd.f32 %v198_v12, %v110_v13  ;;  %v137_v16 = vadd.f32 %v198_v12, %v115_v14 }
  0xa1   :  { %138 = vst [vmem:[%s264_s3] sm:$0xff] %v135_v15 }
  0xa2   :  { %140 = vst [vmem:[%s264_s3 + $0x10] sm:$0xff] %v137_v16 }
  0xa6   :  { %v112_v17 = vpop.f32.mrf.mxu0  ;;  %v117_v18 = vpop.f32.mrf.mxu1 }
  0xa7   :  { %v136_v19 = vadd.f32 %v198_v12, %v112_v17 }
  0xa9   :  { %139 = vst [vmem:[%s264_s3 + $0x8] sm:$0xff] %v136_v19 }

// kernel: tombert_with_resnet_forward.52
= control target key start
LH: loop header
LB: loop body
LE: loop exit
PB: predicated region body
PF: predicated region fallthrough
CT: control target
= control target key end

     0   :  { %s728_s15 = smov 0   ;;  %s730_s16 = smov 0   ;;  %s801_s0 = inlined_call_operand.vmem [shape: bf16[8,16,8], index: 0, kind: input, shape index: {}]   ;;  %s802_s1 = inlined_call_operand.vmem [shape: bf16[8,16,8], index: 1, kind: input, shape index: {}]   ;;  %s803_s2 = inlined_call_operand.vmem [shape: bf16[8,16,8], index: 2, kind: input, shape index: {}]   ;;  %s804_s3 = inlined_call_operand.vmem [shape: f32[8,1,16], index: 3, kind: input, shape index: {}]   ;;  %s805_s4 = inlined_call_operand.vmem [shape: f32[8,16,8], index: 4, kind: output, shape index: {}]  }
   0x1   :  { %s732_s17 = smov 0  }
   0x2 LB: > { %s26_s18 = sadd.s32 1, %s694_s16  ;;  %p601_p0 = scmp.ge.s32.totalorder %s698_s17, 1  ;;  %s698_s17 = sphi %s732_s17, %s14_s17   ;;  %s694_s16 = sphi %s730_s16, %s807_s16   ;;  %s690_s15 = sphi %s728_s15, %s806_s15  }
   0x3   : > { %p28_p1 = scmp.ge.s32.totalorder %s26_s18, 8  ;;  %p221_p2 = scmp.lt.s32.totalorder %s698_s17, 9 }
   0x5   : > { %s809_s18 = smov (%p28_p1, %s26_s18), 0  ;;  %p222_p3 = pnand %p601_p0, %p221_p2 }
   0x6   : > { %p271_p4 = scmp.lt.s32.totalorder (!%p222_p3), %s690_s15, 7 }
   0x7   : > { %225 = sbr.rel (%p222_p3) target bundleno = 659 (0x293), region = 36 }
   0xc   : > { %vm317_vm0 = vcmask 64512   ;;  %v700_v0 = vmov 0.0   ;;  %s811_s15 = smov (!%p271_p4, %s690_s15), 7  ;;  %vm312_vm1 = vcmask 7168   ;;  %v701_v4 = vmov -1e+30  }
   0xd   : > { %318 = vst.msk [vmem:[#allocation4] sm:$0xff] %vm317_vm0, %v700_v0  ;;  %s751_s19 = sshll.u32 %s811_s15, 3  ;;  %s301_s28 = scalar_lea.vmem %s804_s3, %s811_s15  ;;  %vm365_vm2 = vcmask 130048   ;;  %v702_v14 = vmov 0  }
   0xe   : > { %319 = vst.msk [vmem:[#allocation4 + $0x8] sm:$0xff] %vm317_vm0, %v700_v0  ;;  %s284_s22 = scalar_lea.vmem %s802_s1, %s751_s19  ;;  %s275_s25 = scalar_lea.vmem %s801_s0, %s751_s19  ;;  %v663_v5 = vld [vmem:[%s301_s28] ss:$0 sm:$0xff]  ;;  %660 = vset.pattern.permute.xlu1 %v702_v14  ;;  %661 = vset.pattern.permute.xlu0 %v702_v14 }
   0xf   : > { %v631_v1 = vld [vmem:[%s284_s22] sm:$0xff]  ;;  %313 = vst.msk [vmem:[#allocation2] sm:$0xff] %vm312_vm1, %v701_v4  ;;  %662 = vset.pattern.permute.xlu2 %v702_v14  ;;  %s294_s5 = scalar_lea.vmem %s803_s2, %s751_s19  ;;  %s629_s6 = sshll.u32 %s811_s15, 4 }
  0x10   : > { %v339_v2 = vsel %vm317_vm0, %v631_v1, 0  ;;  %v630_v3 = vld [vmem:[%s275_s25] sm:$0xff]  ;;  %314 = vst.msk [vmem:[#allocation2 + $0x8] sm:$0xff] %vm312_vm1, %v701_v4  ;;  %s306_s9 = scalar_lea.vmem %s805_s4, %s629_s6 }
  0x11   : > { %348 = vmatpush.bf16.xpose.msra.mxu0 %v339_v2  ;;  %315 = vst.msk [vmem:[#allocation3] sm:$0xff] %vm312_vm1, %v700_v0  ;;  %v632_v27 = vld [vmem:[%s294_s5] sm:$0xff] }
  0x12   : > { %316 = vst.msk [vmem:[#allocation3 + $0x8] sm:$0xff] %vm312_vm1, %v700_v0  ;;  %450 = vmatpush.bf16.msra.mxu1 %v632_v27 }
  0x14   : > { %v411_v54 = vld [vmem:[#allocation4] sm:$0xff] }
  0x15   : > { %v412_v60 = vld [vmem:[#allocation4 + $0x8] sm:$0xff] }
  0x16   : > { %v363_v15 = vld [vmem:[#allocation2] sm:$0xff] }
  0x17   : > { %v364_v20 = vld [vmem:[#allocation2 + $0x8] sm:$0xff] }
  0x18   : > { %618 = vmatmul.msk.bf16.vlgmr.msra.gmra.mxu0 %vm317_vm0, %v630_v3  ;;  %v396_v43 = vld [vmem:[#allocation3] sm:$0xff] }
  0x19   : > { %v397_v47 = vld [vmem:[#allocation3 + $0x8] sm:$0xff] }
  0x95   : > { %v350_v6 = vpop.f32.mrf.mxu0 }
  0x96   : > { %v355_v7 = vmul.f32 0.35355338, %v350_v6 }
  0x98   : > { %v361_v8 = vadd.f32 %v663_v5, %v355_v7 }
  0x9a   : > { %v366_v9 = vsel %vm365_vm2, %v361_v8, -inf }
  0x9b   : > { %367 = vmax.xlane.f32.xlu0 %v366_v9 }
  0x9d   : > { %v352_v10 = vpop.f32.mrf.mxu0 }
  0x9e   : > { %v356_v11 = vmul.f32 0.35355338, %v352_v10 }
  0xa0   : > { %v362_v12 = vadd.f32 %v663_v5, %v356_v11 }
  0xa2   : > { %v369_v13 = vsel %vm365_vm2, %v362_v12, -inf }
  0xa3   : > { %370 = vmax.xlane.f32.xlu0 %v369_v13 }
 0x10e   : > { %v368_v16 = vpop.xlane.xlu0 %367 }
 0x10f   : > { %v372_v17 = vmax.f32 %v363_v15, %v368_v16 }
 0x111   : > { %v374_v18 = vsub.f32 %v363_v15, %v372_v17  ;;  %461 = vst.msk [vmem:[#allocation2] sm:$0xff] %vm312_vm1, %v372_v17  ;;  %382 = vperm.xlu1 %660, %v372_v17  }
 0x113   : > { %v376_v19 = vmul.f32 1.442695, %v374_v18 }
 0x115   : > { %664 = vpow2.f32 %v376_v19 }
 0x116   : > { %v371_v21 = vpop.xlane.xlu0 %370 }
 0x117   : > { %v373_v22 = vmax.f32 %v364_v20, %v371_v21 }
 0x119   : > { %v375_v23 = vsub.f32 %v364_v20, %v373_v22  ;;  %462 = vst.msk [vmem:[#allocation2 + $0x8] sm:$0xff] %vm312_vm1, %v373_v22  ;;  %387 = vperm.xlu1 %660, %v373_v22  }
 0x11b   : > { %v665_v24 = vpop.eup %664  ;;  %v378_v25 = vmul.f32 1.442695, %v375_v23 }
 0x11c   : > { %415 = vperm.xlu0 %661, %v665_v24   ;;  %v398_v44 = vmul.f32 %v665_v24, %v396_v43 }
 0x11d   : > { %666 = vpow2.f32 %v378_v25 }
 0x123   : > { %v667_v26 = vpop.eup %666 }
 0x124   : > { %420 = vperm.xlu1 %660, %v667_v26   ;;  %v399_v48 = vmul.f32 %v667_v26, %v397_v47 }
 0x183   : > { %v383_v28 = vpop.permute.xlu1 %382 }
 0x184   : > { %v390_v29 = vsub.f32 %v361_v8, %v383_v28 }
 0x186   : > { %v392_v30 = vmul.f32 1.442695, %v390_v29 }
 0x188   : > { %668 = vpow2.f32 %v392_v30 }
 0x18b   : > { %v388_v31 = vpop.permute.xlu1 %387 }
 0x18c   : > { %v391_v32 = vsub.f32 %v362_v12, %v388_v31 }
 0x18e   : > { %v669_v33 = vpop.eup %668  ;;  %v394_v34 = vmul.f32 1.442695, %v391_v32  ;;  %v416_v55 = vpop.permute.xlu0 %415 }
 0x18f   : > { %v400_v35 = vsel %vm365_vm2, %v669_v33, 0.0  ;;  %v425_v36 = vpack.c.bf16 %v669_v33, %v669_v33  ;;  %v423_v56 = vmul.f32 %v416_v55, %v411_v54 }
 0x190   : > { %670 = vpow2.f32 %v394_v34  ;;  %401 = vadd.xlane.f32.xlu2 %v400_v35 }
 0x191   : > { %v431_v40 = vunpack.c.l.b16 %v425_v36 }
 0x196   : > { %v671_v37 = vpop.eup %670  ;;  %v421_v61 = vpop.permute.xlu1 %420 }
 0x197   : > { %v403_v38 = vsel %vm365_vm2, %v671_v37, 0.0  ;;  %v426_v39 = vpack.c.bf16 %v671_v37, %v671_v37  ;;  %v424_v62 = vmul.f32 %v421_v61, %v412_v60 }
 0x198   : > { %404 = vadd.xlane.f32.xlu2 %v403_v38 }
 0x199   : > { %v432_v41 = vunpack.c.l.b16 %v426_v39 }
 0x19b   : > { %v433_v42 = vpack.c.b16 %v432_v41, %v431_v40 }
 0x19d   : > { %623 = vmatmul.msk.bf16.vlgmr.msra.gmra.mxu1 %vm365_vm2, %v433_v42 }
 0x203   : > { %v402_v45 = vpop.xlane.xlu2 %401 }
 0x204   : > { %v406_v46 = vadd.f32 %v402_v45, %v398_v44 }
 0x206   : > { %409 = vst.msk [vmem:[#allocation3] sm:$0xff] %vm312_vm1, %v406_v46 }
 0x20b   : > { %v405_v49 = vpop.xlane.xlu2 %404 }
 0x20c   : > { %v407_v50 = vadd.f32 %v405_v49, %v399_v48 }
 0x20d   : > { %v468_v51 = vld [vmem:[#allocation3] sm:$0xff] }
 0x20e   : > { %410 = vst.msk [vmem:[#allocation3 + $0x8] sm:$0xff] %vm312_vm1, %v407_v50  ;;  %672 = vrcp.f32 %v468_v51 }
 0x214   : > { %v673_v52 = vpop.eup %672 }
 0x215   : > { %474 = vperm.xlu2 %662, %v673_v52   ;;  %v469_v53 = vld [vmem:[#allocation3 + $0x8] sm:$0xff] }
 0x216   : > { %674 = vrcp.f32 %v469_v53 }
 0x21a   : > { %v452_v57 = vpop.f32.mrf.mxu1 }
 0x21b   : > { %v457_v58 = vadd.f32 %v452_v57, %v423_v56 }
 0x21c   : > { %v675_v59 = vpop.eup %674 }
 0x21d   : > { %459 = vst.msk [vmem:[#allocation4] sm:$0xff] %vm317_vm0, %v457_v58  ;;  %479 = vperm.xlu1 %660, %v675_v59  }
 0x222   : > { %v454_v63 = vpop.f32.mrf.mxu1 }
 0x223   : > { %v458_v0 = vadd.f32 %v454_v63, %v424_v62 }
 0x224   : > { %v466_v2 = vld [vmem:[#allocation4] sm:$0xff] }
 0x225   : > { %460 = vst.msk [vmem:[#allocation4 + $0x8] sm:$0xff] %vm317_vm0, %v458_v0 }
 0x22c   : > { %v467_v4 = vld [vmem:[#allocation4 + $0x8] sm:$0xff] }
 0x26f   : > { %v475_v1 = vpop.permute.xlu2 %474 }
 0x270   : > { %v482_v3 = vmul.f32 %v475_v1, %v466_v2 }
 0x272   : > { %484 = vst.msk [vmem:[%s306_s9] sm:$0xff] %vm317_vm0, %v482_v3 }
 0x28f   : > { %v480_v5 = vpop.permute.xlu1 %479 }
 0x290   : > { %v483_v6 = vmul.f32 %v480_v5, %v467_v4 }
 0x292   : > { %485 = vst.msk [vmem:[%s306_s9 + $0x8] sm:$0xff] %vm317_vm0, %v483_v6 }
 0x293 PF: > { %s14_s17 = sadd.s32 1, %s698_s17   ;;  %s806_s15 = smov %s694_s16 }
 0x294   : > { %p11_p5 = scmp.ge.s32.totalorder %s14_s17, 10   ;;  %s807_s16 = smov %s809_s18 }
 0x296   :  { %13 = sbr.rel (!%p11_p5) target bundleno = 2 (0x2), region = 83 }

// kernel: tombert_with_resnet_forward.53
= control target key start
LH: loop header
LB: loop body
LE: loop exit
PB: predicated region body
PF: predicated region fallthrough
CT: control target
= control target key end

     0   :  { %v153_v12 = vlaneseq  ;;  %s403_s1 = inlined_call_operand.vmem [shape: bf16[128,128], index: 1, kind: input, shape index: {}]   ;;  %s404_s2 = inlined_call_operand.vmem [shape: f32[1,128], index: 2, kind: input, shape index: {}]   ;;  %s405_s0 = inlined_call_operand.vmem [shape: bf16[24,128], index: 0, kind: input, shape index: {}]   ;;  %s406_s3 = inlined_call_operand.vmem [shape: f32[24,128], index: 3, kind: input, shape index: {}]   ;;  %s407_s4 = inlined_call_operand.vmem [shape: f32[1,128], index: 4, kind: input, shape index: {}]   ;;  %s408_s5 = inlined_call_operand.vmem [shape: f32[1,128], index: 5, kind: input, shape index: {}]   ;;  %s409_s6 = inlined_call_operand.vmem [shape: f32[24,128], index: 6, kind: output, shape index: {}]  }
   0x1   :  { %v287_v0 = vld [vmem:[%s403_s1 + $0x38] sm:$0xff]  ;;  %v286_v1 = vld [vmem:[%s403_s1 + $0x30] sm:$0xff]  ;;  %v285_v2 = vld [vmem:[%s403_s1 + $0x28] sm:$0xff] }
   0x2   :  { %110 = vmatpush.bf16.msra.mxu0 %v287_v0  ;;  %288 = vmatpush.bf16.msra.mxu1 %v287_v0  ;;  %v284_v3 = vld [vmem:[%s403_s1 + $0x20] sm:$0xff]  ;;  %v283_v4 = vld [vmem:[%s403_s1 + $0x18] sm:$0xff]  ;;  %v282_v5 = vld [vmem:[%s403_s1 + $0x10] sm:$0xff]  ;;  %v154_v14 = vand.u32 127, %v153_v12 }
   0x3   :  { %v281_v6 = vld [vmem:[%s403_s1 + $0x8] sm:$0xff]  ;;  %v280_v9 = vld [vmem:[%s403_s1] sm:$0xff]  ;;  %v149_v17 = vld [vmem:[%s406_s3 + $0x10] sm:$0xff] }
   0x4   :  { %v35_v7 = vld [vmem:[%s405_s0 + $0x8] sm:$0xf]  ;;  %v279_v10 = vld [vmem:[%s405_s0] sm:$0xff]  ;;  %vm155_vm0 = vcmp.lt.s32.totalorder %v154_v14, 32 }
   0x5   :  { %v57_v8 = vunpack.c.l.b16 %v35_v7  ;;  %v296_v13 = vld [vmem:[%s404_s2] ss:$0 sm:$0xff]  ;;  %v148_v26 = vld [vmem:[%s406_s3 + $0x8] sm:$0xff] }
   0x6   :  { %111 = vmatpush.bf16.msra.mxu0 %v286_v1  ;;  %289 = vmatpush.bf16.msra.mxu1 %v286_v1  ;;  %v147_v18 = vld [vmem:[%s406_s3] sm:$0xff] }
   0x7   :  { %v59_v11 = vpack.c.b16 %v57_v8, %v57_v8  ;;  %v297_v63 = vld [vmem:[%s407_s4] ss:$0 sm:$0xff] }
   0xa   :  { %112 = vmatpush.bf16.msra.mxu0 %v285_v2  ;;  %290 = vmatpush.bf16.msra.mxu1 %v285_v2  ;;  %v298_v2 = vld [vmem:[%s408_s5] ss:$0 sm:$0xff] }
   0xe   :  { %113 = vmatpush.bf16.msra.mxu0 %v284_v3  ;;  %291 = vmatpush.bf16.msra.mxu1 %v284_v3 }
  0x12   :  { %114 = vmatpush.bf16.msra.mxu0 %v283_v4  ;;  %292 = vmatpush.bf16.msra.mxu1 %v283_v4 }
  0x16   :  { %115 = vmatpush.bf16.msra.mxu0 %v282_v5  ;;  %293 = vmatpush.bf16.msra.mxu1 %v282_v5 }
  0x1a   :  { %116 = vmatpush.bf16.msra.mxu0 %v281_v6  ;;  %294 = vmatpush.bf16.msra.mxu1 %v281_v6 }
  0x1e   :  { %117 = vmatpush.bf16.msra.mxu0 %v280_v9  ;;  %295 = vmatpush.bf16.msra.mxu1 %v280_v9 }
  0x21   :  { %118 = vmatmul.bf16.vlgmr.msra.gmra.mxu0 %v279_v10  ;;  %123 = vmatmul.bf16.vlgmr.msra.gmra.mxu1 %v59_v11 }
  0x9e   :  { %v119_v15 = vpop.f32.mrf.mxu0  ;;  %v124_v16 = vpop.f32.mrf.mxu1 }
  0x9f   :  { %v144_v19 = vadd.f32 %v296_v13, %v119_v15  ;;  %v146_v20 = vadd.f32 %v296_v13, %v124_v16 }
  0xa1   :  { %v152_v21 = vadd.f32 %v149_v17, %v146_v20  ;;  %v150_v22 = vadd.f32 %v147_v18, %v144_v19 }
  0xa3   :  { %v158_v23 = vsel %vm155_vm0, %v152_v21, 0.0  ;;  %v156_v24 = vsel %vm155_vm0, %v150_v22, 0.0 }
  0xa4   :  { %163 = vadd.xlane.f32.xlu1 %v158_v23  ;;  %159 = vadd.xlane.f32.xlu0 %v156_v24 }
  0xa6   :  { %v121_v25 = vpop.f32.mrf.mxu0  ;;  %v126_v27 = vpop.f32.mrf.mxu1 }
  0xa7   :  { %v145_v28 = vadd.f32 %v296_v13, %v121_v25 }
  0xa9   :  { %v151_v29 = vadd.f32 %v148_v26, %v145_v28 }
  0xab   :  { %v157_v30 = vsel %vm155_vm0, %v151_v29, 0.0 }
  0xac   :  { %161 = vadd.xlane.f32.xlu0 %v157_v30 }
 0x117   :  { %v160_v31 = vpop.xlane.xlu0 %159  ;;  %v164_v36 = vpop.xlane.xlu1 %163 }
 0x118   :  { %v165_v32 = vmul.f32 0.03125, %v160_v31  ;;  %v167_v39 = vmul.f32 0.03125, %v164_v36 }
 0x11a   :  { %v168_v33 = vsub.f32 %v150_v22, %v165_v32  ;;  %v170_v43 = vsub.f32 %v152_v21, %v167_v39 }
 0x11c   :  { %v171_v34 = vsel %vm155_vm0, %v168_v33, 0.0  ;;  %v173_v44 = vsel %vm155_vm0, %v170_v43, 0.0 }
 0x11d   :  { %v174_v35 = vmul.f32 %v171_v34, %v171_v34  ;;  %v176_v45 = vmul.f32 %v173_v44, %v173_v44 }
 0x11f   :  { %177 = vadd.xlane.f32.xlu1 %v174_v35  ;;  %v162_v37 = vpop.xlane.xlu0 %161 }
 0x120   :  { %v166_v38 = vmul.f32 0.03125, %v162_v37 }
 0x122   :  { %v169_v40 = vsub.f32 %v151_v29, %v166_v38 }
 0x124   :  { %v172_v41 = vsel %vm155_vm0, %v169_v40, 0.0 }
 0x125   :  { %v175_v42 = vmul.f32 %v172_v41, %v172_v41 }
 0x127   :  { %179 = vadd.xlane.f32.xlu2 %v175_v42 }
 0x12f   :  { %181 = vadd.xlane.f32.xlu2 %v176_v45 }
 0x192   :  { %v178_v46 = vpop.xlane.xlu1 %177 }
 0x193   :  { %v183_v47 = vmul.f32 0.03125, %v178_v46 }
 0x195   :  { %v186_v48 = vadd.f32 1e-12, %v183_v47 }
 0x197   :  { %299 = vrsqrt.f32 %v186_v48  ;;  %vm195_vm2 = vweird.f32 %v186_v48 }
 0x19a   :  { %v180_v49 = vpop.xlane.xlu2 %179 }
 0x19b   :  { %v184_v50 = vmul.f32 0.03125, %v180_v49 }
 0x19d   :  { %v300_v51 = vpop.eup %299  ;;  %v187_v52 = vadd.f32 1e-12, %v184_v50 }
 0x19e   :  { %v190_v53 = vmul.f32 %v300_v51, %v186_v48  ;;  %vm196_vm1 = vweird.f32 %v300_v51 }
 0x19f   :  { %301 = vrsqrt.f32 %v187_v52  ;;  %vm197_vm3 = vmor %vm195_vm2, %vm196_vm1  ;;  %vm205_vm5 = vweird.f32 %v187_v52 }
 0x1a0   :  { %v191_v54 = vmul.f32 %v300_v51, %v190_v53 }
 0x1a2   :  { %v192_v55 = vmul.f32 0.5, %v191_v54  ;;  %v182_v56 = vpop.xlane.xlu2 %181 }
 0x1a3   :  { %v185_v57 = vmul.f32 0.03125, %v182_v56 }
 0x1a4   :  { %v193_v58 = vsub.f32 1.5, %v192_v55 }
 0x1a5   :  { %v302_v59 = vpop.eup %301  ;;  %v188_v60 = vadd.f32 1e-12, %v185_v57 }
 0x1a6   :  { %v194_v61 = vmul.f32 %v300_v51, %v193_v58  ;;  %v200_v62 = vmul.f32 %v302_v59, %v187_v52  ;;  %vm206_vm4 = vweird.f32 %v302_v59 }
 0x1a7   :  { %303 = vrsqrt.f32 %v188_v60  ;;  %vm207_vm6 = vmor %vm205_vm5, %vm206_vm4  ;;  %vm215_vm8 = vweird.f32 %v188_v60 }
 0x1a8   :  { %v198_v0 = vsel %vm197_vm3, %v300_v51, %v194_v61  ;;  %v201_v1 = vmul.f32 %v302_v59, %v200_v62 }
 0x1a9   :  { %v219_v3 = vmul.f32 %v198_v0, %v171_v34 }
 0x1aa   :  { %v202_v4 = vmul.f32 0.5, %v201_v1 }
 0x1ab   :  { %v226_v5 = vmul.f32 %v297_v63, %v219_v3 }
 0x1ac   :  { %v203_v6 = vsub.f32 1.5, %v202_v4 }
 0x1ad   :  { %v304_v7 = vpop.eup %303  ;;  %v233_v8 = vadd.f32 %v298_v2, %v226_v5 }
 0x1ae   :  { %v204_v9 = vmul.f32 %v302_v59, %v203_v6  ;;  %v210_v10 = vmul.f32 %v304_v7, %v188_v60  ;;  %vm216_vm7 = vweird.f32 %v304_v7 }
 0x1af   :  { %236 = vst [vmem:[%s409_s6] sm:$0xff] %v233_v8  ;;  %vm217_vm9 = vmor %vm215_vm8, %vm216_vm7 }
 0x1b0   :  { %v208_v11 = vsel %vm207_vm6, %v302_v59, %v204_v9  ;;  %v211_v12 = vmul.f32 %v304_v7, %v210_v10 }
 0x1b1   :  { %v220_v13 = vmul.f32 %v208_v11, %v172_v41 }
 0x1b2   :  { %v212_v14 = vmul.f32 0.5, %v211_v12 }
 0x1b3   :  { %v227_v15 = vmul.f32 %v297_v63, %v220_v13 }
 0x1b4   :  { %v213_v16 = vsub.f32 1.5, %v212_v14 }
 0x1b5   :  { %v234_v17 = vadd.f32 %v298_v2, %v227_v15 }
 0x1b6   :  { %v214_v18 = vmul.f32 %v304_v7, %v213_v16 }
 0x1b7   :  { %237 = vst [vmem:[%s409_s6 + $0x8] sm:$0xff] %v234_v17 }
 0x1b8   :  { %v218_v19 = vsel %vm217_vm9, %v304_v7, %v214_v18 }
 0x1b9   :  { %v221_v20 = vmul.f32 %v218_v19, %v173_v44 }
 0x1bb   :  { %v228_v21 = vmul.f32 %v297_v63, %v221_v20 }
 0x1bd   :  { %v235_v22 = vadd.f32 %v298_v2, %v228_v21 }
 0x1bf   :  { %238 = vst [vmem:[%s409_s6 + $0x10] sm:$0xff] %v235_v22 }

// kernel: tombert_with_resnet_forward.54
= control target key start
LH: loop header
LB: loop body
LE: loop exit
PB: predicated region body
PF: predicated region fallthrough
CT: control target
= control target key end

     0   :  { %s294_s1 = inlined_call_operand.vmem [shape: bf16[128,128], index: 1, kind: input, shape index: {}]   ;;  %s295_s2 = inlined_call_operand.vmem [shape: f32[1,128], index: 2, kind: input, shape index: {}]   ;;  %s296_s0 = inlined_call_operand.vmem [shape: bf16[24,128], index: 0, kind: input, shape index: {}]   ;;  %s297_s3 = inlined_call_operand.vmem [shape: f32[24,128], index: 3, kind: output, shape index: {}]  }
   0x1   :  { %v216_v0 = vld [vmem:[%s294_s1 + $0x38] sm:$0xff]  ;;  %v215_v1 = vld [vmem:[%s294_s1 + $0x30] sm:$0xff]  ;;  %v214_v2 = vld [vmem:[%s294_s1 + $0x28] sm:$0xff] }
   0x2   :  { %101 = vmatpush.bf16.msra.mxu0 %v216_v0  ;;  %217 = vmatpush.bf16.msra.mxu1 %v216_v0  ;;  %v213_v3 = vld [vmem:[%s294_s1 + $0x20] sm:$0xff]  ;;  %v212_v4 = vld [vmem:[%s294_s1 + $0x18] sm:$0xff]  ;;  %v211_v5 = vld [vmem:[%s294_s1 + $0x10] sm:$0xff] }
   0x3   :  { %v210_v6 = vld [vmem:[%s294_s1 + $0x8] sm:$0xff]  ;;  %v209_v9 = vld [vmem:[%s294_s1] sm:$0xff] }
   0x4   :  { %v26_v7 = vld [vmem:[%s296_s0 + $0x8] sm:$0xf]  ;;  %v208_v10 = vld [vmem:[%s296_s0] sm:$0xff] }
   0x5   :  { %v48_v8 = vunpack.c.l.b16 %v26_v7  ;;  %v225_v12 = vld [vmem:[%s295_s2] ss:$0 sm:$0xff] }
   0x6   :  { %102 = vmatpush.bf16.msra.mxu0 %v215_v1  ;;  %218 = vmatpush.bf16.msra.mxu1 %v215_v1 }
   0x7   :  { %v50_v11 = vpack.c.b16 %v48_v8, %v48_v8 }
   0xa   :  { %103 = vmatpush.bf16.msra.mxu0 %v214_v2  ;;  %219 = vmatpush.bf16.msra.mxu1 %v214_v2 }
   0xe   :  { %104 = vmatpush.bf16.msra.mxu0 %v213_v3  ;;  %220 = vmatpush.bf16.msra.mxu1 %v213_v3 }
  0x12   :  { %105 = vmatpush.bf16.msra.mxu0 %v212_v4  ;;  %221 = vmatpush.bf16.msra.mxu1 %v212_v4 }
  0x16   :  { %106 = vmatpush.bf16.msra.mxu0 %v211_v5  ;;  %222 = vmatpush.bf16.msra.mxu1 %v211_v5 }
  0x1a   :  { %107 = vmatpush.bf16.msra.mxu0 %v210_v6  ;;  %223 = vmatpush.bf16.msra.mxu1 %v210_v6 }
  0x1e   :  { %108 = vmatpush.bf16.msra.mxu0 %v209_v9  ;;  %224 = vmatpush.bf16.msra.mxu1 %v209_v9 }
  0x21   :  { %109 = vmatmul.bf16.vlgmr.msra.gmra.mxu0 %v208_v10  ;;  %114 = vmatmul.bf16.vlgmr.msra.gmra.mxu1 %v50_v11 }
  0x9e   :  { %v110_v13 = vpop.f32.mrf.mxu0  ;;  %v115_v14 = vpop.f32.mrf.mxu1 }
  0x9f   :  { %v135_v15 = vadd.f32 %v225_v12, %v110_v13  ;;  %v137_v16 = vadd.f32 %v225_v12, %v115_v14 }
  0xa1   :  { %v141_v17 = vmul.f32 %v135_v15, %v135_v15  ;;  %v143_v18 = vmul.f32 %v137_v16, %v137_v16  ;;  %v138_v37 = vmul.f32 0.5, %v135_v15  ;;  %v140_v39 = vmul.f32 0.5, %v137_v16 }
  0xa3   :  { %v144_v19 = vmul.f32 %v141_v17, %v135_v15  ;;  %v146_v20 = vmul.f32 %v143_v18, %v137_v16 }
  0xa5   :  { %v147_v21 = vmul.f32 0.044715, %v144_v19  ;;  %v149_v22 = vmul.f32 0.044715, %v146_v20 }
  0xa6   :  { %v112_v23 = vpop.f32.mrf.mxu0  ;;  %v117_v24 = vpop.f32.mrf.mxu1 }
  0xa7   :  { %v150_v25 = vadd.f32 %v147_v21, %v135_v15  ;;  %v152_v26 = vadd.f32 %v149_v22, %v137_v16  ;;  %v136_v27 = vadd.f32 %v225_v12, %v112_v23 }
  0xa9   :  { %v153_v28 = vmul.f32 0.7978846, %v150_v25  ;;  %v155_v29 = vmul.f32 0.7978846, %v152_v26  ;;  %v142_v30 = vmul.f32 %v136_v27, %v136_v27  ;;  %v139_v44 = vmul.f32 0.5, %v136_v27 }
  0xab   :  { %226 = vtanh.f32 %v153_v28  ;;  %v145_v31 = vmul.f32 %v142_v30, %v136_v27 }
  0xac   :  { %228 = vtanh.f32 %v155_v29 }
  0xad   :  { %v148_v32 = vmul.f32 0.044715, %v145_v31 }
  0xaf   :  { %v151_v33 = vadd.f32 %v148_v32, %v136_v27 }
  0xb1   :  { %v227_v34 = vpop.eup %226  ;;  %v154_v35 = vmul.f32 0.7978846, %v151_v33 }
  0xb2   :  { %v229_v36 = vpop.eup %228  ;;  %v159_v38 = vadd.f32 1.0, %v227_v34 }
  0xb3   :  { %v161_v40 = vadd.f32 1.0, %v229_v36  ;;  %230 = vtanh.f32 %v154_v35 }
  0xb4   :  { %v162_v41 = vmul.f32 %v159_v38, %v138_v37 }
  0xb5   :  { %v164_v42 = vmul.f32 %v161_v40, %v140_v39 }
  0xb6   :  { %165 = vst [vmem:[%s297_s3] sm:$0xff] %v162_v41 }
  0xb7   :  { %167 = vst [vmem:[%s297_s3 + $0x10] sm:$0xff] %v164_v42 }
  0xb9   :  { %v231_v43 = vpop.eup %230 }
  0xba   :  { %v160_v45 = vadd.f32 1.0, %v231_v43 }
  0xbc   :  { %v163_v46 = vmul.f32 %v160_v45, %v139_v44 }
  0xbe   :  { %166 = vst [vmem:[%s297_s3 + $0x8] sm:$0xff] %v163_v46 }

// kernel: tombert_with_resnet_forward.57
= control target key start
LH: loop header
LB: loop body
LE: loop exit
PB: predicated region body
PF: predicated region fallthrough
CT: control target
= control target key end

     0   :  { %s208_s1 = inlined_call_operand.vmem [shape: bf16[128,128], index: 1, kind: input, shape index: {}]   ;;  %s209_s2 = inlined_call_operand.vmem [shape: f32[1,128], index: 2, kind: input, shape index: {}]   ;;  %s210_s0 = inlined_call_operand.vmem [shape: bf16[8,128], index: 0, kind: input, shape index: {}]   ;;  %s211_s3 = inlined_call_operand.vmem [shape: f32[8,128], index: 3, kind: output, shape index: {}]  }
   0x1   :  { %v153_v0 = vld [vmem:[%s208_s1 + $0x38] sm:$0xff]  ;;  %v152_v1 = vld [vmem:[%s208_s1 + $0x30] sm:$0xff]  ;;  %v151_v2 = vld [vmem:[%s208_s1 + $0x28] sm:$0xff] }
   0x2   :  { %85 = vmatpush.bf16.msra.mxu0 %v153_v0  ;;  %v150_v3 = vld [vmem:[%s208_s1 + $0x20] sm:$0xff]  ;;  %v149_v4 = vld [vmem:[%s208_s1 + $0x18] sm:$0xff]  ;;  %v148_v5 = vld [vmem:[%s208_s1 + $0x10] sm:$0xff] }
   0x3   :  { %v147_v6 = vld [vmem:[%s208_s1 + $0x8] sm:$0xff]  ;;  %v146_v7 = vld [vmem:[%s208_s1] sm:$0xff] }
   0x4   :  { %v20_v8 = vld [vmem:[%s210_s0] sm:$0xf] }
   0x5   :  { %v154_v9 = vld [vmem:[%s209_s2] ss:$0 sm:$0xff] }
   0x6   :  { %86 = vmatpush.bf16.msra.mxu0 %v152_v1 }
   0xa   :  { %87 = vmatpush.bf16.msra.mxu0 %v151_v2 }
   0xe   :  { %88 = vmatpush.bf16.msra.mxu0 %v150_v3 }
  0x12   :  { %89 = vmatpush.bf16.msra.mxu0 %v149_v4 }
  0x16   :  { %90 = vmatpush.bf16.msra.mxu0 %v148_v5 }
  0x1a   :  { %91 = vmatpush.bf16.msra.mxu0 %v147_v6 }
  0x1e   :  { %92 = vmatpush.bf16.msra.mxu0 %v146_v7 }
  0x21   :  { %93 = vmatmul.bf16.vlgmr.msra.gmra.mxu0 %v20_v8 }
  0x9e   :  { %v94_v10 = vpop.f32.mrf.mxu0 }
  0x9f   :  { %v108_v11 = vadd.f32 %v154_v9, %v94_v10 }
  0xa1   :  { %109 = vst [vmem:[%s211_s3] sm:$0xff] %v108_v11 }
  0xa6   :  { %v96_v12 = vpop.f32.mrf.mxu0 }

</bundles_post_ra>
